<compile_context>
chip_gen: v7x
topology: tpu7x:2x2x1
jax: 0.10.0
libtpu: 0.0.40
codegen_flags: <defaults>
</compile_context>

<pallas_src>
import functools

import jax
import jax.numpy as jnp
from jax.experimental import pallas as pl
from jax.experimental.pallas import tpu as pltpu


def _round_up(x, m):
    return (x + m - 1) // m * m


def char_bilstm_kernel(x_ref, xlast_ref, len_ref,
                       wih_f_ref, whh_f_ref, b_f_ref,
                       wih_b_ref, b_b_ref,
                       out_ref, *, T, BB, H, unroll):
    """One batch-block (BB sequences) of the CharBiLSTM forward.

    x_ref    : [T*BB, E] time-major embedded chars for this block
    xlast_ref: [BB, E]   embedded char at position len-1 of each sequence
    len_ref  : [BB, 1]   int32 sequence lengths
    w*_f     : forward-direction LSTM params ([E,4H], [H,4H], [1,4H])
    w*_b     : backward-direction params ([E,4H], [1,4H])  (W_hh_b not needed)
    out_ref  : [BB, 2H]  gathered BiLSTM output (forward ++ backward halves)
    """
    cd = x_ref.dtype                       # MXU operand dtype (f32 or bf16)
    wih = wih_f_ref[...]
    whh = whh_f_ref[...]                   # loop-invariant MXU RHS
    b_f = b_f_ref[...]                     # f32
    lens = len_ref[...]                    # [BB, 1] int32

    # Forward recurrence.  Per step: fused input+hidden gate projection
    # (two dots, f32 accumulation), one batched sigmoid over all 4 gates,
    # tanh only on the g slice, and on-the-fly capture of h at t == len-1.
    def step(t, carry):
        h, c, h_last = carry
        row = pl.multiple_of(t * BB, BB)                  # sublane-aligned slab
        x_t = x_ref[pl.ds(row, BB), :]
        gates = (jnp.dot(x_t, wih, preferred_element_type=jnp.float32)
                 + jnp.dot(h.astype(cd), whh, preferred_element_type=jnp.float32)
                 + b_f)
        sg = jax.nn.sigmoid(gates)                        # one full-vreg EUP pass
        i_g = sg[:, 0 * H:1 * H]
        f_g = sg[:, 1 * H:2 * H]
        o_g = sg[:, 3 * H:4 * H]
        g_g = jnp.tanh(gates[:, 2 * H:3 * H])
        c = f_g * c + i_g * g_g
        h = o_g * jnp.tanh(c)
        h_last = jnp.where(lens == t + 1, h, h_last)
        return h, c, h_last

    z = jnp.zeros((BB, H), jnp.float32)
    _, _, h_fwd = jax.lax.fori_loop(0, T, step, (z, z, z), unroll=unroll)

    # Backward half gathered at position len-1: exactly one reverse-LSTM cell
    # step on the last valid token from zero state (see module docstring).
    gb = (jnp.dot(xlast_ref[...], wih_b_ref[...],
                  preferred_element_type=jnp.float32) + b_b_ref[...])
    sb = jax.nn.sigmoid(gb)
    cb = sb[:, 0 * H:1 * H] * jnp.tanh(gb[:, 2 * H:3 * H])
    hb = sb[:, 3 * H:4 * H] * jnp.tanh(cb)

    # Single lane-dense [BB, 2H] store (2H = 128 lanes -> unmasked vst).
    out_ref[...] = jnp.concatenate([h_fwd, hb], axis=-1).astype(out_ref.dtype)


def char_bilstm_pallas(emb_table, char_input, char_lengths, params, *,
                       block_b=64, compute_dtype=jnp.float32):
    B, T = char_input.shape
    E = emb_table.shape[1]
    Hd = params["w_hh_f"].shape[0]
    G = 4 * Hd

    # Correctness guard: packed-sequence semantics require 1 <= len <= T.
    lengths = jnp.clip(char_lengths.astype(jnp.int32), 1, T)

    # Effective batch block: <= block_b (~64 is the vreg-pressure sweet spot),
    # a multiple of 8 (sublane tile).  Batch is padded to a multiple of it.
    # NOTE(v7x): prefer a block_b that makes nb even so the "parallel" grid
    # axis shards across both TensorCores; on v5e/v6e (1 TC) fewer, larger
    # blocks are strictly better.
    bb = max(8, (min(block_b, _round_up(B, 8)) // 8) * 8)
    B_pad = _round_up(B, bb)
    nb = B_pad // bb

    # Glue (embedding gather, padding, time-major layout) — no MXU work here.
    x = jnp.take(emb_table, char_input, axis=0).astype(compute_dtype)  # [B,T,E]
    if B_pad != B:
        x = jnp.pad(x, ((0, B_pad - B), (0, 0), (0, 0)))
        lengths = jnp.pad(lengths, (0, B_pad - B), constant_values=1)
    x_last = x[jnp.arange(B_pad), lengths - 1]                         # [B_pad,E]
    # Per batch-block, time-major slab so each timestep is a contiguous,
    # sublane-aligned group of bb rows at row t*bb inside the kernel.
    x_blk = (x.reshape(nb, bb, T, E)
               .transpose(0, 2, 1, 3)
               .reshape(nb, T * bb, E))
    len2d = lengths.reshape(B_pad, 1)

    # MXU operands (x and weight tables) in compute_dtype (bf16 halves HBM
    # traffic and doubles MXU ingest); biases, state and accumulation in f32.
    wih_f = params["w_ih_f"].astype(compute_dtype)
    whh_f = params["w_hh_f"].astype(compute_dtype)
    wih_b = params["w_ih_b"].astype(compute_dtype)
    b_f = params["b_f"].astype(jnp.float32)
    b_b = params["b_b"].astype(jnp.float32)

    isz = jnp.dtype(compute_dtype).itemsize
    # VMEM budget (v7x has 64 MiB total / 32 MiB scoped default): inputs are
    # double-buffered; no kernel scratch anymore (xp scratch was deleted).
    block_bytes = (2 * (T * bb * E + bb * E) * isz       # x_blk + x_last (x2)
                   + 2 * bb * 4                          # lengths (x2)
                   + (2 * E * G + Hd * G) * isz + 2 * G * 4   # weights + biases
                   + 2 * bb * 2 * Hd * 4)                # output (x2)
    vmem_limit = int(min(48 << 20, max(16 << 20, 4 * block_bytes)))

    flops = 2 * B_pad * T * (E + Hd) * G + 2 * B_pad * E * G
    transcendentals = 6 * Hd * B_pad * (T + 1)
    bytes_accessed = (isz * (x_blk.size + x_last.size + 2 * E * G + Hd * G)
                      + 4 * (len2d.size + 2 * G + B_pad * 2 * Hd))

    unroll = True if T <= 32 else 8    # full unroll only for short sequences

    kernel = functools.partial(char_bilstm_kernel, T=T, BB=bb, H=Hd,
                               unroll=unroll)
    out = pl.pallas_call(
        kernel,
        out_shape=jax.ShapeDtypeStruct((B_pad, 2 * Hd), jnp.float32),
        grid=(nb,),
        in_specs=[
            pl.BlockSpec((None, T * bb, E), lambda i: (i, 0, 0)),  # x (time-major)
            pl.BlockSpec((bb, E), lambda i: (i, 0)),               # x_last
            pl.BlockSpec((bb, 1), lambda i: (i, 0)),               # lengths
            pl.BlockSpec((E, G), lambda i: (0, 0)),                # w_ih_f
            pl.BlockSpec((Hd, G), lambda i: (0, 0)),               # w_hh_f
            pl.BlockSpec((1, G), lambda i: (0, 0)),                # b_f
            pl.BlockSpec((E, G), lambda i: (0, 0)),                # w_ih_b
            pl.BlockSpec((1, G), lambda i: (0, 0)),                # b_b
        ],
        out_specs=pl.BlockSpec((bb, 2 * Hd), lambda i: (i, 0)),
        compiler_params=pltpu.CompilerParams(
            dimension_semantics=("parallel",),
            vmem_limit_bytes=vmem_limit,
        ),
        cost_estimate=pl.CostEstimate(
            flops=flops, transcendentals=transcendentals,
            bytes_accessed=bytes_accessed),
    )(x_blk, x_last, len2d, wih_f, whh_f, b_f, wih_b, b_b)
    return out[:B]


# ----------------------------------------------------------------------------
# Pure-JAX reference: a faithful port of the PyTorch module (full bidirectional
# LSTM over packed sequences, then gather at position len-1).
# ----------------------------------------------------------------------------
def _lstm_cell(x_t, h, c, w_ih, w_hh, b):
    gates = x_t @ w_ih + h @ w_hh + b
    i, f, g, o = jnp.split(gates, 4, axis=-1)
    c_new = jax.nn.sigmoid(f) * c + jax.nn.sigmoid(i) * jnp.tanh(g)
    h_new = jax.nn.sigmoid(o) * jnp.tanh(c_new)
    return h_new, c_new


def char_bilstm_reference(emb_table, char_input, char_lengths, params):
    x = emb_table[char_input]                             # [B, T, E]
    B, T, _ = x.shape
    Hd = params["w_hh_f"].shape[0]
    lengths = char_lengths.astype(jnp.int32)
    z = jnp.zeros((B, Hd), jnp.float32)

    # Forward direction.
    def fstep(carry, x_t):
        h, c = _lstm_cell(x_t, carry[0], carry[1],
                          params["w_ih_f"], params["w_hh_f"], params["b_f"])
        return (h, c), h
    _, hs_f = jax.lax.scan(fstep, (z, z), jnp.swapaxes(x, 0, 1))
    hs_f = jnp.swapaxes(hs_f, 0, 1)                       # [B, T, Hd]

    # Backward direction with packed-sequence semantics: each sequence is
    # reversed within its own length; step s consumes position len-1-s.
    pos = (lengths[:, None] - 1) - jnp.arange(T)[None, :]
    valid = pos >= 0
    x_rev = x[jnp.arange(B)[:, None], jnp.clip(pos, 0, T - 1), :]

    def bstep(carry, inp):
        x_t, m = inp
        h, c = carry
        h2, c2 = _lstm_cell(x_t, h, c,
                            params["w_ih_b"], params["w_hh_b"], params["b_b"])
        m = m[:, None]
        h = jnp.where(m, h2, h)
        c = jnp.where(m, c2, c)
        return (h, c), h
    _, hs_b = jax.lax.scan(bstep, (z, z),
                           (jnp.swapaxes(x_rev, 0, 1), jnp.swapaxes(valid, 0, 1)))
    hs_b = jnp.swapaxes(hs_b, 0, 1)   # step s <-> original position len-1-s

    last_f = hs_f[jnp.arange(B), lengths - 1]             # forward @ t = len-1
    last_b = hs_b[:, 0, :]                                # backward @ t = len-1
    return jnp.concatenate([last_f, last_b], axis=-1)


def init_params(key, emb_dim, hidden_dim):
    Hd = hidden_dim // 2
    G = 4 * Hd
    ks = jax.random.split(key, 6)
    s = 1.0 / float(jnp.sqrt(Hd))
    u = lambda k, shp: jax.random.uniform(k, shp, jnp.float32, -s, s)
    return dict(
        w_ih_f=u(ks[0], (emb_dim, G)), w_hh_f=u(ks[1], (Hd, G)), b_f=u(ks[2], (1, G)),
        w_ih_b=u(ks[3], (emb_dim, G)), w_hh_b=u(ks[4], (Hd, G)), b_b=u(ks[5], (1, G)),
    )


if __name__ == "__main__":
    # Small shapes consistent with CharBiLSTM(vocab_size, emb_dim, hidden_dim),
    # chosen so the gate width (4*Hd=256) and output (2*Hd=128) are lane-dense
    # and the batch is a multiple of the 8-row sublane tile.
    vocab_size, emb_dim, hidden_dim = 64, 32, 128
    B, T = 16, 16

    key = jax.random.PRNGKey(0)
    k_emb, k_par, k_tok, k_len = jax.random.split(key, 4)

    emb_table = 0.1 * jax.random.normal(k_emb, (vocab_size, emb_dim), jnp.float32)
    params = init_params(k_par, emb_dim, hidden_dim)
    char_input = jax.random.randint(k_tok, (B, T), 0, vocab_size)
    char_lengths = jax.random.randint(k_len, (B,), 1, T + 1)   # lengths in [1, T]

    ref = char_bilstm_reference(emb_table, char_input, char_lengths, params)

    # f32 path (tight tolerance).
    out = char_bilstm_pallas(emb_table, char_input, char_lengths, params)
    out = jax.block_until_ready(out)
    assert out.shape == (B, hidden_dim)
    assert jnp.allclose(out, ref, atol=1e-4, rtol=1e-4), (
        f"f32 mismatch vs reference, max abs err = {jnp.max(jnp.abs(out - ref))}")

    # bf16 DMA / MXU-operand path (state & accumulation stay f32; looser tol).
    out_bf = char_bilstm_pallas(emb_table, char_input, char_lengths, params,
                                compute_dtype=jnp.bfloat16)
    out_bf = jax.block_until_ready(out_bf)
    assert jnp.allclose(out_bf, ref, atol=5e-2, rtol=5e-2), (
        f"bf16 mismatch vs reference, max abs err = {jnp.max(jnp.abs(out_bf - ref))}")

    print("KERNEL_OK")
</pallas_src>

<mosaic_0001>
module attributes {stable_mosaic.version = 11 : i64} {
  func.func @char_bilstm_kernel(%arg0: i32, %arg1: memref<1x256x32xf32, #tpu.memory_space<vmem>>, %arg2: memref<16x32xf32, #tpu.memory_space<vmem>>, %arg3: memref<16x1xi32, #tpu.memory_space<vmem>>, %arg4: memref<32x256xf32, #tpu.memory_space<vmem>>, %arg5: memref<64x256xf32, #tpu.memory_space<vmem>>, %arg6: memref<1x256xf32, #tpu.memory_space<vmem>>, %arg7: memref<32x256xf32, #tpu.memory_space<vmem>>, %arg8: memref<1x256xf32, #tpu.memory_space<vmem>>, %arg9: memref<16x128xf32, #tpu.memory_space<vmem>>) attributes {dimension_semantics = [#tpu.dimension_semantics<parallel>], iteration_bounds = array<i64: 1>, scalar_prefetch = 0 : i64, scratch_operands = 0 : i64, tpu.core_type = #tpu.core_type<tc>, window_params = [{transform_indices = @transform_0, window_bounds = array<i64: 1, 256, 32>}, {transform_indices = @transform_1, window_bounds = array<i64: 16, 32>}, {transform_indices = @transform_2, window_bounds = array<i64: 16, 1>}, {pipeline_mode = #tpu.pipeline_mode<synchronous>, transform_indices = @transform_3, window_bounds = array<i64: 32, 256>}, {pipeline_mode = #tpu.pipeline_mode<synchronous>, transform_indices = @transform_4, window_bounds = array<i64: 64, 256>}, {pipeline_mode = #tpu.pipeline_mode<synchronous>, transform_indices = @transform_5, window_bounds = array<i64: 1, 256>}, {pipeline_mode = #tpu.pipeline_mode<synchronous>, transform_indices = @transform_6, window_bounds = array<i64: 32, 256>}, {pipeline_mode = #tpu.pipeline_mode<synchronous>, transform_indices = @transform_7, window_bounds = array<i64: 1, 256>}, {transform_indices = @transform_8, window_bounds = array<i64: 16, 128>}]} {
    %c0 = arith.constant 0 : index
    %c0_0 = arith.constant 0 : index
    %0 = vector.load %arg4[%c0, %c0_0] : memref<32x256xf32, #tpu.memory_space<vmem>>, vector<32x256xf32>
    %c0_1 = arith.constant 0 : index
    %c0_2 = arith.constant 0 : index
    %1 = vector.load %arg5[%c0_1, %c0_2] : memref<64x256xf32, #tpu.memory_space<vmem>>, vector<64x256xf32>
    %c0_3 = arith.constant 0 : index
    %c0_4 = arith.constant 0 : index
    %2 = vector.load %arg6[%c0_3, %c0_4] : memref<1x256xf32, #tpu.memory_space<vmem>>, vector<1x256xf32>
    %c0_5 = arith.constant 0 : index
    %c0_6 = arith.constant 0 : index
    %3 = vector.load %arg3[%c0_5, %c0_6] : memref<16x1xi32, #tpu.memory_space<vmem>>, vector<16x1xi32>
    %cst = arith.constant 0.000000e+00 : f32
    %4 = vector.broadcast %cst : f32 to vector<16x64xf32>
    %c0_i32 = arith.constant 0 : i32
    %c16_i32 = arith.constant 16 : i32
    %5 = arith.muli %c0_i32, %c16_i32 : i32
    %6 = tpu.assume_multiple %5, 16 : i32
    %c0_7 = arith.constant 0 : index
    %7 = arith.index_cast %6 : i32 to index
    %c0_8 = arith.constant 0 : index
    %8 = vector.load %arg1[%c0_7, %7, %c0_8] : memref<1x256x32xf32, #tpu.memory_space<vmem>>, vector<1x16x32xf32>
    %9 = vector.shape_cast %8 : vector<1x16x32xf32> to vector<16x32xf32>
    %cst_9 = arith.constant dense<0.000000e+00> : vector<16x256xf32>
    %10 = tpu.matmul %9, %0, %cst_9 {dimension_numbers = #tpu.dot_dimension_numbers<[1], [0], [0], [1], [0, 0, 1, 1], [], []>} : vector<16x32xf32>, vector<32x256xf32>, vector<16x256xf32> -> vector<16x256xf32>
    %cst_10 = arith.constant dense<0.000000e+00> : vector<16x256xf32>
    %11 = tpu.matmul %4, %1, %cst_10 {dimension_numbers = #tpu.dot_dimension_numbers<[1], [0], [0], [1], [0, 0, 1, 1], [], []>} : vector<16x64xf32>, vector<64x256xf32>, vector<16x256xf32> -> vector<16x256xf32>
    %12 = arith.addf %10, %11 : vector<16x256xf32>
    %13 = vector.broadcast %2 : vector<1x256xf32> to vector<16x256xf32>
    %14 = arith.addf %12, %13 : vector<16x256xf32>
    %15 = arith.negf %14 : vector<16x256xf32>
    %16 = math.exp %15 : vector<16x256xf32>
    %cst_11 = arith.constant 1.000000e+00 : f32
    %17 = vector.broadcast %cst_11 : f32 to vector<16x256xf32>
    %18 = arith.addf %17, %16 : vector<16x256xf32>
    %19 = arith.divf %17, %18 : vector<16x256xf32>
    %20 = vector.extract_strided_slice %19 {offsets = [0, 0], sizes = [16, 64], strides = [1, 1]} : vector<16x256xf32> to vector<16x64xf32>
    %21 = vector.extract_strided_slice %19 {offsets = [0, 64], sizes = [16, 64], strides = [1, 1]} : vector<16x256xf32> to vector<16x64xf32>
    %22 = vector.extract_strided_slice %19 {offsets = [0, 192], sizes = [16, 64], strides = [1, 1]} : vector<16x256xf32> to vector<16x64xf32>
    %23 = vector.extract_strided_slice %14 {offsets = [0, 128], sizes = [16, 64], strides = [1, 1]} : vector<16x256xf32> to vector<16x64xf32>
    %24 = math.tanh %23 : vector<16x64xf32>
    %25 = arith.mulf %21, %4 : vector<16x64xf32>
    %26 = arith.mulf %20, %24 : vector<16x64xf32>
    %27 = arith.addf %25, %26 : vector<16x64xf32>
    %28 = math.tanh %27 : vector<16x64xf32>
    %29 = arith.mulf %22, %28 : vector<16x64xf32>
    %c1_i32 = arith.constant 1 : i32
    %30 = arith.addi %c0_i32, %c1_i32 : i32
    %31 = vector.broadcast %30 : i32 to vector<16x1xi32>
    %32 = arith.cmpi eq, %3, %31 : vector<16x1xi32>
    %33 = vector.shape_cast %32 : vector<16x1xi1> to vector<16x1xi1>
    %34 = vector.broadcast %33 : vector<16x1xi1> to vector<16x64xi1>
    %35 = arith.select %34, %29, %4 : vector<16x64xi1>, vector<16x64xf32>
    %c1_i32_12 = arith.constant 1 : i32
    %c16_i32_13 = arith.constant 16 : i32
    %36 = arith.muli %c1_i32_12, %c16_i32_13 : i32
    %37 = tpu.assume_multiple %36, 16 : i32
    %c0_14 = arith.constant 0 : index
    %38 = arith.index_cast %37 : i32 to index
    %c0_15 = arith.constant 0 : index
    %39 = vector.load %arg1[%c0_14, %38, %c0_15] : memref<1x256x32xf32, #tpu.memory_space<vmem>>, vector<1x16x32xf32>
    %40 = vector.shape_cast %39 : vector<1x16x32xf32> to vector<16x32xf32>
    %cst_16 = arith.constant dense<0.000000e+00> : vector<16x256xf32>
    %41 = tpu.matmul %40, %0, %cst_16 {dimension_numbers = #tpu.dot_dimension_numbers<[1], [0], [0], [1], [0, 0, 1, 1], [], []>} : vector<16x32xf32>, vector<32x256xf32>, vector<16x256xf32> -> vector<16x256xf32>
    %cst_17 = arith.constant dense<0.000000e+00> : vector<16x256xf32>
    %42 = tpu.matmul %29, %1, %cst_17 {dimension_numbers = #tpu.dot_dimension_numbers<[1], [0], [0], [1], [0, 0, 1, 1], [], []>} : vector<16x64xf32>, vector<64x256xf32>, vector<16x256xf32> -> vector<16x256xf32>
    %43 = arith.addf %41, %42 : vector<16x256xf32>
    %44 = vector.broadcast %2 : vector<1x256xf32> to vector<16x256xf32>
    %45 = arith.addf %43, %44 : vector<16x256xf32>
    %46 = arith.negf %45 : vector<16x256xf32>
    %47 = math.exp %46 : vector<16x256xf32>
    %cst_18 = arith.constant 1.000000e+00 : f32
    %48 = vector.broadcast %cst_18 : f32 to vector<16x256xf32>
    %49 = arith.addf %48, %47 : vector<16x256xf32>
    %50 = arith.divf %48, %49 : vector<16x256xf32>
    %51 = vector.extract_strided_slice %50 {offsets = [0, 0], sizes = [16, 64], strides = [1, 1]} : vector<16x256xf32> to vector<16x64xf32>
    %52 = vector.extract_strided_slice %50 {offsets = [0, 64], sizes = [16, 64], strides = [1, 1]} : vector<16x256xf32> to vector<16x64xf32>
    %53 = vector.extract_strided_slice %50 {offsets = [0, 192], sizes = [16, 64], strides = [1, 1]} : vector<16x256xf32> to vector<16x64xf32>
    %54 = vector.extract_strided_slice %45 {offsets = [0, 128], sizes = [16, 64], strides = [1, 1]} : vector<16x256xf32> to vector<16x64xf32>
    %55 = math.tanh %54 : vector<16x64xf32>
    %56 = arith.mulf %52, %27 : vector<16x64xf32>
    %57 = arith.mulf %51, %55 : vector<16x64xf32>
    %58 = arith.addf %56, %57 : vector<16x64xf32>
    %59 = math.tanh %58 : vector<16x64xf32>
    %60 = arith.mulf %53, %59 : vector<16x64xf32>
    %c1_i32_19 = arith.constant 1 : i32
    %61 = arith.addi %c1_i32_12, %c1_i32_19 : i32
    %62 = vector.broadcast %61 : i32 to vector<16x1xi32>
    %63 = arith.cmpi eq, %3, %62 : vector<16x1xi32>
    %64 = vector.shape_cast %63 : vector<16x1xi1> to vector<16x1xi1>
    %65 = vector.broadcast %64 : vector<16x1xi1> to vector<16x64xi1>
    %66 = arith.select %65, %60, %35 : vector<16x64xi1>, vector<16x64xf32>
    %c2_i32 = arith.constant 2 : i32
    %c16_i32_20 = arith.constant 16 : i32
    %67 = arith.muli %c2_i32, %c16_i32_20 : i32
    %68 = tpu.assume_multiple %67, 16 : i32
    %c0_21 = arith.constant 0 : index
    %69 = arith.index_cast %68 : i32 to index
    %c0_22 = arith.constant 0 : index
    %70 = vector.load %arg1[%c0_21, %69, %c0_22] : memref<1x256x32xf32, #tpu.memory_space<vmem>>, vector<1x16x32xf32>
    %71 = vector.shape_cast %70 : vector<1x16x32xf32> to vector<16x32xf32>
    %cst_23 = arith.constant dense<0.000000e+00> : vector<16x256xf32>
    %72 = tpu.matmul %71, %0, %cst_23 {dimension_numbers = #tpu.dot_dimension_numbers<[1], [0], [0], [1], [0, 0, 1, 1], [], []>} : vector<16x32xf32>, vector<32x256xf32>, vector<16x256xf32> -> vector<16x256xf32>
    %cst_24 = arith.constant dense<0.000000e+00> : vector<16x256xf32>
    %73 = tpu.matmul %60, %1, %cst_24 {dimension_numbers = #tpu.dot_dimension_numbers<[1], [0], [0], [1], [0, 0, 1, 1], [], []>} : vector<16x64xf32>, vector<64x256xf32>, vector<16x256xf32> -> vector<16x256xf32>
    %74 = arith.addf %72, %73 : vector<16x256xf32>
    %75 = vector.broadcast %2 : vector<1x256xf32> to vector<16x256xf32>
    %76 = arith.addf %74, %75 : vector<16x256xf32>
    %77 = arith.negf %76 : vector<16x256xf32>
    %78 = math.exp %77 : vector<16x256xf32>
    %cst_25 = arith.constant 1.000000e+00 : f32
    %79 = vector.broadcast %cst_25 : f32 to vector<16x256xf32>
    %80 = arith.addf %79, %78 : vector<16x256xf32>
    %81 = arith.divf %79, %80 : vector<16x256xf32>
    %82 = vector.extract_strided_slice %81 {offsets = [0, 0], sizes = [16, 64], strides = [1, 1]} : vector<16x256xf32> to vector<16x64xf32>
    %83 = vector.extract_strided_slice %81 {offsets = [0, 64], sizes = [16, 64], strides = [1, 1]} : vector<16x256xf32> to vector<16x64xf32>
    %84 = vector.extract_strided_slice %81 {offsets = [0, 192], sizes = [16, 64], strides = [1, 1]} : vector<16x256xf32> to vector<16x64xf32>
    %85 = vector.extract_strided_slice %76 {offsets = [0, 128], sizes = [16, 64], strides = [1, 1]} : vector<16x256xf32> to vector<16x64xf32>
    %86 = math.tanh %85 : vector<16x64xf32>
    %87 = arith.mulf %83, %58 : vector<16x64xf32>
    %88 = arith.mulf %82, %86 : vector<16x64xf32>
    %89 = arith.addf %87, %88 : vector<16x64xf32>
    %90 = math.tanh %89 : vector<16x64xf32>
    %91 = arith.mulf %84, %90 : vector<16x64xf32>
    %c1_i32_26 = arith.constant 1 : i32
    %92 = arith.addi %c2_i32, %c1_i32_26 : i32
    %93 = vector.broadcast %92 : i32 to vector<16x1xi32>
    %94 = arith.cmpi eq, %3, %93 : vector<16x1xi32>
    %95 = vector.shape_cast %94 : vector<16x1xi1> to vector<16x1xi1>
    %96 = vector.broadcast %95 : vector<16x1xi1> to vector<16x64xi1>
    %97 = arith.select %96, %91, %66 : vector<16x64xi1>, vector<16x64xf32>
    %c3_i32 = arith.constant 3 : i32
    %c16_i32_27 = arith.constant 16 : i32
    %98 = arith.muli %c3_i32, %c16_i32_27 : i32
    %99 = tpu.assume_multiple %98, 16 : i32
    %c0_28 = arith.constant 0 : index
    %100 = arith.index_cast %99 : i32 to index
    %c0_29 = arith.constant 0 : index
    %101 = vector.load %arg1[%c0_28, %100, %c0_29] : memref<1x256x32xf32, #tpu.memory_space<vmem>>, vector<1x16x32xf32>
    %102 = vector.shape_cast %101 : vector<1x16x32xf32> to vector<16x32xf32>
    %cst_30 = arith.constant dense<0.000000e+00> : vector<16x256xf32>
    %103 = tpu.matmul %102, %0, %cst_30 {dimension_numbers = #tpu.dot_dimension_numbers<[1], [0], [0], [1], [0, 0, 1, 1], [], []>} : vector<16x32xf32>, vector<32x256xf32>, vector<16x256xf32> -> vector<16x256xf32>
    %cst_31 = arith.constant dense<0.000000e+00> : vector<16x256xf32>
    %104 = tpu.matmul %91, %1, %cst_31 {dimension_numbers = #tpu.dot_dimension_numbers<[1], [0], [0], [1], [0, 0, 1, 1], [], []>} : vector<16x64xf32>, vector<64x256xf32>, vector<16x256xf32> -> vector<16x256xf32>
    %105 = arith.addf %103, %104 : vector<16x256xf32>
    %106 = vector.broadcast %2 : vector<1x256xf32> to vector<16x256xf32>
    %107 = arith.addf %105, %106 : vector<16x256xf32>
    %108 = arith.negf %107 : vector<16x256xf32>
    %109 = math.exp %108 : vector<16x256xf32>
    %cst_32 = arith.constant 1.000000e+00 : f32
    %110 = vector.broadcast %cst_32 : f32 to vector<16x256xf32>
    %111 = arith.addf %110, %109 : vector<16x256xf32>
    %112 = arith.divf %110, %111 : vector<16x256xf32>
    %113 = vector.extract_strided_slice %112 {offsets = [0, 0], sizes = [16, 64], strides = [1, 1]} : vector<16x256xf32> to vector<16x64xf32>
    %114 = vector.extract_strided_slice %112 {offsets = [0, 64], sizes = [16, 64], strides = [1, 1]} : vector<16x256xf32> to vector<16x64xf32>
    %115 = vector.extract_strided_slice %112 {offsets = [0, 192], sizes = [16, 64], strides = [1, 1]} : vector<16x256xf32> to vector<16x64xf32>
    %116 = vector.extract_strided_slice %107 {offsets = [0, 128], sizes = [16, 64], strides = [1, 1]} : vector<16x256xf32> to vector<16x64xf32>
    %117 = math.tanh %116 : vector<16x64xf32>
    %118 = arith.mulf %114, %89 : vector<16x64xf32>
    %119 = arith.mulf %113, %117 : vector<16x64xf32>
    %120 = arith.addf %118, %119 : vector<16x64xf32>
    %121 = math.tanh %120 : vector<16x64xf32>
    %122 = arith.mulf %115, %121 : vector<16x64xf32>
    %c1_i32_33 = arith.constant 1 : i32
    %123 = arith.addi %c3_i32, %c1_i32_33 : i32
    %124 = vector.broadcast %123 : i32 to vector<16x1xi32>
    %125 = arith.cmpi eq, %3, %124 : vector<16x1xi32>
    %126 = vector.shape_cast %125 : vector<16x1xi1> to vector<16x1xi1>
    %127 = vector.broadcast %126 : vector<16x1xi1> to vector<16x64xi1>
    %128 = arith.select %127, %122, %97 : vector<16x64xi1>, vector<16x64xf32>
    %c4_i32 = arith.constant 4 : i32
    %c16_i32_34 = arith.constant 16 : i32
    %129 = arith.muli %c4_i32, %c16_i32_34 : i32
    %130 = tpu.assume_multiple %129, 16 : i32
    %c0_35 = arith.constant 0 : index
    %131 = arith.index_cast %130 : i32 to index
    %c0_36 = arith.constant 0 : index
    %132 = vector.load %arg1[%c0_35, %131, %c0_36] : memref<1x256x32xf32, #tpu.memory_space<vmem>>, vector<1x16x32xf32>
    %133 = vector.shape_cast %132 : vector<1x16x32xf32> to vector<16x32xf32>
    %cst_37 = arith.constant dense<0.000000e+00> : vector<16x256xf32>
    %134 = tpu.matmul %133, %0, %cst_37 {dimension_numbers = #tpu.dot_dimension_numbers<[1], [0], [0], [1], [0, 0, 1, 1], [], []>} : vector<16x32xf32>, vector<32x256xf32>, vector<16x256xf32> -> vector<16x256xf32>
    %cst_38 = arith.constant dense<0.000000e+00> : vector<16x256xf32>
    %135 = tpu.matmul %122, %1, %cst_38 {dimension_numbers = #tpu.dot_dimension_numbers<[1], [0], [0], [1], [0, 0, 1, 1], [], []>} : vector<16x64xf32>, vector<64x256xf32>, vector<16x256xf32> -> vector<16x256xf32>
    %136 = arith.addf %134, %135 : vector<16x256xf32>
    %137 = vector.broadcast %2 : vector<1x256xf32> to vector<16x256xf32>
    %138 = arith.addf %136, %137 : vector<16x256xf32>
    %139 = arith.negf %138 : vector<16x256xf32>
    %140 = math.exp %139 : vector<16x256xf32>
    %cst_39 = arith.constant 1.000000e+00 : f32
    %141 = vector.broadcast %cst_39 : f32 to vector<16x256xf32>
    %142 = arith.addf %141, %140 : vector<16x256xf32>
    %143 = arith.divf %141, %142 : vector<16x256xf32>
    %144 = vector.extract_strided_slice %143 {offsets = [0, 0], sizes = [16, 64], strides = [1, 1]} : vector<16x256xf32> to vector<16x64xf32>
    %145 = vector.extract_strided_slice %143 {offsets = [0, 64], sizes = [16, 64], strides = [1, 1]} : vector<16x256xf32> to vector<16x64xf32>
    %146 = vector.extract_strided_slice %143 {offsets = [0, 192], sizes = [16, 64], strides = [1, 1]} : vector<16x256xf32> to vector<16x64xf32>
    %147 = vector.extract_strided_slice %138 {offsets = [0, 128], sizes = [16, 64], strides = [1, 1]} : vector<16x256xf32> to vector<16x64xf32>
    %148 = math.tanh %147 : vector<16x64xf32>
    %149 = arith.mulf %145, %120 : vector<16x64xf32>
    %150 = arith.mulf %144, %148 : vector<16x64xf32>
    %151 = arith.addf %149, %150 : vector<16x64xf32>
    %152 = math.tanh %151 : vector<16x64xf32>
    %153 = arith.mulf %146, %152 : vector<16x64xf32>
    %c1_i32_40 = arith.constant 1 : i32
    %154 = arith.addi %c4_i32, %c1_i32_40 : i32
    %155 = vector.broadcast %154 : i32 to vector<16x1xi32>
    %156 = arith.cmpi eq, %3, %155 : vector<16x1xi32>
    %157 = vector.shape_cast %156 : vector<16x1xi1> to vector<16x1xi1>
    %158 = vector.broadcast %157 : vector<16x1xi1> to vector<16x64xi1>
    %159 = arith.select %158, %153, %128 : vector<16x64xi1>, vector<16x64xf32>
    %c5_i32 = arith.constant 5 : i32
    %c16_i32_41 = arith.constant 16 : i32
    %160 = arith.muli %c5_i32, %c16_i32_41 : i32
    %161 = tpu.assume_multiple %160, 16 : i32
    %c0_42 = arith.constant 0 : index
    %162 = arith.index_cast %161 : i32 to index
    %c0_43 = arith.constant 0 : index
    %163 = vector.load %arg1[%c0_42, %162, %c0_43] : memref<1x256x32xf32, #tpu.memory_space<vmem>>, vector<1x16x32xf32>
    %164 = vector.shape_cast %163 : vector<1x16x32xf32> to vector<16x32xf32>
    %cst_44 = arith.constant dense<0.000000e+00> : vector<16x256xf32>
    %165 = tpu.matmul %164, %0, %cst_44 {dimension_numbers = #tpu.dot_dimension_numbers<[1], [0], [0], [1], [0, 0, 1, 1], [], []>} : vector<16x32xf32>, vector<32x256xf32>, vector<16x256xf32> -> vector<16x256xf32>
    %cst_45 = arith.constant dense<0.000000e+00> : vector<16x256xf32>
    %166 = tpu.matmul %153, %1, %cst_45 {dimension_numbers = #tpu.dot_dimension_numbers<[1], [0], [0], [1], [0, 0, 1, 1], [], []>} : vector<16x64xf32>, vector<64x256xf32>, vector<16x256xf32> -> vector<16x256xf32>
    %167 = arith.addf %165, %166 : vector<16x256xf32>
    %168 = vector.broadcast %2 : vector<1x256xf32> to vector<16x256xf32>
    %169 = arith.addf %167, %168 : vector<16x256xf32>
    %170 = arith.negf %169 : vector<16x256xf32>
    %171 = math.exp %170 : vector<16x256xf32>
    %cst_46 = arith.constant 1.000000e+00 : f32
    %172 = vector.broadcast %cst_46 : f32 to vector<16x256xf32>
    %173 = arith.addf %172, %171 : vector<16x256xf32>
    %174 = arith.divf %172, %173 : vector<16x256xf32>
    %175 = vector.extract_strided_slice %174 {offsets = [0, 0], sizes = [16, 64], strides = [1, 1]} : vector<16x256xf32> to vector<16x64xf32>
    %176 = vector.extract_strided_slice %174 {offsets = [0, 64], sizes = [16, 64], strides = [1, 1]} : vector<16x256xf32> to vector<16x64xf32>
    %177 = vector.extract_strided_slice %174 {offsets = [0, 192], sizes = [16, 64], strides = [1, 1]} : vector<16x256xf32> to vector<16x64xf32>
    %178 = vector.extract_strided_slice %169 {offsets = [0, 128], sizes = [16, 64], strides = [1, 1]} : vector<16x256xf32> to vector<16x64xf32>
    %179 = math.tanh %178 : vector<16x64xf32>
    %180 = arith.mulf %176, %151 : vector<16x64xf32>
    %181 = arith.mulf %175, %179 : vector<16x64xf32>
    %182 = arith.addf %180, %181 : vector<16x64xf32>
    %183 = math.tanh %182 : vector<16x64xf32>
    %184 = arith.mulf %177, %183 : vector<16x64xf32>
    %c1_i32_47 = arith.constant 1 : i32
    %185 = arith.addi %c5_i32, %c1_i32_47 : i32
    %186 = vector.broadcast %185 : i32 to vector<16x1xi32>
    %187 = arith.cmpi eq, %3, %186 : vector<16x1xi32>
    %188 = vector.shape_cast %187 : vector<16x1xi1> to vector<16x1xi1>
    %189 = vector.broadcast %188 : vector<16x1xi1> to vector<16x64xi1>
    %190 = arith.select %189, %184, %159 : vector<16x64xi1>, vector<16x64xf32>
    %c6_i32 = arith.constant 6 : i32
    %c16_i32_48 = arith.constant 16 : i32
    %191 = arith.muli %c6_i32, %c16_i32_48 : i32
    %192 = tpu.assume_multiple %191, 16 : i32
    %c0_49 = arith.constant 0 : index
    %193 = arith.index_cast %192 : i32 to index
    %c0_50 = arith.constant 0 : index
    %194 = vector.load %arg1[%c0_49, %193, %c0_50] : memref<1x256x32xf32, #tpu.memory_space<vmem>>, vector<1x16x32xf32>
    %195 = vector.shape_cast %194 : vector<1x16x32xf32> to vector<16x32xf32>
    %cst_51 = arith.constant dense<0.000000e+00> : vector<16x256xf32>
    %196 = tpu.matmul %195, %0, %cst_51 {dimension_numbers = #tpu.dot_dimension_numbers<[1], [0], [0], [1], [0, 0, 1, 1], [], []>} : vector<16x32xf32>, vector<32x256xf32>, vector<16x256xf32> -> vector<16x256xf32>
    %cst_52 = arith.constant dense<0.000000e+00> : vector<16x256xf32>
    %197 = tpu.matmul %184, %1, %cst_52 {dimension_numbers = #tpu.dot_dimension_numbers<[1], [0], [0], [1], [0, 0, 1, 1], [], []>} : vector<16x64xf32>, vector<64x256xf32>, vector<16x256xf32> -> vector<16x256xf32>
    %198 = arith.addf %196, %197 : vector<16x256xf32>
    %199 = vector.broadcast %2 : vector<1x256xf32> to vector<16x256xf32>
    %200 = arith.addf %198, %199 : vector<16x256xf32>
    %201 = arith.negf %200 : vector<16x256xf32>
    %202 = math.exp %201 : vector<16x256xf32>
    %cst_53 = arith.constant 1.000000e+00 : f32
    %203 = vector.broadcast %cst_53 : f32 to vector<16x256xf32>
    %204 = arith.addf %203, %202 : vector<16x256xf32>
    %205 = arith.divf %203, %204 : vector<16x256xf32>
    %206 = vector.extract_strided_slice %205 {offsets = [0, 0], sizes = [16, 64], strides = [1, 1]} : vector<16x256xf32> to vector<16x64xf32>
    %207 = vector.extract_strided_slice %205 {offsets = [0, 64], sizes = [16, 64], strides = [1, 1]} : vector<16x256xf32> to vector<16x64xf32>
    %208 = vector.extract_strided_slice %205 {offsets = [0, 192], sizes = [16, 64], strides = [1, 1]} : vector<16x256xf32> to vector<16x64xf32>
    %209 = vector.extract_strided_slice %200 {offsets = [0, 128], sizes = [16, 64], strides = [1, 1]} : vector<16x256xf32> to vector<16x64xf32>
    %210 = math.tanh %209 : vector<16x64xf32>
    %211 = arith.mulf %207, %182 : vector<16x64xf32>
    %212 = arith.mulf %206, %210 : vector<16x64xf32>
    %213 = arith.addf %211, %212 : vector<16x64xf32>
    %214 = math.tanh %213 : vector<16x64xf32>
    %215 = arith.mulf %208, %214 : vector<16x64xf32>
    %c1_i32_54 = arith.constant 1 : i32
    %216 = arith.addi %c6_i32, %c1_i32_54 : i32
    %217 = vector.broadcast %216 : i32 to vector<16x1xi32>
    %218 = arith.cmpi eq, %3, %217 : vector<16x1xi32>
    %219 = vector.shape_cast %218 : vector<16x1xi1> to vector<16x1xi1>
    %220 = vector.broadcast %219 : vector<16x1xi1> to vector<16x64xi1>
    %221 = arith.select %220, %215, %190 : vector<16x64xi1>, vector<16x64xf32>
    %c7_i32 = arith.constant 7 : i32
    %c16_i32_55 = arith.constant 16 : i32
    %222 = arith.muli %c7_i32, %c16_i32_55 : i32
    %223 = tpu.assume_multiple %222, 16 : i32
    %c0_56 = arith.constant 0 : index
    %224 = arith.index_cast %223 : i32 to index
    %c0_57 = arith.constant 0 : index
    %225 = vector.load %arg1[%c0_56, %224, %c0_57] : memref<1x256x32xf32, #tpu.memory_space<vmem>>, vector<1x16x32xf32>
    %226 = vector.shape_cast %225 : vector<1x16x32xf32> to vector<16x32xf32>
    %cst_58 = arith.constant dense<0.000000e+00> : vector<16x256xf32>
    %227 = tpu.matmul %226, %0, %cst_58 {dimension_numbers = #tpu.dot_dimension_numbers<[1], [0], [0], [1], [0, 0, 1, 1], [], []>} : vector<16x32xf32>, vector<32x256xf32>, vector<16x256xf32> -> vector<16x256xf32>
    %cst_59 = arith.constant dense<0.000000e+00> : vector<16x256xf32>
    %228 = tpu.matmul %215, %1, %cst_59 {dimension_numbers = #tpu.dot_dimension_numbers<[1], [0], [0], [1], [0, 0, 1, 1], [], []>} : vector<16x64xf32>, vector<64x256xf32>, vector<16x256xf32> -> vector<16x256xf32>
    %229 = arith.addf %227, %228 : vector<16x256xf32>
    %230 = vector.broadcast %2 : vector<1x256xf32> to vector<16x256xf32>
    %231 = arith.addf %229, %230 : vector<16x256xf32>
    %232 = arith.negf %231 : vector<16x256xf32>
    %233 = math.exp %232 : vector<16x256xf32>
    %cst_60 = arith.constant 1.000000e+00 : f32
    %234 = vector.broadcast %cst_60 : f32 to vector<16x256xf32>
    %235 = arith.addf %234, %233 : vector<16x256xf32>
    %236 = arith.divf %234, %235 : vector<16x256xf32>
    %237 = vector.extract_strided_slice %236 {offsets = [0, 0], sizes = [16, 64], strides = [1, 1]} : vector<16x256xf32> to vector<16x64xf32>
    %238 = vector.extract_strided_slice %236 {offsets = [0, 64], sizes = [16, 64], strides = [1, 1]} : vector<16x256xf32> to vector<16x64xf32>
    %239 = vector.extract_strided_slice %236 {offsets = [0, 192], sizes = [16, 64], strides = [1, 1]} : vector<16x256xf32> to vector<16x64xf32>
    %240 = vector.extract_strided_slice %231 {offsets = [0, 128], sizes = [16, 64], strides = [1, 1]} : vector<16x256xf32> to vector<16x64xf32>
    %241 = math.tanh %240 : vector<16x64xf32>
    %242 = arith.mulf %238, %213 : vector<16x64xf32>
    %243 = arith.mulf %237, %241 : vector<16x64xf32>
    %244 = arith.addf %242, %243 : vector<16x64xf32>
    %245 = math.tanh %244 : vector<16x64xf32>
    %246 = arith.mulf %239, %245 : vector<16x64xf32>
    %c1_i32_61 = arith.constant 1 : i32
    %247 = arith.addi %c7_i32, %c1_i32_61 : i32
    %248 = vector.broadcast %247 : i32 to vector<16x1xi32>
    %249 = arith.cmpi eq, %3, %248 : vector<16x1xi32>
    %250 = vector.shape_cast %249 : vector<16x1xi1> to vector<16x1xi1>
    %251 = vector.broadcast %250 : vector<16x1xi1> to vector<16x64xi1>
    %252 = arith.select %251, %246, %221 : vector<16x64xi1>, vector<16x64xf32>
    %c8_i32 = arith.constant 8 : i32
    %c16_i32_62 = arith.constant 16 : i32
    %253 = arith.muli %c8_i32, %c16_i32_62 : i32
    %254 = tpu.assume_multiple %253, 16 : i32
    %c0_63 = arith.constant 0 : index
    %255 = arith.index_cast %254 : i32 to index
    %c0_64 = arith.constant 0 : index
    %256 = vector.load %arg1[%c0_63, %255, %c0_64] : memref<1x256x32xf32, #tpu.memory_space<vmem>>, vector<1x16x32xf32>
    %257 = vector.shape_cast %256 : vector<1x16x32xf32> to vector<16x32xf32>
    %cst_65 = arith.constant dense<0.000000e+00> : vector<16x256xf32>
    %258 = tpu.matmul %257, %0, %cst_65 {dimension_numbers = #tpu.dot_dimension_numbers<[1], [0], [0], [1], [0, 0, 1, 1], [], []>} : vector<16x32xf32>, vector<32x256xf32>, vector<16x256xf32> -> vector<16x256xf32>
    %cst_66 = arith.constant dense<0.000000e+00> : vector<16x256xf32>
    %259 = tpu.matmul %246, %1, %cst_66 {dimension_numbers = #tpu.dot_dimension_numbers<[1], [0], [0], [1], [0, 0, 1, 1], [], []>} : vector<16x64xf32>, vector<64x256xf32>, vector<16x256xf32> -> vector<16x256xf32>
    %260 = arith.addf %258, %259 : vector<16x256xf32>
    %261 = vector.broadcast %2 : vector<1x256xf32> to vector<16x256xf32>
    %262 = arith.addf %260, %261 : vector<16x256xf32>
    %263 = arith.negf %262 : vector<16x256xf32>
    %264 = math.exp %263 : vector<16x256xf32>
    %cst_67 = arith.constant 1.000000e+00 : f32
    %265 = vector.broadcast %cst_67 : f32 to vector<16x256xf32>
    %266 = arith.addf %265, %264 : vector<16x256xf32>
    %267 = arith.divf %265, %266 : vector<16x256xf32>
    %268 = vector.extract_strided_slice %267 {offsets = [0, 0], sizes = [16, 64], strides = [1, 1]} : vector<16x256xf32> to vector<16x64xf32>
    %269 = vector.extract_strided_slice %267 {offsets = [0, 64], sizes = [16, 64], strides = [1, 1]} : vector<16x256xf32> to vector<16x64xf32>
    %270 = vector.extract_strided_slice %267 {offsets = [0, 192], sizes = [16, 64], strides = [1, 1]} : vector<16x256xf32> to vector<16x64xf32>
    %271 = vector.extract_strided_slice %262 {offsets = [0, 128], sizes = [16, 64], strides = [1, 1]} : vector<16x256xf32> to vector<16x64xf32>
    %272 = math.tanh %271 : vector<16x64xf32>
    %273 = arith.mulf %269, %244 : vector<16x64xf32>
    %274 = arith.mulf %268, %272 : vector<16x64xf32>
    %275 = arith.addf %273, %274 : vector<16x64xf32>
    %276 = math.tanh %275 : vector<16x64xf32>
    %277 = arith.mulf %270, %276 : vector<16x64xf32>
    %c1_i32_68 = arith.constant 1 : i32
    %278 = arith.addi %c8_i32, %c1_i32_68 : i32
    %279 = vector.broadcast %278 : i32 to vector<16x1xi32>
    %280 = arith.cmpi eq, %3, %279 : vector<16x1xi32>
    %281 = vector.shape_cast %280 : vector<16x1xi1> to vector<16x1xi1>
    %282 = vector.broadcast %281 : vector<16x1xi1> to vector<16x64xi1>
    %283 = arith.select %282, %277, %252 : vector<16x64xi1>, vector<16x64xf32>
    %c9_i32 = arith.constant 9 : i32
    %c16_i32_69 = arith.constant 16 : i32
    %284 = arith.muli %c9_i32, %c16_i32_69 : i32
    %285 = tpu.assume_multiple %284, 16 : i32
    %c0_70 = arith.constant 0 : index
    %286 = arith.index_cast %285 : i32 to index
    %c0_71 = arith.constant 0 : index
    %287 = vector.load %arg1[%c0_70, %286, %c0_71] : memref<1x256x32xf32, #tpu.memory_space<vmem>>, vector<1x16x32xf32>
    %288 = vector.shape_cast %287 : vector<1x16x32xf32> to vector<16x32xf32>
    %cst_72 = arith.constant dense<0.000000e+00> : vector<16x256xf32>
    %289 = tpu.matmul %288, %0, %cst_72 {dimension_numbers = #tpu.dot_dimension_numbers<[1], [0], [0], [1], [0, 0, 1, 1], [], []>} : vector<16x32xf32>, vector<32x256xf32>, vector<16x256xf32> -> vector<16x256xf32>
    %cst_73 = arith.constant dense<0.000000e+00> : vector<16x256xf32>
    %290 = tpu.matmul %277, %1, %cst_73 {dimension_numbers = #tpu.dot_dimension_numbers<[1], [0], [0], [1], [0, 0, 1, 1], [], []>} : vector<16x64xf32>, vector<64x256xf32>, vector<16x256xf32> -> vector<16x256xf32>
    %291 = arith.addf %289, %290 : vector<16x256xf32>
    %292 = vector.broadcast %2 : vector<1x256xf32> to vector<16x256xf32>
    %293 = arith.addf %291, %292 : vector<16x256xf32>
    %294 = arith.negf %293 : vector<16x256xf32>
    %295 = math.exp %294 : vector<16x256xf32>
    %cst_74 = arith.constant 1.000000e+00 : f32
    %296 = vector.broadcast %cst_74 : f32 to vector<16x256xf32>
    %297 = arith.addf %296, %295 : vector<16x256xf32>
    %298 = arith.divf %296, %297 : vector<16x256xf32>
    %299 = vector.extract_strided_slice %298 {offsets = [0, 0], sizes = [16, 64], strides = [1, 1]} : vector<16x256xf32> to vector<16x64xf32>
    %300 = vector.extract_strided_slice %298 {offsets = [0, 64], sizes = [16, 64], strides = [1, 1]} : vector<16x256xf32> to vector<16x64xf32>
    %301 = vector.extract_strided_slice %298 {offsets = [0, 192], sizes = [16, 64], strides = [1, 1]} : vector<16x256xf32> to vector<16x64xf32>
    %302 = vector.extract_strided_slice %293 {offsets = [0, 128], sizes = [16, 64], strides = [1, 1]} : vector<16x256xf32> to vector<16x64xf32>
    %303 = math.tanh %302 : vector<16x64xf32>
    %304 = arith.mulf %300, %275 : vector<16x64xf32>
    %305 = arith.mulf %299, %303 : vector<16x64xf32>
    %306 = arith.addf %304, %305 : vector<16x64xf32>
    %307 = math.tanh %306 : vector<16x64xf32>
    %308 = arith.mulf %301, %307 : vector<16x64xf32>
    %c1_i32_75 = arith.constant 1 : i32
    %309 = arith.addi %c9_i32, %c1_i32_75 : i32
    %310 = vector.broadcast %309 : i32 to vector<16x1xi32>
    %311 = arith.cmpi eq, %3, %310 : vector<16x1xi32>
    %312 = vector.shape_cast %311 : vector<16x1xi1> to vector<16x1xi1>
    %313 = vector.broadcast %312 : vector<16x1xi1> to vector<16x64xi1>
    %314 = arith.select %313, %308, %283 : vector<16x64xi1>, vector<16x64xf32>
    %c10_i32 = arith.constant 10 : i32
    %c16_i32_76 = arith.constant 16 : i32
    %315 = arith.muli %c10_i32, %c16_i32_76 : i32
    %316 = tpu.assume_multiple %315, 16 : i32
    %c0_77 = arith.constant 0 : index
    %317 = arith.index_cast %316 : i32 to index
    %c0_78 = arith.constant 0 : index
    %318 = vector.load %arg1[%c0_77, %317, %c0_78] : memref<1x256x32xf32, #tpu.memory_space<vmem>>, vector<1x16x32xf32>
    %319 = vector.shape_cast %318 : vector<1x16x32xf32> to vector<16x32xf32>
    %cst_79 = arith.constant dense<0.000000e+00> : vector<16x256xf32>
    %320 = tpu.matmul %319, %0, %cst_79 {dimension_numbers = #tpu.dot_dimension_numbers<[1], [0], [0], [1], [0, 0, 1, 1], [], []>} : vector<16x32xf32>, vector<32x256xf32>, vector<16x256xf32> -> vector<16x256xf32>
    %cst_80 = arith.constant dense<0.000000e+00> : vector<16x256xf32>
    %321 = tpu.matmul %308, %1, %cst_80 {dimension_numbers = #tpu.dot_dimension_numbers<[1], [0], [0], [1], [0, 0, 1, 1], [], []>} : vector<16x64xf32>, vector<64x256xf32>, vector<16x256xf32> -> vector<16x256xf32>
    %322 = arith.addf %320, %321 : vector<16x256xf32>
    %323 = vector.broadcast %2 : vector<1x256xf32> to vector<16x256xf32>
    %324 = arith.addf %322, %323 : vector<16x256xf32>
    %325 = arith.negf %324 : vector<16x256xf32>
    %326 = math.exp %325 : vector<16x256xf32>
    %cst_81 = arith.constant 1.000000e+00 : f32
    %327 = vector.broadcast %cst_81 : f32 to vector<16x256xf32>
    %328 = arith.addf %327, %326 : vector<16x256xf32>
    %329 = arith.divf %327, %328 : vector<16x256xf32>
    %330 = vector.extract_strided_slice %329 {offsets = [0, 0], sizes = [16, 64], strides = [1, 1]} : vector<16x256xf32> to vector<16x64xf32>
    %331 = vector.extract_strided_slice %329 {offsets = [0, 64], sizes = [16, 64], strides = [1, 1]} : vector<16x256xf32> to vector<16x64xf32>
    %332 = vector.extract_strided_slice %329 {offsets = [0, 192], sizes = [16, 64], strides = [1, 1]} : vector<16x256xf32> to vector<16x64xf32>
    %333 = vector.extract_strided_slice %324 {offsets = [0, 128], sizes = [16, 64], strides = [1, 1]} : vector<16x256xf32> to vector<16x64xf32>
    %334 = math.tanh %333 : vector<16x64xf32>
    %335 = arith.mulf %331, %306 : vector<16x64xf32>
    %336 = arith.mulf %330, %334 : vector<16x64xf32>
    %337 = arith.addf %335, %336 : vector<16x64xf32>
    %338 = math.tanh %337 : vector<16x64xf32>
    %339 = arith.mulf %332, %338 : vector<16x64xf32>
    %c1_i32_82 = arith.constant 1 : i32
    %340 = arith.addi %c10_i32, %c1_i32_82 : i32
    %341 = vector.broadcast %340 : i32 to vector<16x1xi32>
    %342 = arith.cmpi eq, %3, %341 : vector<16x1xi32>
    %343 = vector.shape_cast %342 : vector<16x1xi1> to vector<16x1xi1>
    %344 = vector.broadcast %343 : vector<16x1xi1> to vector<16x64xi1>
    %345 = arith.select %344, %339, %314 : vector<16x64xi1>, vector<16x64xf32>
    %c11_i32 = arith.constant 11 : i32
    %c16_i32_83 = arith.constant 16 : i32
    %346 = arith.muli %c11_i32, %c16_i32_83 : i32
    %347 = tpu.assume_multiple %346, 16 : i32
    %c0_84 = arith.constant 0 : index
    %348 = arith.index_cast %347 : i32 to index
    %c0_85 = arith.constant 0 : index
    %349 = vector.load %arg1[%c0_84, %348, %c0_85] : memref<1x256x32xf32, #tpu.memory_space<vmem>>, vector<1x16x32xf32>
    %350 = vector.shape_cast %349 : vector<1x16x32xf32> to vector<16x32xf32>
    %cst_86 = arith.constant dense<0.000000e+00> : vector<16x256xf32>
    %351 = tpu.matmul %350, %0, %cst_86 {dimension_numbers = #tpu.dot_dimension_numbers<[1], [0], [0], [1], [0, 0, 1, 1], [], []>} : vector<16x32xf32>, vector<32x256xf32>, vector<16x256xf32> -> vector<16x256xf32>
    %cst_87 = arith.constant dense<0.000000e+00> : vector<16x256xf32>
    %352 = tpu.matmul %339, %1, %cst_87 {dimension_numbers = #tpu.dot_dimension_numbers<[1], [0], [0], [1], [0, 0, 1, 1], [], []>} : vector<16x64xf32>, vector<64x256xf32>, vector<16x256xf32> -> vector<16x256xf32>
    %353 = arith.addf %351, %352 : vector<16x256xf32>
    %354 = vector.broadcast %2 : vector<1x256xf32> to vector<16x256xf32>
    %355 = arith.addf %353, %354 : vector<16x256xf32>
    %356 = arith.negf %355 : vector<16x256xf32>
    %357 = math.exp %356 : vector<16x256xf32>
    %cst_88 = arith.constant 1.000000e+00 : f32
    %358 = vector.broadcast %cst_88 : f32 to vector<16x256xf32>
    %359 = arith.addf %358, %357 : vector<16x256xf32>
    %360 = arith.divf %358, %359 : vector<16x256xf32>
    %361 = vector.extract_strided_slice %360 {offsets = [0, 0], sizes = [16, 64], strides = [1, 1]} : vector<16x256xf32> to vector<16x64xf32>
    %362 = vector.extract_strided_slice %360 {offsets = [0, 64], sizes = [16, 64], strides = [1, 1]} : vector<16x256xf32> to vector<16x64xf32>
    %363 = vector.extract_strided_slice %360 {offsets = [0, 192], sizes = [16, 64], strides = [1, 1]} : vector<16x256xf32> to vector<16x64xf32>
    %364 = vector.extract_strided_slice %355 {offsets = [0, 128], sizes = [16, 64], strides = [1, 1]} : vector<16x256xf32> to vector<16x64xf32>
    %365 = math.tanh %364 : vector<16x64xf32>
    %366 = arith.mulf %362, %337 : vector<16x64xf32>
    %367 = arith.mulf %361, %365 : vector<16x64xf32>
    %368 = arith.addf %366, %367 : vector<16x64xf32>
    %369 = math.tanh %368 : vector<16x64xf32>
    %370 = arith.mulf %363, %369 : vector<16x64xf32>
    %c1_i32_89 = arith.constant 1 : i32
    %371 = arith.addi %c11_i32, %c1_i32_89 : i32
    %372 = vector.broadcast %371 : i32 to vector<16x1xi32>
    %373 = arith.cmpi eq, %3, %372 : vector<16x1xi32>
    %374 = vector.shape_cast %373 : vector<16x1xi1> to vector<16x1xi1>
    %375 = vector.broadcast %374 : vector<16x1xi1> to vector<16x64xi1>
    %376 = arith.select %375, %370, %345 : vector<16x64xi1>, vector<16x64xf32>
    %c12_i32 = arith.constant 12 : i32
    %c16_i32_90 = arith.constant 16 : i32
    %377 = arith.muli %c12_i32, %c16_i32_90 : i32
    %378 = tpu.assume_multiple %377, 16 : i32
    %c0_91 = arith.constant 0 : index
    %379 = arith.index_cast %378 : i32 to index
    %c0_92 = arith.constant 0 : index
    %380 = vector.load %arg1[%c0_91, %379, %c0_92] : memref<1x256x32xf32, #tpu.memory_space<vmem>>, vector<1x16x32xf32>
    %381 = vector.shape_cast %380 : vector<1x16x32xf32> to vector<16x32xf32>
    %cst_93 = arith.constant dense<0.000000e+00> : vector<16x256xf32>
    %382 = tpu.matmul %381, %0, %cst_93 {dimension_numbers = #tpu.dot_dimension_numbers<[1], [0], [0], [1], [0, 0, 1, 1], [], []>} : vector<16x32xf32>, vector<32x256xf32>, vector<16x256xf32> -> vector<16x256xf32>
    %cst_94 = arith.constant dense<0.000000e+00> : vector<16x256xf32>
    %383 = tpu.matmul %370, %1, %cst_94 {dimension_numbers = #tpu.dot_dimension_numbers<[1], [0], [0], [1], [0, 0, 1, 1], [], []>} : vector<16x64xf32>, vector<64x256xf32>, vector<16x256xf32> -> vector<16x256xf32>
    %384 = arith.addf %382, %383 : vector<16x256xf32>
    %385 = vector.broadcast %2 : vector<1x256xf32> to vector<16x256xf32>
    %386 = arith.addf %384, %385 : vector<16x256xf32>
    %387 = arith.negf %386 : vector<16x256xf32>
    %388 = math.exp %387 : vector<16x256xf32>
    %cst_95 = arith.constant 1.000000e+00 : f32
    %389 = vector.broadcast %cst_95 : f32 to vector<16x256xf32>
    %390 = arith.addf %389, %388 : vector<16x256xf32>
    %391 = arith.divf %389, %390 : vector<16x256xf32>
    %392 = vector.extract_strided_slice %391 {offsets = [0, 0], sizes = [16, 64], strides = [1, 1]} : vector<16x256xf32> to vector<16x64xf32>
    %393 = vector.extract_strided_slice %391 {offsets = [0, 64], sizes = [16, 64], strides = [1, 1]} : vector<16x256xf32> to vector<16x64xf32>
    %394 = vector.extract_strided_slice %391 {offsets = [0, 192], sizes = [16, 64], strides = [1, 1]} : vector<16x256xf32> to vector<16x64xf32>
    %395 = vector.extract_strided_slice %386 {offsets = [0, 128], sizes = [16, 64], strides = [1, 1]} : vector<16x256xf32> to vector<16x64xf32>
    %396 = math.tanh %395 : vector<16x64xf32>
    %397 = arith.mulf %393, %368 : vector<16x64xf32>
    %398 = arith.mulf %392, %396 : vector<16x64xf32>
    %399 = arith.addf %397, %398 : vector<16x64xf32>
    %400 = math.tanh %399 : vector<16x64xf32>
    %401 = arith.mulf %394, %400 : vector<16x64xf32>
    %c1_i32_96 = arith.constant 1 : i32
    %402 = arith.addi %c12_i32, %c1_i32_96 : i32
    %403 = vector.broadcast %402 : i32 to vector<16x1xi32>
    %404 = arith.cmpi eq, %3, %403 : vector<16x1xi32>
    %405 = vector.shape_cast %404 : vector<16x1xi1> to vector<16x1xi1>
    %406 = vector.broadcast %405 : vector<16x1xi1> to vector<16x64xi1>
    %407 = arith.select %406, %401, %376 : vector<16x64xi1>, vector<16x64xf32>
    %c13_i32 = arith.constant 13 : i32
    %c16_i32_97 = arith.constant 16 : i32
    %408 = arith.muli %c13_i32, %c16_i32_97 : i32
    %409 = tpu.assume_multiple %408, 16 : i32
    %c0_98 = arith.constant 0 : index
    %410 = arith.index_cast %409 : i32 to index
    %c0_99 = arith.constant 0 : index
    %411 = vector.load %arg1[%c0_98, %410, %c0_99] : memref<1x256x32xf32, #tpu.memory_space<vmem>>, vector<1x16x32xf32>
    %412 = vector.shape_cast %411 : vector<1x16x32xf32> to vector<16x32xf32>
    %cst_100 = arith.constant dense<0.000000e+00> : vector<16x256xf32>
    %413 = tpu.matmul %412, %0, %cst_100 {dimension_numbers = #tpu.dot_dimension_numbers<[1], [0], [0], [1], [0, 0, 1, 1], [], []>} : vector<16x32xf32>, vector<32x256xf32>, vector<16x256xf32> -> vector<16x256xf32>
    %cst_101 = arith.constant dense<0.000000e+00> : vector<16x256xf32>
    %414 = tpu.matmul %401, %1, %cst_101 {dimension_numbers = #tpu.dot_dimension_numbers<[1], [0], [0], [1], [0, 0, 1, 1], [], []>} : vector<16x64xf32>, vector<64x256xf32>, vector<16x256xf32> -> vector<16x256xf32>
    %415 = arith.addf %413, %414 : vector<16x256xf32>
    %416 = vector.broadcast %2 : vector<1x256xf32> to vector<16x256xf32>
    %417 = arith.addf %415, %416 : vector<16x256xf32>
    %418 = arith.negf %417 : vector<16x256xf32>
    %419 = math.exp %418 : vector<16x256xf32>
    %cst_102 = arith.constant 1.000000e+00 : f32
    %420 = vector.broadcast %cst_102 : f32 to vector<16x256xf32>
    %421 = arith.addf %420, %419 : vector<16x256xf32>
    %422 = arith.divf %420, %421 : vector<16x256xf32>
    %423 = vector.extract_strided_slice %422 {offsets = [0, 0], sizes = [16, 64], strides = [1, 1]} : vector<16x256xf32> to vector<16x64xf32>
    %424 = vector.extract_strided_slice %422 {offsets = [0, 64], sizes = [16, 64], strides = [1, 1]} : vector<16x256xf32> to vector<16x64xf32>
    %425 = vector.extract_strided_slice %422 {offsets = [0, 192], sizes = [16, 64], strides = [1, 1]} : vector<16x256xf32> to vector<16x64xf32>
    %426 = vector.extract_strided_slice %417 {offsets = [0, 128], sizes = [16, 64], strides = [1, 1]} : vector<16x256xf32> to vector<16x64xf32>
    %427 = math.tanh %426 : vector<16x64xf32>
    %428 = arith.mulf %424, %399 : vector<16x64xf32>
    %429 = arith.mulf %423, %427 : vector<16x64xf32>
    %430 = arith.addf %428, %429 : vector<16x64xf32>
    %431 = math.tanh %430 : vector<16x64xf32>
    %432 = arith.mulf %425, %431 : vector<16x64xf32>
    %c1_i32_103 = arith.constant 1 : i32
    %433 = arith.addi %c13_i32, %c1_i32_103 : i32
    %434 = vector.broadcast %433 : i32 to vector<16x1xi32>
    %435 = arith.cmpi eq, %3, %434 : vector<16x1xi32>
    %436 = vector.shape_cast %435 : vector<16x1xi1> to vector<16x1xi1>
    %437 = vector.broadcast %436 : vector<16x1xi1> to vector<16x64xi1>
    %438 = arith.select %437, %432, %407 : vector<16x64xi1>, vector<16x64xf32>
    %c14_i32 = arith.constant 14 : i32
    %c16_i32_104 = arith.constant 16 : i32
    %439 = arith.muli %c14_i32, %c16_i32_104 : i32
    %440 = tpu.assume_multiple %439, 16 : i32
    %c0_105 = arith.constant 0 : index
    %441 = arith.index_cast %440 : i32 to index
    %c0_106 = arith.constant 0 : index
    %442 = vector.load %arg1[%c0_105, %441, %c0_106] : memref<1x256x32xf32, #tpu.memory_space<vmem>>, vector<1x16x32xf32>
    %443 = vector.shape_cast %442 : vector<1x16x32xf32> to vector<16x32xf32>
    %cst_107 = arith.constant dense<0.000000e+00> : vector<16x256xf32>
    %444 = tpu.matmul %443, %0, %cst_107 {dimension_numbers = #tpu.dot_dimension_numbers<[1], [0], [0], [1], [0, 0, 1, 1], [], []>} : vector<16x32xf32>, vector<32x256xf32>, vector<16x256xf32> -> vector<16x256xf32>
    %cst_108 = arith.constant dense<0.000000e+00> : vector<16x256xf32>
    %445 = tpu.matmul %432, %1, %cst_108 {dimension_numbers = #tpu.dot_dimension_numbers<[1], [0], [0], [1], [0, 0, 1, 1], [], []>} : vector<16x64xf32>, vector<64x256xf32>, vector<16x256xf32> -> vector<16x256xf32>
    %446 = arith.addf %444, %445 : vector<16x256xf32>
    %447 = vector.broadcast %2 : vector<1x256xf32> to vector<16x256xf32>
    %448 = arith.addf %446, %447 : vector<16x256xf32>
    %449 = arith.negf %448 : vector<16x256xf32>
    %450 = math.exp %449 : vector<16x256xf32>
    %cst_109 = arith.constant 1.000000e+00 : f32
    %451 = vector.broadcast %cst_109 : f32 to vector<16x256xf32>
    %452 = arith.addf %451, %450 : vector<16x256xf32>
    %453 = arith.divf %451, %452 : vector<16x256xf32>
    %454 = vector.extract_strided_slice %453 {offsets = [0, 0], sizes = [16, 64], strides = [1, 1]} : vector<16x256xf32> to vector<16x64xf32>
    %455 = vector.extract_strided_slice %453 {offsets = [0, 64], sizes = [16, 64], strides = [1, 1]} : vector<16x256xf32> to vector<16x64xf32>
    %456 = vector.extract_strided_slice %453 {offsets = [0, 192], sizes = [16, 64], strides = [1, 1]} : vector<16x256xf32> to vector<16x64xf32>
    %457 = vector.extract_strided_slice %448 {offsets = [0, 128], sizes = [16, 64], strides = [1, 1]} : vector<16x256xf32> to vector<16x64xf32>
    %458 = math.tanh %457 : vector<16x64xf32>
    %459 = arith.mulf %455, %430 : vector<16x64xf32>
    %460 = arith.mulf %454, %458 : vector<16x64xf32>
    %461 = arith.addf %459, %460 : vector<16x64xf32>
    %462 = math.tanh %461 : vector<16x64xf32>
    %463 = arith.mulf %456, %462 : vector<16x64xf32>
    %c1_i32_110 = arith.constant 1 : i32
    %464 = arith.addi %c14_i32, %c1_i32_110 : i32
    %465 = vector.broadcast %464 : i32 to vector<16x1xi32>
    %466 = arith.cmpi eq, %3, %465 : vector<16x1xi32>
    %467 = vector.shape_cast %466 : vector<16x1xi1> to vector<16x1xi1>
    %468 = vector.broadcast %467 : vector<16x1xi1> to vector<16x64xi1>
    %469 = arith.select %468, %463, %438 : vector<16x64xi1>, vector<16x64xf32>
    %c15_i32 = arith.constant 15 : i32
    %c16_i32_111 = arith.constant 16 : i32
    %470 = arith.muli %c15_i32, %c16_i32_111 : i32
    %471 = tpu.assume_multiple %470, 16 : i32
    %c0_112 = arith.constant 0 : index
    %472 = arith.index_cast %471 : i32 to index
    %c0_113 = arith.constant 0 : index
    %473 = vector.load %arg1[%c0_112, %472, %c0_113] : memref<1x256x32xf32, #tpu.memory_space<vmem>>, vector<1x16x32xf32>
    %474 = vector.shape_cast %473 : vector<1x16x32xf32> to vector<16x32xf32>
    %cst_114 = arith.constant dense<0.000000e+00> : vector<16x256xf32>
    %475 = tpu.matmul %474, %0, %cst_114 {dimension_numbers = #tpu.dot_dimension_numbers<[1], [0], [0], [1], [0, 0, 1, 1], [], []>} : vector<16x32xf32>, vector<32x256xf32>, vector<16x256xf32> -> vector<16x256xf32>
    %cst_115 = arith.constant dense<0.000000e+00> : vector<16x256xf32>
    %476 = tpu.matmul %463, %1, %cst_115 {dimension_numbers = #tpu.dot_dimension_numbers<[1], [0], [0], [1], [0, 0, 1, 1], [], []>} : vector<16x64xf32>, vector<64x256xf32>, vector<16x256xf32> -> vector<16x256xf32>
    %477 = arith.addf %475, %476 : vector<16x256xf32>
    %478 = vector.broadcast %2 : vector<1x256xf32> to vector<16x256xf32>
    %479 = arith.addf %477, %478 : vector<16x256xf32>
    %480 = arith.negf %479 : vector<16x256xf32>
    %481 = math.exp %480 : vector<16x256xf32>
    %cst_116 = arith.constant 1.000000e+00 : f32
    %482 = vector.broadcast %cst_116 : f32 to vector<16x256xf32>
    %483 = arith.addf %482, %481 : vector<16x256xf32>
    %484 = arith.divf %482, %483 : vector<16x256xf32>
    %485 = vector.extract_strided_slice %484 {offsets = [0, 0], sizes = [16, 64], strides = [1, 1]} : vector<16x256xf32> to vector<16x64xf32>
    %486 = vector.extract_strided_slice %484 {offsets = [0, 64], sizes = [16, 64], strides = [1, 1]} : vector<16x256xf32> to vector<16x64xf32>
    %487 = vector.extract_strided_slice %484 {offsets = [0, 192], sizes = [16, 64], strides = [1, 1]} : vector<16x256xf32> to vector<16x64xf32>
    %488 = vector.extract_strided_slice %479 {offsets = [0, 128], sizes = [16, 64], strides = [1, 1]} : vector<16x256xf32> to vector<16x64xf32>
    %489 = math.tanh %488 : vector<16x64xf32>
    %490 = arith.mulf %486, %461 : vector<16x64xf32>
    %491 = arith.mulf %485, %489 : vector<16x64xf32>
    %492 = arith.addf %490, %491 : vector<16x64xf32>
    %493 = math.tanh %492 : vector<16x64xf32>
    %494 = arith.mulf %487, %493 : vector<16x64xf32>
    %c1_i32_117 = arith.constant 1 : i32
    %495 = arith.addi %c15_i32, %c1_i32_117 : i32
    %496 = vector.broadcast %495 : i32 to vector<16x1xi32>
    %497 = arith.cmpi eq, %3, %496 : vector<16x1xi32>
    %498 = vector.shape_cast %497 : vector<16x1xi1> to vector<16x1xi1>
    %499 = vector.broadcast %498 : vector<16x1xi1> to vector<16x64xi1>
    %500 = arith.select %499, %494, %469 : vector<16x64xi1>, vector<16x64xf32>
    %c16_i32_118 = arith.constant 16 : i32
    %c0_119 = arith.constant 0 : index
    %c0_120 = arith.constant 0 : index
    %501 = vector.load %arg2[%c0_119, %c0_120] : memref<16x32xf32, #tpu.memory_space<vmem>>, vector<16x32xf32>
    %c0_121 = arith.constant 0 : index
    %c0_122 = arith.constant 0 : index
    %502 = vector.load %arg7[%c0_121, %c0_122] : memref<32x256xf32, #tpu.memory_space<vmem>>, vector<32x256xf32>
    %cst_123 = arith.constant dense<0.000000e+00> : vector<16x256xf32>
    %503 = tpu.matmul %501, %502, %cst_123 {dimension_numbers = #tpu.dot_dimension_numbers<[1], [0], [0], [1], [0, 0, 1, 1], [], []>} : vector<16x32xf32>, vector<32x256xf32>, vector<16x256xf32> -> vector<16x256xf32>
    %c0_124 = arith.constant 0 : index
    %c0_125 = arith.constant 0 : index
    %504 = vector.load %arg8[%c0_124, %c0_125] : memref<1x256xf32, #tpu.memory_space<vmem>>, vector<1x256xf32>
    %505 = vector.broadcast %504 : vector<1x256xf32> to vector<16x256xf32>
    %506 = arith.addf %503, %505 : vector<16x256xf32>
    %507 = arith.negf %506 : vector<16x256xf32>
    %508 = math.exp %507 : vector<16x256xf32>
    %cst_126 = arith.constant 1.000000e+00 : f32
    %509 = vector.broadcast %cst_126 : f32 to vector<16x256xf32>
    %510 = arith.addf %509, %508 : vector<16x256xf32>
    %511 = arith.divf %509, %510 : vector<16x256xf32>
    %512 = vector.extract_strided_slice %511 {offsets = [0, 0], sizes = [16, 64], strides = [1, 1]} : vector<16x256xf32> to vector<16x64xf32>
    %513 = vector.extract_strided_slice %506 {offsets = [0, 128], sizes = [16, 64], strides = [1, 1]} : vector<16x256xf32> to vector<16x64xf32>
    %514 = math.tanh %513 : vector<16x64xf32>
    %515 = arith.mulf %512, %514 : vector<16x64xf32>
    %516 = vector.extract_strided_slice %511 {offsets = [0, 192], sizes = [16, 64], strides = [1, 1]} : vector<16x256xf32> to vector<16x64xf32>
    %517 = math.tanh %515 : vector<16x64xf32>
    %518 = arith.mulf %516, %517 : vector<16x64xf32>
    %519 = tpu.concatenate %500, %518 in 1 : vector<16x64xf32>, vector<16x64xf32> -> vector<16x128xf32>
    %c0_127 = arith.constant 0 : index
    %c0_128 = arith.constant 0 : index
    %520 = vector.load %arg9[%c0_127, %c0_128] : memref<16x128xf32, #tpu.memory_space<vmem>>, vector<16x128xf32>
    tpu.vector_store %arg9[%c0_127, %c0_128], %519 {strides = array<i32>} : memref<16x128xf32, #tpu.memory_space<vmem>>, vector<16x128xf32>,
    return
  }
  func.func @transform_0(%arg0: i32) -> (i32, i32, i32) {
    %c0_i32 = arith.constant 0 : i32
    %c0_i32_0 = arith.constant 0 : i32
    %c0_i32_1 = arith.constant 0 : i32
    return %arg0, %c0_i32, %c0_i32_0 : i32, i32, i32
  }
  func.func @transform_1(%arg0: i32) -> (i32, i32) {
    %c0_i32 = arith.constant 0 : i32
    %c0_i32_0 = arith.constant 0 : i32
    return %arg0, %c0_i32 : i32, i32
  }
  func.func @transform_2(%arg0: i32) -> (i32, i32) {
    %c0_i32 = arith.constant 0 : i32
    %c0_i32_0 = arith.constant 0 : i32
    return %arg0, %c0_i32 : i32, i32
  }
  func.func @transform_3(%arg0: i32) -> (i32, i32) {
    %c0_i32 = arith.constant 0 : i32
    %c0_i32_0 = arith.constant 0 : i32
    %c0_i32_1 = arith.constant 0 : i32
    return %c0_i32, %c0_i32_0 : i32, i32
  }
  func.func @transform_4(%arg0: i32) -> (i32, i32) {
    %c0_i32 = arith.constant 0 : i32
    %c0_i32_0 = arith.constant 0 : i32
    %c0_i32_1 = arith.constant 0 : i32
    return %c0_i32, %c0_i32_0 : i32, i32
  }
  func.func @transform_5(%arg0: i32) -> (i32, i32) {
    %c0_i32 = arith.constant 0 : i32
    %c0_i32_0 = arith.constant 0 : i32
    %c0_i32_1 = arith.constant 0 : i32
    return %c0_i32, %c0_i32_0 : i32, i32
  }
  func.func @transform_6(%arg0: i32) -> (i32, i32) {
    %c0_i32 = arith.constant 0 : i32
    %c0_i32_0 = arith.constant 0 : i32
    %c0_i32_1 = arith.constant 0 : i32
    return %c0_i32, %c0_i32_0 : i32, i32
  }
  func.func @transform_7(%arg0: i32) -> (i32, i32) {
    %c0_i32 = arith.constant 0 : i32
    %c0_i32_0 = arith.constant 0 : i32
    %c0_i32_1 = arith.constant 0 : i32
    return %c0_i32, %c0_i32_0 : i32, i32
  }
  func.func @transform_8(%arg0: i32) -> (i32, i32) {
    %c0_i32 = arith.constant 0 : i32
    %c0_i32_0 = arith.constant 0 : i32
    return %arg0, %c0_i32 : i32, i32
  }
}

</mosaic_0001>

<bundles_post_ra>
// kernel: tpu_custom_call.1
= control target key start
LH: loop header
LB: loop body
LE: loop exit
PB: predicated region body
PF: predicated region fallthrough
CT: control target
= control target key end

     0   :  { %v5057_v7 = vmov 0.0   ;;  %s6232_s0 = inlined_call_operand.vmem [shape: f32[1,256,32], index: 0, kind: input, shape index: {}]   ;;  %s6233_s1 = inlined_call_operand.vmem [shape: f32[16,32], index: 1, kind: input, shape index: {}]   ;;  %s6234_s2 = inlined_call_operand.vmem [shape: s32[16,1], index: 2, kind: input, shape index: {}]   ;;  %s6235_s3 = inlined_call_operand.vmem [shape: f32[32,256], index: 3, kind: input, shape index: {}]   ;;  %s6236_s4 = inlined_call_operand.vmem [shape: f32[64,256], index: 4, kind: input, shape index: {}]   ;;  %s6237_s5 = inlined_call_operand.vmem [shape: f32[1,256], index: 5, kind: input, shape index: {}]   ;;  %s6238_s6 = inlined_call_operand.vmem [shape: f32[32,256], index: 6, kind: input, shape index: {}]   ;;  %s6239_s7 = inlined_call_operand.vmem [shape: f32[1,256], index: 7, kind: input, shape index: {}]   ;;  %s6240_s8 = inlined_call_operand.hbm [shape: f32[16,128], index: 8, kind: output, shape index: {}]  }
   0x1   :  { %v39_v0 = vld [vmem:[%s6236_s4 + $0x8] sm:$0xff]  ;;  %v41_v1 = vld [vmem:[%s6236_s4 + $0x18] sm:$0xff]  ;;  %v38_v2 = vld [vmem:[%s6236_s4] sm:$0xff]  ;;  %127 = vmatprep.mubr.f32.mxu0 %v5057_v7  ;;  %374 = vmatprep.mubr.f32.mxu1 %v5057_v7 }
   0x2   :  { %v5117_v3 = vpack.c.bf16 %v41_v1, %v39_v0  ;;  %v40_v4 = vld [vmem:[%s6236_s4 + $0x10] sm:$0xff]  ;;  %v43_v5 = vld [vmem:[%s6236_s4 + $0x28] sm:$0xff]  ;;  %v45_v6 = vld [vmem:[%s6236_s4 + $0x38] sm:$0xff] }
   0x3   :  { %v5130_v8 = vpack.c.bf16 %v40_v4, %v38_v2  ;;  %v5132_v9 = vpack.c.bf16 %v45_v6, %v43_v5  ;;  %v42_v10 = vld [vmem:[%s6236_s4 + $0x20] sm:$0xff]  ;;  %v44_v11 = vld [vmem:[%s6236_s4 + $0x30] sm:$0xff]  ;;  %v47_v12 = vld [vmem:[%s6236_s4 + $0x48] sm:$0xff] }
   0x4   :  { %4158 = vmatprep.subr.bf16.mxu0 %v5117_v3  ;;  %v49_v13 = vld [vmem:[%s6236_s4 + $0x58] sm:$0xff]  ;;  %4182 = vmatprep.subr.bf16.mxu1 %v5117_v3  ;;  %v5149_v14 = vpack.c.bf16 %v44_v11, %v42_v10  ;;  %v46_v16 = vld [vmem:[%s6236_s4 + $0x40] sm:$0xff]  ;;  %v48_v17 = vld [vmem:[%s6236_s4 + $0x50] sm:$0xff] }
   0x5   :  { %4160 = vmatpush1.bf16.msra.mxu0 %v5130_v8  ;;  %4184 = vmatpush1.bf16.msra.mxu1 %v5130_v8  ;;  %v5153_v15 = vpack.c.bf16 %v49_v13, %v47_v12  ;;  %v51_v18 = vld [vmem:[%s6236_s4 + $0x68] sm:$0xff]  ;;  %v53_v19 = vld [vmem:[%s6236_s4 + $0x78] sm:$0xff]  ;;  %v5169_v20 = vpack.c.bf16 %v48_v17, %v46_v16  ;;  %v50_v22 = vld [vmem:[%s6236_s4 + $0x60] sm:$0xff] }
   0x6   :  { %4162 = vmatprep.subr.bf16.mxu0 %v5132_v9  ;;  %4186 = vmatprep.subr.bf16.mxu1 %v5132_v9  ;;  %v5173_v21 = vpack.c.bf16 %v53_v19, %v51_v18  ;;  %v52_v23 = vld [vmem:[%s6236_s4 + $0x70] sm:$0xff] }
   0x9   :  { %4164 = vmatpush1.bf16.msra.mxu0 %v5149_v14  ;;  %4188 = vmatpush1.bf16.msra.mxu1 %v5149_v14 }
   0xa   :  { %4166 = vmatprep.subr.bf16.mxu0 %v5153_v15  ;;  %4190 = vmatprep.subr.bf16.mxu1 %v5153_v15 }
   0xb   :  { %13 = vsyncpa [#allocation3], 0  ;;  %v31_v24 = vld [vmem:[%s6235_s3 + $0x8] sm:$0xff]  ;;  %v33_v25 = vld [vmem:[%s6235_s3 + $0x18] sm:$0xff]  ;;  %v5189_v26 = vpack.c.bf16 %v52_v23, %v50_v22  ;;  %vm140_vm0 = vcmask 261120   ;;  %v225_v39 = vlaneseq  ;;  %vm59_vm1 = vcmask 523264  }
   0xc   :  { %v5193_v27 = vpack.c.bf16 %v33_v25, %v31_v24  ;;  %v30_v28 = vld [vmem:[%s6235_s3] sm:$0xff]  ;;  %v32_v29 = vld [vmem:[%s6235_s3 + $0x10] sm:$0xff]  ;;  %v35_v30 = vld [vmem:[%s6235_s3 + $0x28] sm:$0xff] }
   0xd   :  { %4168 = vmatpush1.bf16.msra.mxu0 %v5169_v20  ;;  %4192 = vmatpush1.bf16.msra.mxu1 %v5169_v20  ;;  %v37_v31 = vld [vmem:[%s6235_s3 + $0x38] sm:$0xff]  ;;  %v5209_v32 = vpack.c.bf16 %v32_v29, %v30_v28  ;;  %v34_v34 = vld [vmem:[%s6235_s3 + $0x20] sm:$0xff]  ;;  %v36_v35 = vld [vmem:[%s6235_s3 + $0x30] sm:$0xff]  ;;  %v5250_v40 = vshrl.u32 %v225_v39, 7 }
   0xe   :  { %4170 = vmatprep.subr.bf16.mxu0 %v5173_v21  ;;  %4194 = vmatprep.subr.bf16.mxu1 %v5173_v21  ;;  %v5213_v33 = vpack.c.bf16 %v37_v31, %v35_v30  ;;  %v5225_v36 = vpack.c.bf16 %v36_v35, %v34_v34  ;;  %v57_v37 = vld [vmem:[%s6232_s0] sm:$0xff]  ;;  %v58_v38 = vld [vmem:[%s6232_s0 + $0x8] sm:$0xff]  ;;  %v4001_v34 = vld [vmem:[%s6232_s0 + $0x10] sm:$0xff] }
   0xf   :  { %v227_v41 = vsub.s32 0, %v5250_v40  ;;  %v54_v42 = vld [vmem:[%s6237_s5] sm:$0x3]  ;;  %v231_v49 = vsub.s32 1, %v5250_v40  ;;  %s5058_s5 = smov 64   ;;  %v4002_v35 = vld [vmem:[%s6232_s0 + $0x18] sm:$0xff] }
  0x11   :  { %4172 = vmatpush1.bf16.msra.mxu0 %v5189_v26  ;;  %4196 = vmatpush1.bf16.msra.mxu1 %v5189_v26  ;;  %v5258_v43 = vrot.slane %v54_v42, %v227_v41  ;;  %v5265_v53 = vrot.slane %v54_v42, %v231_v49 }
  0x12   :  { %4174 = vmatprep.subr.bf16.mxu0 %v5193_v27  ;;  %4198 = vmatprep.subr.bf16.mxu1 %v5193_v27 }
  0x14   :  { %128 = vmatmul.mubr.f32.vlgmr.msra.gmra.mrb[0].mxu0 %v5057_v7 }
  0x15   :  { %4176 = vmatpush1.bf16.msra.mxu0 %v5209_v32  ;;  %133 = vmatprep.mubr.f32.mxu0 %v5057_v7 }
  0x16   :  { %4178 = vmatprep.subr.bf16.mxu0 %v5213_v33 }
  0x18   :  { %134 = vmatmul.mubr.f32.gmra.mrb[2].mxu0 %v5057_v7 }
  0x19   :  { %4180 = vmatpush1.bf16.msra.mxu0 %v5225_v36  ;;  %211 = vmatprep.mubr.f32.mxu0 %v5057_v7 }
  0x1a   :  { %4206 = vmatprep.subr.bf16.mxu0 %v5117_v3 }
  0x1c   :  { %3995 = vmatmul.mubr.msk.f32.vlgmr.msra.gmra.mrb[0].mxu0 %vm140_vm0, %v57_v37 }
  0x1d   :  { %217 = vmatprep.mubr.f32.mxu0 %v5057_v7  ;;  %4208 = vmatpush1.bf16.msra.mxu0 %v5130_v8 }
  0x1e   :  { %4210 = vmatprep.subr.bf16.mxu0 %v5132_v9 }
  0x20   :  { %3996 = vmatmul.mubr.msk.f32.gmra.mrb[2].mxu0 %vm140_vm0, %v58_v38 }
  0x21   :  { %4212 = vmatpush1.bf16.msra.mxu0 %v5149_v14  ;;  %609 = vmatprep.mubr.f32.mxu0 %v5057_v7 }
  0x22   :  { %4214 = vmatprep.subr.bf16.mxu0 %v5153_v15 }
  0x25   :  { %4216 = vmatpush1.bf16.msra.mxu0 %v5169_v20 }
  0x26   :  { %4218 = vmatprep.subr.bf16.mxu0 %v5173_v21 }
  0x29   :  { %4220 = vmatpush1.bf16.msra.mxu0 %v5189_v26 }
  0x2a   :  { %4222 = vmatprep.subr.bf16.mxu0 %v5193_v27 }
  0xef   :  { %v213_v44 = vpop.f32.mrb[0].mxu0 }
  0xf0   :  { %v235_v45 = vadd.f32 %v5258_v43, %v213_v44  ;;  %v215_v46 = vpop.f32.mrb[1].mxu0 }
  0xf1   :  { %v236_v54 = vadd.f32 %v5265_v53, %v215_v46 }
  0xf2   :  { %v3997_v47 = vmul.f32 -1.442695, %v235_v45 }
  0xf3   :  { %v219_v48 = vpop.f32.mrb[2].mxu0  ;;  %v3998_v2 = vmul.f32 -1.442695, %v236_v54 }
  0xf4   :  { %4625 = vpow2.f32 %v3997_v47  ;;  %v237_v50 = vadd.f32 %v5258_v43, %v219_v48  ;;  %v221_v51 = vpop.f32.mrb[3].mxu0 }
  0xf5   :  { %v238_v57 = vadd.f32 %v5265_v53, %v221_v51 }
  0xf6   :  { %v3999_v52 = vmul.f32 -1.442695, %v237_v50 }
  0xf7   :  { %v4000_v4 = vmul.f32 -1.442695, %v238_v57 }
  0xf8   :  { %4627 = vpow2.f32 %v3999_v52 }
  0xf9   :  { %4629 = vtanh.f32 %v236_v54 }
  0xfe   :  { %v4626_v55 = vpop.eup %4625 }
  0xff   :  { %v251_v56 = vadd.f32 1.0, %v4626_v55 }
 0x101   :  { %4631 = vrcp.f32 %v251_v56 }
 0x102   :  { %v4628_v58 = vpop.eup %4627  ;;  %4633 = vtanh.f32 %v238_v57 }
 0x103   :  { %v253_v59 = vadd.f32 1.0, %v4628_v58  ;;  %v4630_v60 = vpop.eup %4629 }
 0x105   :  { %4635 = vrcp.f32 %v253_v59 }
 0x106   :  { %4637 = vpow2.f32 %v3998_v2 }
 0x107   :  { %4639 = vpow2.f32 %v4000_v4 }
 0x10b   :  { %v4632_v61 = vpop.eup %4631 }
 0x10c   :  { %v267_v62 = vmul.f32 %v4632_v61, %v4630_v60  ;;  %v4634_v63 = vpop.eup %4633  ;;  %v265_v11 = vmul.f32 0.0, %v4632_v61 }
 0x10e   :  { %271 = vrot.lane.b32.xlu0 %v267_v62, %s5058_s5 }
 0x10f   :  { %v4636_v0 = vpop.eup %4635 }
 0x110   :  { %v268_v1 = vmul.f32 %v4636_v0, %v4634_v63  ;;  %v4638_v5 = vpop.eup %4637  ;;  %v266_v17 = vmul.f32 0.0, %v4636_v0 }
 0x111   :  { %v252_v6 = vadd.f32 1.0, %v4638_v5  ;;  %v4640_v10 = vpop.eup %4639 }
 0x112   :  { %273 = vrot.lane.b32.xlu0 %v268_v1, %s5058_s5  ;;  %v254_v16 = vadd.f32 1.0, %v4640_v10 }
 0x113   :  { %4641 = vrcp.f32 %v252_v6 }
 0x11d   :  { %v4642_v22 = vpop.eup %4641 }
 0x180   :  { %v272_v12 = vpop.permute.xlu0 %271 }
 0x181   :  { %v5271_v13 = vadd.f32 %v272_v12, %v265_v11 }
 0x183   :  { %4643 = vtanh.f32 %v5271_v13 }
 0x184   :  { %v274_v18 = vpop.permute.xlu0 %273  ;;  %4645 = vrcp.f32 %v254_v16 }
 0x185   :  { %v5274_v19 = vadd.f32 %v274_v18, %v266_v17 }
 0x187   :  { %4647 = vtanh.f32 %v5274_v19 }
 0x18d   :  { %v4644_v23 = vpop.eup %4643 }
 0x18e   :  { %v5277_v24 = vmul.f32 %v4644_v23, %v4642_v22  ;;  %v4646_v25 = vpop.eup %4645 }
 0x190   :  { %302 = vrot.lane.b32.xlu1 %v5277_v24, %s5058_s5 }
 0x191   :  { %v4648_v28 = vpop.eup %4647 }
 0x192   :  { %v5281_v29 = vmul.f32 %v4648_v28, %v4646_v25 }
 0x194   :  { %304 = vrot.lane.b32.xlu1 %v5281_v29, %s5058_s5 }
 0x202   :  { %v303_v30 = vpop.permute.xlu1 %302 }
 0x203   :  { %4003 = vmatmul.mubr.msk.f32.vlgmr.msra.gmra.mrb[0].mxu1 %vm59_vm1, %v303_v30  ;;  %v4011_v30 = vld [vmem:[%s6232_s0 + $0x20] sm:$0xff] }
 0x204   :  { %4200 = vmatpush1.bf16.msra.mxu1 %v5209_v32  ;;  %380 = vmatprep.mubr.f32.mxu1 %v5057_v7 }
 0x205   :  { %4202 = vmatprep.subr.bf16.mxu1 %v5213_v33 }
 0x206   :  { %v305_v31 = vpop.permute.xlu1 %304 }
 0x207   :  { %4004 = vmatmul.mubr.msk.f32.gmra.mrb[2].mxu1 %vm59_vm1, %v305_v31  ;;  %v4012_v31 = vld [vmem:[%s6232_s0 + $0x28] sm:$0xff] }
 0x208   :  { %4204 = vmatpush1.bf16.msra.mxu1 %v5225_v36  ;;  %457 = vmatprep.mubr.f32.mxu1 %v5057_v7 }
 0x209   :  { %4230 = vmatprep.subr.bf16.mxu1 %v5117_v3 }
 0x20b   :  { %4005 = vmatmul.mubr.msk.f32.vlgmr.msra.gmra.mrb[0].mxu1 %vm140_vm0, %v4001_v34 }
 0x20c   :  { %463 = vmatprep.mubr.f32.mxu1 %v5057_v7  ;;  %4232 = vmatpush1.bf16.msra.mxu1 %v5130_v8 }
 0x20d   :  { %4234 = vmatprep.subr.bf16.mxu1 %v5132_v9 }
 0x20f   :  { %4006 = vmatmul.mubr.msk.f32.gmra.mrb[2].mxu1 %vm140_vm0, %v4002_v35 }
 0x210   :  { %4236 = vmatpush1.bf16.msra.mxu1 %v5149_v14  ;;  %844 = vmatprep.mubr.f32.mxu1 %v5057_v7 }
 0x211   :  { %4238 = vmatprep.subr.bf16.mxu1 %v5153_v15 }
 0x214   :  { %4240 = vmatpush1.bf16.msra.mxu1 %v5169_v20 }
 0x215   :  { %4242 = vmatprep.subr.bf16.mxu1 %v5173_v21 }
 0x218   :  { %4244 = vmatpush1.bf16.msra.mxu1 %v5189_v26 }
 0x219   :  { %4246 = vmatprep.subr.bf16.mxu1 %v5193_v27 }
 0x2de   :  { %v459_v37 = vpop.f32.mrb[0].mxu1 }
 0x2df   :  { %v470_v38 = vadd.f32 %v459_v37, %v5258_v43  ;;  %v461_v39 = vpop.f32.mrb[1].mxu1 }
 0x2e0   :  { %v471_v48 = vadd.f32 %v461_v39, %v5265_v53 }
 0x2e1   :  { %v4007_v42 = vmul.f32 -1.442695, %v470_v38 }
 0x2e2   :  { %v465_v44 = vpop.f32.mrb[2].mxu1  ;;  %v4008_v62 = vmul.f32 -1.442695, %v471_v48 }
 0x2e3   :  { %4649 = vpow2.f32 %v4007_v42  ;;  %v472_v45 = vadd.f32 %v465_v44, %v5258_v43  ;;  %v467_v46 = vpop.f32.mrb[3].mxu1 }
 0x2e4   :  { %v473_v52 = vadd.f32 %v467_v46, %v5265_v53 }
 0x2e5   :  { %v4009_v47 = vmul.f32 -1.442695, %v472_v45 }
 0x2e6   :  { %v4010_v63 = vmul.f32 -1.442695, %v473_v52 }
 0x2e7   :  { %4651 = vpow2.f32 %v4009_v47 }
 0x2e8   :  { %4653 = vtanh.f32 %v471_v48 }
 0x2ed   :  { %v4650_v50 = vpop.eup %4649 }
 0x2ee   :  { %v486_v51 = vadd.f32 1.0, %v4650_v50 }
 0x2f0   :  { %4655 = vrcp.f32 %v486_v51 }
 0x2f1   :  { %v4652_v54 = vpop.eup %4651  ;;  %4657 = vtanh.f32 %v473_v52 }
 0x2f2   :  { %v488_v55 = vadd.f32 1.0, %v4652_v54  ;;  %v4654_v56 = vpop.eup %4653 }
 0x2f4   :  { %4659 = vrcp.f32 %v488_v55 }
 0x2f5   :  { %4661 = vpow2.f32 %v4008_v62 }
 0x2f6   :  { %4663 = vpow2.f32 %v4010_v63 }
 0x2fa   :  { %v4656_v57 = vpop.eup %4655 }
 0x2fb   :  { %v502_v58 = vmul.f32 %v4656_v57, %v4654_v56  ;;  %v4658_v59 = vpop.eup %4657  ;;  %v500_v4 = vmul.f32 %v4656_v57, %v5271_v13 }
 0x2fd   :  { %506 = vrot.lane.b32.xlu0 %v502_v58, %s5058_s5 }
 0x2fe   :  { %v4660_v60 = vpop.eup %4659 }
 0x2ff   :  { %v503_v61 = vmul.f32 %v4660_v60, %v4658_v59  ;;  %v4662_v0 = vpop.eup %4661  ;;  %v501_v11 = vmul.f32 %v4660_v60, %v5274_v19 }
 0x300   :  { %v487_v1 = vadd.f32 1.0, %v4662_v0  ;;  %v4664_v2 = vpop.eup %4663 }
 0x301   :  { %508 = vrot.lane.b32.xlu1 %v503_v61, %s5058_s5  ;;  %v489_v10 = vadd.f32 1.0, %v4664_v2 }
 0x302   :  { %4665 = vrcp.f32 %v487_v1 }
 0x30c   :  { %v4666_v17 = vpop.eup %4665 }
 0x36f   :  { %v507_v5 = vpop.permute.xlu0 %506 }
 0x370   :  { %v5318_v6 = vadd.f32 %v507_v5, %v500_v4 }
 0x372   :  { %4667 = vtanh.f32 %v5318_v6 }
 0x373   :  { %v509_v12 = vpop.permute.xlu1 %508  ;;  %4669 = vrcp.f32 %v489_v10 }
 0x374   :  { %v5322_v16 = vadd.f32 %v509_v12, %v501_v11 }
 0x376   :  { %4671 = vtanh.f32 %v5322_v16 }
 0x37c   :  { %v4668_v18 = vpop.eup %4667 }
 0x37d   :  { %v5325_v22 = vmul.f32 %v4668_v18, %v4666_v17  ;;  %v4670_v13 = vpop.eup %4669 }
 0x37f   :  { %537 = vrot.lane.b32.xlu0 %v5325_v22, %s5058_s5 }
 0x380   :  { %v4672_v23 = vpop.eup %4671 }
 0x381   :  { %v5329_v25 = vmul.f32 %v4672_v23, %v4670_v13 }
 0x383   :  { %539 = vrot.lane.b32.xlu1 %v5329_v25, %s5058_s5 }
 0x3f1   :  { %v538_v19 = vpop.permute.xlu0 %537 }
 0x3f2   :  { %4013 = vmatmul.mubr.msk.f32.vlgmr.msra.gmra.mrb[4].mxu0 %vm59_vm1, %v538_v19 }
 0x3f3   :  { %4224 = vmatpush1.bf16.msra.mxu0 %v5209_v32  ;;  %615 = vmatprep.mubr.f32.mxu0 %v5057_v7 }
 0x3f4   :  { %4226 = vmatprep.subr.bf16.mxu0 %v5213_v33 }
 0x3f5   :  { %v540_v28 = vpop.permute.xlu1 %539 }
 0x3f6   :  { %4014 = vmatmul.mubr.msk.f32.gmra.mrb[6].mxu0 %vm59_vm1, %v540_v28 }
 0x3f7   :  { %4228 = vmatpush1.bf16.msra.mxu0 %v5225_v36  ;;  %692 = vmatprep.mubr.f32.mxu0 %v5057_v7 }
 0x3f8   :  { %4254 = vmatprep.subr.bf16.mxu0 %v5117_v3 }
 0x3fa   :  { %4015 = vmatmul.mubr.msk.f32.vlgmr.msra.gmra.mrb[4].mxu0 %vm140_vm0, %v4011_v30  ;;  %v4021_v30 = vld [vmem:[%s6232_s0 + $0x30] sm:$0xff] }
 0x3fb   :  { %698 = vmatprep.mubr.f32.mxu0 %v5057_v7  ;;  %4256 = vmatpush1.bf16.msra.mxu0 %v5130_v8 }
 0x3fc   :  { %4258 = vmatprep.subr.bf16.mxu0 %v5132_v9 }
 0x3fe   :  { %4016 = vmatmul.mubr.msk.f32.gmra.mrb[6].mxu0 %vm140_vm0, %v4012_v31  ;;  %v4022_v31 = vld [vmem:[%s6232_s0 + $0x38] sm:$0xff] }
 0x3ff   :  { %4260 = vmatpush1.bf16.msra.mxu0 %v5149_v14  ;;  %1079 = vmatprep.mubr.f32.mxu0 %v5057_v7 }
 0x400   :  { %4262 = vmatprep.subr.bf16.mxu0 %v5153_v15 }
 0x403   :  { %4264 = vmatpush1.bf16.msra.mxu0 %v5169_v20 }
 0x404   :  { %4266 = vmatprep.subr.bf16.mxu0 %v5173_v21 }
 0x407   :  { %4268 = vmatpush1.bf16.msra.mxu0 %v5189_v26 }
 0x408   :  { %4270 = vmatprep.subr.bf16.mxu0 %v5193_v27 }
 0x4cd   :  { %v694_v34 = vpop.f32.mrb[4].mxu0 }
 0x4ce   :  { %v705_v35 = vadd.f32 %v694_v34, %v5258_v43  ;;  %v696_v37 = vpop.f32.mrb[5].mxu0 }
 0x4cf   :  { %v706_v46 = vadd.f32 %v696_v37, %v5265_v53 }
 0x4d0   :  { %v4017_v38 = vmul.f32 -1.442695, %v705_v35 }
 0x4d1   :  { %v700_v39 = vpop.f32.mrb[6].mxu0  ;;  %v4018_v60 = vmul.f32 -1.442695, %v706_v46 }
 0x4d2   :  { %4673 = vpow2.f32 %v4017_v38  ;;  %v707_v42 = vadd.f32 %v700_v39, %v5258_v43  ;;  %v702_v44 = vpop.f32.mrb[7].mxu0 }
 0x4d3   :  { %v708_v50 = vadd.f32 %v702_v44, %v5265_v53 }
 0x4d4   :  { %v4019_v45 = vmul.f32 -1.442695, %v707_v42 }
 0x4d5   :  { %v4020_v61 = vmul.f32 -1.442695, %v708_v50 }
 0x4d6   :  { %4675 = vpow2.f32 %v4019_v45 }
 0x4d7   :  { %4677 = vtanh.f32 %v706_v46 }
 0x4dc   :  { %v4674_v47 = vpop.eup %4673 }
 0x4dd   :  { %v721_v48 = vadd.f32 1.0, %v4674_v47 }
 0x4df   :  { %4679 = vrcp.f32 %v721_v48 }
 0x4e0   :  { %v4676_v51 = vpop.eup %4675  ;;  %4681 = vtanh.f32 %v708_v50 }
 0x4e1   :  { %v723_v52 = vadd.f32 1.0, %v4676_v51  ;;  %v4678_v54 = vpop.eup %4677 }
 0x4e3   :  { %4683 = vrcp.f32 %v723_v52 }
 0x4e4   :  { %4685 = vpow2.f32 %v4018_v60 }
 0x4e5   :  { %4687 = vpow2.f32 %v4020_v61 }
 0x4e9   :  { %v4680_v55 = vpop.eup %4679 }
 0x4ea   :  { %v737_v56 = vmul.f32 %v4680_v55, %v4678_v54  ;;  %v4682_v57 = vpop.eup %4681  ;;  %v735_v1 = vmul.f32 %v4680_v55, %v5318_v6 }
 0x4ec   :  { %741 = vrot.lane.b32.xlu0 %v737_v56, %s5058_s5 }
 0x4ed   :  { %v4684_v58 = vpop.eup %4683 }
 0x4ee   :  { %v738_v59 = vmul.f32 %v4684_v58, %v4682_v57  ;;  %v4686_v62 = vpop.eup %4685  ;;  %v736_v10 = vmul.f32 %v4684_v58, %v5322_v16 }
 0x4ef   :  { %v722_v63 = vadd.f32 1.0, %v4686_v62  ;;  %v4688_v0 = vpop.eup %4687 }
 0x4f0   :  { %743 = vrot.lane.b32.xlu1 %v738_v59, %s5058_s5  ;;  %v724_v5 = vadd.f32 1.0, %v4688_v0 }
 0x4f1   :  { %4689 = vrcp.f32 %v722_v63 }
 0x4fb   :  { %v4690_v17 = vpop.eup %4689 }
 0x55e   :  { %v742_v2 = vpop.permute.xlu0 %741 }
 0x55f   :  { %v5366_v4 = vadd.f32 %v742_v2, %v735_v1 }
 0x561   :  { %4691 = vtanh.f32 %v5366_v4 }
 0x562   :  { %v744_v11 = vpop.permute.xlu1 %743  ;;  %4693 = vrcp.f32 %v724_v5 }
 0x563   :  { %v5370_v12 = vadd.f32 %v744_v11, %v736_v10 }
 0x565   :  { %4695 = vtanh.f32 %v5370_v12 }
 0x56b   :  { %v4692_v18 = vpop.eup %4691 }
 0x56c   :  { %v5373_v13 = vmul.f32 %v4692_v18, %v4690_v17  ;;  %v4694_v6 = vpop.eup %4693 }
 0x56e   :  { %772 = vrot.lane.b32.xlu0 %v5373_v13, %s5058_s5 }
 0x56f   :  { %v4696_v23 = vpop.eup %4695 }
 0x570   :  { %v5377_v19 = vmul.f32 %v4696_v23, %v4694_v6 }
 0x572   :  { %774 = vrot.lane.b32.xlu1 %v5377_v19, %s5058_s5 }
 0x5e0   :  { %v773_v16 = vpop.permute.xlu0 %772 }
 0x5e1   :  { %4023 = vmatmul.mubr.msk.f32.vlgmr.msra.gmra.mrb[4].mxu1 %vm59_vm1, %v773_v16 }
 0x5e2   :  { %4248 = vmatpush1.bf16.msra.mxu1 %v5209_v32  ;;  %850 = vmatprep.mubr.f32.mxu1 %v5057_v7 }
 0x5e3   :  { %4250 = vmatprep.subr.bf16.mxu1 %v5213_v33 }
 0x5e4   :  { %v775_v28 = vpop.permute.xlu1 %774 }
 0x5e5   :  { %4024 = vmatmul.mubr.msk.f32.gmra.mrb[6].mxu1 %vm59_vm1, %v775_v28 }
 0x5e6   :  { %4252 = vmatpush1.bf16.msra.mxu1 %v5225_v36  ;;  %927 = vmatprep.mubr.f32.mxu1 %v5057_v7 }
 0x5e7   :  { %4278 = vmatprep.subr.bf16.mxu1 %v5117_v3 }
 0x5e9   :  { %4025 = vmatmul.mubr.msk.f32.vlgmr.msra.gmra.mrb[4].mxu1 %vm140_vm0, %v4021_v30 }
 0x5ea   :  { %933 = vmatprep.mubr.f32.mxu1 %v5057_v7  ;;  %4280 = vmatpush1.bf16.msra.mxu1 %v5130_v8 }
 0x5eb   :  { %4282 = vmatprep.subr.bf16.mxu1 %v5132_v9 }
 0x5ed   :  { %4026 = vmatmul.mubr.msk.f32.gmra.mrb[6].mxu1 %vm140_vm0, %v4022_v31 }
 0x5ee   :  { %4284 = vmatpush1.bf16.msra.mxu1 %v5149_v14  ;;  %1314 = vmatprep.mubr.f32.mxu1 %v5057_v7 }
 0x5ef   :  { %4286 = vmatprep.subr.bf16.mxu1 %v5153_v15 }
 0x5f2   :  { %4288 = vmatpush1.bf16.msra.mxu1 %v5169_v20 }
 0x5f3   :  { %4290 = vmatprep.subr.bf16.mxu1 %v5173_v21 }
 0x5f6   :  { %4292 = vmatpush1.bf16.msra.mxu1 %v5189_v26 }
 0x5f7   :  { %4294 = vmatprep.subr.bf16.mxu1 %v5193_v27 }
 0x6bc   :  { %v929_v34 = vpop.f32.mrb[4].mxu1 }
 0x6bd   :  { %v940_v35 = vadd.f32 %v929_v34, %v5258_v43  ;;  %v931_v37 = vpop.f32.mrb[5].mxu1  ;;  %v4031_v34 = vld [vmem:[%s6232_s0 + $0x40] sm:$0xff] }
 0x6be   :  { %v941_v46 = vadd.f32 %v931_v37, %v5265_v53 }
 0x6bf   :  { %v4027_v38 = vmul.f32 -1.442695, %v940_v35  ;;  %v4032_v35 = vld [vmem:[%s6232_s0 + $0x48] sm:$0xff] }
 0x6c0   :  { %v935_v39 = vpop.f32.mrb[6].mxu1  ;;  %v4028_v60 = vmul.f32 -1.442695, %v941_v46 }
 0x6c1   :  { %4697 = vpow2.f32 %v4027_v38  ;;  %v942_v42 = vadd.f32 %v935_v39, %v5258_v43  ;;  %v937_v44 = vpop.f32.mrb[7].mxu1 }
 0x6c2   :  { %v943_v50 = vadd.f32 %v937_v44, %v5265_v53 }
 0x6c3   :  { %v4029_v45 = vmul.f32 -1.442695, %v942_v42 }
 0x6c4   :  { %v4030_v61 = vmul.f32 -1.442695, %v943_v50 }
 0x6c5   :  { %4699 = vpow2.f32 %v4029_v45 }
 0x6c6   :  { %4701 = vtanh.f32 %v941_v46 }
 0x6cb   :  { %v4698_v47 = vpop.eup %4697 }
 0x6cc   :  { %v956_v48 = vadd.f32 1.0, %v4698_v47 }
 0x6ce   :  { %4703 = vrcp.f32 %v956_v48 }
 0x6cf   :  { %v4700_v51 = vpop.eup %4699  ;;  %4705 = vtanh.f32 %v943_v50 }
 0x6d0   :  { %v958_v52 = vadd.f32 1.0, %v4700_v51  ;;  %v4702_v54 = vpop.eup %4701 }
 0x6d2   :  { %4707 = vrcp.f32 %v958_v52 }
 0x6d3   :  { %4709 = vpow2.f32 %v4028_v60 }
 0x6d4   :  { %4711 = vpow2.f32 %v4030_v61 }
 0x6d8   :  { %v4704_v55 = vpop.eup %4703 }
 0x6d9   :  { %v972_v56 = vmul.f32 %v4704_v55, %v4702_v54  ;;  %v4706_v57 = vpop.eup %4705  ;;  %v970_v1 = vmul.f32 %v4704_v55, %v5366_v4 }
 0x6db   :  { %976 = vrot.lane.b32.xlu0 %v972_v56, %s5058_s5 }
 0x6dc   :  { %v4708_v58 = vpop.eup %4707 }
 0x6dd   :  { %v973_v59 = vmul.f32 %v4708_v58, %v4706_v57  ;;  %v4710_v62 = vpop.eup %4709  ;;  %v971_v11 = vmul.f32 %v4708_v58, %v5370_v12 }
 0x6de   :  { %v957_v63 = vadd.f32 1.0, %v4710_v62  ;;  %v4712_v0 = vpop.eup %4711 }
 0x6df   :  { %978 = vrot.lane.b32.xlu1 %v973_v59, %s5058_s5  ;;  %v959_v10 = vadd.f32 1.0, %v4712_v0 }
 0x6e0   :  { %4713 = vrcp.f32 %v957_v63 }
 0x6ea   :  { %v4714_v6 = vpop.eup %4713 }
 0x74d   :  { %v977_v2 = vpop.permute.xlu0 %976 }
 0x74e   :  { %v5414_v5 = vadd.f32 %v977_v2, %v970_v1 }
 0x750   :  { %4715 = vtanh.f32 %v5414_v5 }
 0x751   :  { %v979_v17 = vpop.permute.xlu1 %978  ;;  %4717 = vrcp.f32 %v959_v10 }
 0x752   :  { %v5418_v18 = vadd.f32 %v979_v17, %v971_v11 }
 0x754   :  { %4719 = vtanh.f32 %v5418_v18 }
 0x75a   :  { %v4716_v23 = vpop.eup %4715 }
 0x75b   :  { %v5421_v16 = vmul.f32 %v4716_v23, %v4714_v6  ;;  %v4718_v4 = vpop.eup %4717 }
 0x75d   :  { %1007 = vrot.lane.b32.xlu0 %v5421_v16, %s5058_s5 }
 0x75e   :  { %v4720_v28 = vpop.eup %4719 }
 0x75f   :  { %v5425_v30 = vmul.f32 %v4720_v28, %v4718_v4 }
 0x761   :  { %1009 = vrot.lane.b32.xlu1 %v5425_v30, %s5058_s5 }
 0x7cf   :  { %v1008_v12 = vpop.permute.xlu0 %1007 }
 0x7d0   :  { %4033 = vmatmul.mubr.msk.f32.vlgmr.msra.gmra.mrb[8].mxu0 %vm59_vm1, %v1008_v12 }
 0x7d1   :  { %4272 = vmatpush1.bf16.msra.mxu0 %v5209_v32  ;;  %1085 = vmatprep.mubr.f32.mxu0 %v5057_v7 }
 0x7d2   :  { %4274 = vmatprep.subr.bf16.mxu0 %v5213_v33 }
 0x7d3   :  { %v1010_v31 = vpop.permute.xlu1 %1009 }
 0x7d4   :  { %4034 = vmatmul.mubr.msk.f32.gmra.mrb[10].mxu0 %vm59_vm1, %v1010_v31 }
 0x7d5   :  { %4276 = vmatpush1.bf16.msra.mxu0 %v5225_v36  ;;  %1162 = vmatprep.mubr.f32.mxu0 %v5057_v7 }
 0x7d6   :  { %4302 = vmatprep.subr.bf16.mxu0 %v5117_v3 }
 0x7d8   :  { %4035 = vmatmul.mubr.msk.f32.vlgmr.msra.gmra.mrb[8].mxu0 %vm140_vm0, %v4031_v34 }
 0x7d9   :  { %1168 = vmatprep.mubr.f32.mxu0 %v5057_v7  ;;  %4304 = vmatpush1.bf16.msra.mxu0 %v5130_v8 }
 0x7da   :  { %4306 = vmatprep.subr.bf16.mxu0 %v5132_v9 }
 0x7dc   :  { %4036 = vmatmul.mubr.msk.f32.gmra.mrb[10].mxu0 %vm140_vm0, %v4032_v35 }
 0x7dd   :  { %4308 = vmatpush1.bf16.msra.mxu0 %v5149_v14  ;;  %1549 = vmatprep.mubr.f32.mxu0 %v5057_v7 }
 0x7de   :  { %4310 = vmatprep.subr.bf16.mxu0 %v5153_v15 }
 0x7e1   :  { %4312 = vmatpush1.bf16.msra.mxu0 %v5169_v20 }
 0x7e2   :  { %4314 = vmatprep.subr.bf16.mxu0 %v5173_v21 }
 0x7e5   :  { %4316 = vmatpush1.bf16.msra.mxu0 %v5189_v26 }
 0x7e6   :  { %4318 = vmatprep.subr.bf16.mxu0 %v5193_v27 }
 0x8ab   :  { %v1164_v37 = vpop.f32.mrb[8].mxu0 }
 0x8ac   :  { %v1175_v38 = vadd.f32 %v1164_v37, %v5258_v43  ;;  %v1166_v39 = vpop.f32.mrb[9].mxu0 }
 0x8ad   :  { %v1176_v48 = vadd.f32 %v1166_v39, %v5265_v53  ;;  %v4041_v39 = vld [vmem:[%s6232_s0 + $0x50] sm:$0xff] }
 0x8ae   :  { %v4037_v42 = vmul.f32 -1.442695, %v1175_v38 }
 0x8af   :  { %v1170_v44 = vpop.f32.mrb[10].mxu0  ;;  %v4038_v62 = vmul.f32 -1.442695, %v1176_v48 }
 0x8b0   :  { %4721 = vpow2.f32 %v4037_v42  ;;  %v1177_v45 = vadd.f32 %v1170_v44, %v5258_v43  ;;  %v1172_v46 = vpop.f32.mrb[11].mxu0  ;;  %v4042_v42 = vld [vmem:[%s6232_s0 + $0x58] sm:$0xff] }
 0x8b1   :  { %v1178_v52 = vadd.f32 %v1172_v46, %v5265_v53 }
 0x8b2   :  { %v4039_v47 = vmul.f32 -1.442695, %v1177_v45 }
 0x8b3   :  { %v4040_v63 = vmul.f32 -1.442695, %v1178_v52 }
 0x8b4   :  { %4723 = vpow2.f32 %v4039_v47 }
 0x8b5   :  { %4725 = vtanh.f32 %v1176_v48 }
 0x8ba   :  { %v4722_v50 = vpop.eup %4721 }
 0x8bb   :  { %v1191_v51 = vadd.f32 1.0, %v4722_v50 }
 0x8bd   :  { %4727 = vrcp.f32 %v1191_v51 }
 0x8be   :  { %v4724_v54 = vpop.eup %4723  ;;  %4729 = vtanh.f32 %v1178_v52 }
 0x8bf   :  { %v1193_v55 = vadd.f32 1.0, %v4724_v54  ;;  %v4726_v56 = vpop.eup %4725 }
 0x8c1   :  { %4731 = vrcp.f32 %v1193_v55 }
 0x8c2   :  { %4733 = vpow2.f32 %v4038_v62 }
 0x8c3   :  { %4735 = vpow2.f32 %v4040_v63 }
 0x8c7   :  { %v4728_v57 = vpop.eup %4727 }
 0x8c8   :  { %v1207_v58 = vmul.f32 %v4728_v57, %v4726_v56  ;;  %v4730_v59 = vpop.eup %4729  ;;  %v1205_v10 = vmul.f32 %v4728_v57, %v5414_v5 }
 0x8ca   :  { %1211 = vrot.lane.b32.xlu0 %v1207_v58, %s5058_s5 }
 0x8cb   :  { %v4732_v60 = vpop.eup %4731 }
 0x8cc   :  { %v1208_v61 = vmul.f32 %v4732_v60, %v4730_v59  ;;  %v4734_v0 = vpop.eup %4733  ;;  %v1206_v23 = vmul.f32 %v4732_v60, %v5418_v18 }
 0x8cd   :  { %v1192_v1 = vadd.f32 1.0, %v4734_v0  ;;  %v4736_v2 = vpop.eup %4735 }
 0x8ce   :  { %1213 = vrot.lane.b32.xlu1 %v1208_v61, %s5058_s5  ;;  %v1194_v6 = vadd.f32 1.0, %v4736_v2 }
 0x8cf   :  { %4737 = vrcp.f32 %v1192_v1 }
 0x8d9   :  { %v4738_v12 = vpop.eup %4737 }
 0x93c   :  { %v1212_v11 = vpop.permute.xlu0 %1211 }
 0x93d   :  { %v5462_v17 = vadd.f32 %v1212_v11, %v1205_v10 }
 0x93f   :  { %4739 = vtanh.f32 %v5462_v17 }
 0x940   :  { %v1214_v4 = vpop.permute.xlu1 %1213  ;;  %4741 = vrcp.f32 %v1194_v6 }
 0x941   :  { %v5466_v28 = vadd.f32 %v1214_v4, %v1206_v23 }
 0x943   :  { %4743 = vtanh.f32 %v5466_v28 }
 0x949   :  { %v4740_v31 = vpop.eup %4739 }
 0x94a   :  { %v5469_v34 = vmul.f32 %v4740_v31, %v4738_v12  ;;  %v4742_v5 = vpop.eup %4741 }
 0x94c   :  { %1242 = vrot.lane.b32.xlu0 %v5469_v34, %s5058_s5 }
 0x94d   :  { %v4744_v35 = vpop.eup %4743 }
 0x94e   :  { %v5473_v37 = vmul.f32 %v4744_v35, %v4742_v5 }
 0x950   :  { %1244 = vrot.lane.b32.xlu1 %v5473_v37, %s5058_s5 }
 0x9be   :  { %v1243_v18 = vpop.permute.xlu0 %1242 }
 0x9bf   :  { %4043 = vmatmul.mubr.msk.f32.vlgmr.msra.gmra.mrb[8].mxu1 %vm59_vm1, %v1243_v18 }
 0x9c0   :  { %4296 = vmatpush1.bf16.msra.mxu1 %v5209_v32  ;;  %1320 = vmatprep.mubr.f32.mxu1 %v5057_v7 }
 0x9c1   :  { %4298 = vmatprep.subr.bf16.mxu1 %v5213_v33 }
 0x9c2   :  { %v1245_v38 = vpop.permute.xlu1 %1244 }
 0x9c3   :  { %4044 = vmatmul.mubr.msk.f32.gmra.mrb[10].mxu1 %vm59_vm1, %v1245_v38 }
 0x9c4   :  { %4300 = vmatpush1.bf16.msra.mxu1 %v5225_v36  ;;  %1397 = vmatprep.mubr.f32.mxu1 %v5057_v7 }
 0x9c5   :  { %4326 = vmatprep.subr.bf16.mxu1 %v5117_v3 }
 0x9c7   :  { %4045 = vmatmul.mubr.msk.f32.vlgmr.msra.gmra.mrb[8].mxu1 %vm140_vm0, %v4041_v39 }
 0x9c8   :  { %1403 = vmatprep.mubr.f32.mxu1 %v5057_v7  ;;  %4328 = vmatpush1.bf16.msra.mxu1 %v5130_v8 }
 0x9c9   :  { %4330 = vmatprep.subr.bf16.mxu1 %v5132_v9 }
 0x9cb   :  { %4046 = vmatmul.mubr.msk.f32.gmra.mrb[10].mxu1 %vm140_vm0, %v4042_v42 }
 0x9cc   :  { %4332 = vmatpush1.bf16.msra.mxu1 %v5149_v14  ;;  %1784 = vmatprep.mubr.f32.mxu1 %v5057_v7 }
 0x9cd   :  { %4334 = vmatprep.subr.bf16.mxu1 %v5153_v15 }
 0x9d0   :  { %4336 = vmatpush1.bf16.msra.mxu1 %v5169_v20 }
 0x9d1   :  { %4338 = vmatprep.subr.bf16.mxu1 %v5173_v21 }
 0x9d4   :  { %4340 = vmatpush1.bf16.msra.mxu1 %v5189_v26 }
 0x9d5   :  { %4342 = vmatprep.subr.bf16.mxu1 %v5193_v27 }
 0xa9a   :  { %v1399_v44 = vpop.f32.mrb[8].mxu1 }
 0xa9b   :  { %v1410_v45 = vadd.f32 %v1399_v44, %v5258_v43  ;;  %v1401_v46 = vpop.f32.mrb[9].mxu1 }
 0xa9c   :  { %v1411_v54 = vadd.f32 %v1401_v46, %v5265_v53 }
 0xa9d   :  { %v4047_v47 = vmul.f32 -1.442695, %v1410_v45 }
 0xa9e   :  { %v1405_v48 = vpop.f32.mrb[10].mxu1  ;;  %v4048_v2 = vmul.f32 -1.442695, %v1411_v54 }
 0xa9f   :  { %4745 = vpow2.f32 %v4047_v47  ;;  %v1412_v50 = vadd.f32 %v1405_v48, %v5258_v43  ;;  %v1407_v51 = vpop.f32.mrb[11].mxu1  ;;  %v4051_v48 = vld [vmem:[%s6232_s0 + $0x60] sm:$0xff] }
 0xaa0   :  { %v1413_v57 = vadd.f32 %v1407_v51, %v5265_v53 }
 0xaa1   :  { %v4049_v52 = vmul.f32 -1.442695, %v1412_v50  ;;  %v4052_v50 = vld [vmem:[%s6232_s0 + $0x68] sm:$0xff] }
 0xaa2   :  { %v4050_v10 = vmul.f32 -1.442695, %v1413_v57 }
 0xaa3   :  { %4747 = vpow2.f32 %v4049_v52 }
 0xaa4   :  { %4749 = vtanh.f32 %v1411_v54 }
 0xaa9   :  { %v4746_v55 = vpop.eup %4745 }
 0xaaa   :  { %v1426_v56 = vadd.f32 1.0, %v4746_v55 }
 0xaac   :  { %4751 = vrcp.f32 %v1426_v56 }
 0xaad   :  { %v4748_v58 = vpop.eup %4747  ;;  %4753 = vtanh.f32 %v1413_v57 }
 0xaae   :  { %v1428_v59 = vadd.f32 1.0, %v4748_v58  ;;  %v4750_v60 = vpop.eup %4749 }
 0xab0   :  { %4755 = vrcp.f32 %v1428_v59 }
 0xab1   :  { %4757 = vpow2.f32 %v4048_v2 }
 0xab2   :  { %4759 = vpow2.f32 %v4050_v10 }
 0xab6   :  { %v4752_v61 = vpop.eup %4751 }
 0xab7   :  { %v1442_v62 = vmul.f32 %v4752_v61, %v4750_v60  ;;  %v4754_v63 = vpop.eup %4753  ;;  %v1440_v4 = vmul.f32 %v4752_v61, %v5462_v17 }
 0xab9   :  { %1446 = vrot.lane.b32.xlu0 %v1442_v62, %s5058_s5 }
 0xaba   :  { %v4756_v0 = vpop.eup %4755 }
 0xabb   :  { %v1443_v1 = vmul.f32 %v4756_v0, %v4754_v63  ;;  %v4758_v11 = vpop.eup %4757  ;;  %v1441_v35 = vmul.f32 %v4756_v0, %v5466_v28 }
 0xabc   :  { %v1427_v6 = vadd.f32 1.0, %v4758_v11  ;;  %v4760_v23 = vpop.eup %4759 }
 0xabd   :  { %1448 = vrot.lane.b32.xlu1 %v1443_v1, %s5058_s5  ;;  %v1429_v5 = vadd.f32 1.0, %v4760_v23 }
 0xabe   :  { %4761 = vrcp.f32 %v1427_v6 }
 0xac8   :  { %v4762_v39 = vpop.eup %4761 }
 0xb2b   :  { %v1447_v12 = vpop.permute.xlu0 %1446 }
 0xb2c   :  { %v5510_v31 = vadd.f32 %v1447_v12, %v1440_v4 }
 0xb2e   :  { %4763 = vtanh.f32 %v5510_v31 }
 0xb2f   :  { %v1449_v18 = vpop.permute.xlu1 %1448  ;;  %4765 = vrcp.f32 %v1429_v5 }
 0xb30   :  { %v5514_v38 = vadd.f32 %v1449_v18, %v1441_v35 }
 0xb32   :  { %4767 = vtanh.f32 %v5514_v38 }
 0xb38   :  { %v4764_v42 = vpop.eup %4763 }
 0xb39   :  { %v5517_v44 = vmul.f32 %v4764_v42, %v4762_v39  ;;  %v4766_v17 = vpop.eup %4765 }
 0xb3b   :  { %1477 = vrot.lane.b32.xlu0 %v5517_v44, %s5058_s5 }
 0xb3c   :  { %v4768_v45 = vpop.eup %4767 }
 0xb3d   :  { %v5521_v46 = vmul.f32 %v4768_v45, %v4766_v17 }
 0xb3f   :  { %1479 = vrot.lane.b32.xlu1 %v5521_v46, %s5058_s5 }
 0xbad   :  { %v1478_v28 = vpop.permute.xlu0 %1477 }
 0xbae   :  { %4053 = vmatmul.mubr.msk.f32.vlgmr.msra.gmra.mrb[12].mxu0 %vm59_vm1, %v1478_v28 }
 0xbaf   :  { %4320 = vmatpush1.bf16.msra.mxu0 %v5209_v32  ;;  %1555 = vmatprep.mubr.f32.mxu0 %v5057_v7 }
 0xbb0   :  { %4322 = vmatprep.subr.bf16.mxu0 %v5213_v33 }
 0xbb1   :  { %v1480_v47 = vpop.permute.xlu1 %1479 }
 0xbb2   :  { %4054 = vmatmul.mubr.msk.f32.gmra.mrb[14].mxu0 %vm59_vm1, %v1480_v47 }
 0xbb3   :  { %4324 = vmatpush1.bf16.msra.mxu0 %v5225_v36  ;;  %1632 = vmatprep.mubr.f32.mxu0 %v5057_v7 }
 0xbb4   :  { %4350 = vmatprep.subr.bf16.mxu0 %v5117_v3 }
 0xbb6   :  { %4055 = vmatmul.mubr.msk.f32.vlgmr.msra.gmra.mrb[12].mxu0 %vm140_vm0, %v4051_v48 }
 0xbb7   :  { %1638 = vmatprep.mubr.f32.mxu0 %v5057_v7  ;;  %4352 = vmatpush1.bf16.msra.mxu0 %v5130_v8 }
 0xbb8   :  { %4354 = vmatprep.subr.bf16.mxu0 %v5132_v9 }
 0xbba   :  { %4056 = vmatmul.mubr.msk.f32.gmra.mrb[14].mxu0 %vm140_vm0, %v4052_v50 }
 0xbbb   :  { %4356 = vmatpush1.bf16.msra.mxu0 %v5149_v14  ;;  %2019 = vmatprep.mubr.f32.mxu0 %v5057_v7 }
 0xbbc   :  { %4358 = vmatprep.subr.bf16.mxu0 %v5153_v15 }
 0xbbf   :  { %4360 = vmatpush1.bf16.msra.mxu0 %v5169_v20 }
 0xbc0   :  { %4362 = vmatprep.subr.bf16.mxu0 %v5173_v21 }
 0xbc3   :  { %4364 = vmatpush1.bf16.msra.mxu0 %v5189_v26 }
 0xbc4   :  { %4366 = vmatprep.subr.bf16.mxu0 %v5193_v27 }
 0xc89   :  { %v1634_v51 = vpop.f32.mrb[12].mxu0 }
 0xc8a   :  { %v1645_v52 = vadd.f32 %v1634_v51, %v5258_v43  ;;  %v1636_v54 = vpop.f32.mrb[13].mxu0 }
 0xc8b   :  { %v1646_v60 = vadd.f32 %v1636_v54, %v5265_v53 }
 0xc8c   :  { %v4057_v55 = vmul.f32 -1.442695, %v1645_v52 }
 0xc8d   :  { %v1640_v56 = vpop.f32.mrb[14].mxu0  ;;  %v4058_v12 = vmul.f32 -1.442695, %v1646_v60 }
 0xc8e   :  { %4769 = vpow2.f32 %v4057_v55  ;;  %v1647_v57 = vadd.f32 %v1640_v56, %v5258_v43  ;;  %v1642_v58 = vpop.f32.mrb[15].mxu0 }
 0xc8f   :  { %v1648_v63 = vadd.f32 %v1642_v58, %v5265_v53  ;;  %v4061_v58 = vld [vmem:[%s6232_s0 + $0x70] sm:$0xff] }
 0xc90   :  { %v4059_v59 = vmul.f32 -1.442695, %v1647_v57 }
 0xc91   :  { %v4060_v5 = vmul.f32 -1.442695, %v1648_v63 }
 0xc92   :  { %4771 = vpow2.f32 %v4059_v59  ;;  %v4062_v59 = vld [vmem:[%s6232_s0 + $0x78] sm:$0xff] }
 0xc93   :  { %4773 = vtanh.f32 %v1646_v60 }
 0xc98   :  { %v4770_v61 = vpop.eup %4769 }
 0xc99   :  { %v1661_v62 = vadd.f32 1.0, %v4770_v61 }
 0xc9b   :  { %4775 = vrcp.f32 %v1661_v62 }
 0xc9c   :  { %v4772_v0 = vpop.eup %4771  ;;  %4777 = vtanh.f32 %v1648_v63 }
 0xc9d   :  { %v1663_v1 = vadd.f32 1.0, %v4772_v0  ;;  %v4774_v2 = vpop.eup %4773 }
 0xc9f   :  { %4779 = vrcp.f32 %v1663_v1 }
 0xca0   :  { %4781 = vpow2.f32 %v4058_v12 }
 0xca1   :  { %4783 = vpow2.f32 %v4060_v5 }
 0xca5   :  { %v4776_v10 = vpop.eup %4775 }
 0xca6   :  { %v1677_v11 = vmul.f32 %v4776_v10, %v4774_v2  ;;  %v4778_v6 = vpop.eup %4777  ;;  %v1675_v42 = vmul.f32 %v4776_v10, %v5510_v31 }
 0xca8   :  { %1681 = vrot.lane.b32.xlu0 %v1677_v11, %s5058_s5 }
 0xca9   :  { %v4780_v23 = vpop.eup %4779 }
 0xcaa   :  { %v1678_v4 = vmul.f32 %v4780_v23, %v4778_v6  ;;  %v4782_v35 = vpop.eup %4781  ;;  %v1676_v47 = vmul.f32 %v4780_v23, %v5514_v38 }
 0xcab   :  { %v1662_v18 = vadd.f32 1.0, %v4782_v35  ;;  %v4784_v39 = vpop.eup %4783 }
 0xcac   :  { %1683 = vrot.lane.b32.xlu1 %v1678_v4, %s5058_s5  ;;  %v1664_v28 = vadd.f32 1.0, %v4784_v39 }
 0xcad   :  { %4785 = vrcp.f32 %v1662_v18 }
 0xcb7   :  { %v4786_v51 = vpop.eup %4785 }
 0xd1a   :  { %v1682_v17 = vpop.permute.xlu0 %1681 }
 0xd1b   :  { %v5558_v45 = vadd.f32 %v1682_v17, %v1675_v42 }
 0xd1d   :  { %4787 = vtanh.f32 %v5558_v45 }
 0xd1e   :  { %v1684_v48 = vpop.permute.xlu1 %1683  ;;  %4789 = vrcp.f32 %v1664_v28 }
 0xd1f   :  { %v5562_v50 = vadd.f32 %v1684_v48, %v1676_v47 }
 0xd21   :  { %4791 = vtanh.f32 %v5562_v50 }
 0xd27   :  { %v4788_v52 = vpop.eup %4787 }
 0xd28   :  { %v5565_v54 = vmul.f32 %v4788_v52, %v4786_v51  ;;  %v4790_v31 = vpop.eup %4789 }
 0xd2a   :  { %1712 = vrot.lane.b32.xlu0 %v5565_v54, %s5058_s5 }
 0xd2b   :  { %v4792_v55 = vpop.eup %4791 }
 0xd2c   :  { %v5569_v56 = vmul.f32 %v4792_v55, %v4790_v31 }
 0xd2e   :  { %1714 = vrot.lane.b32.xlu1 %v5569_v56, %s5058_s5 }
 0xd9c   :  { %v1713_v38 = vpop.permute.xlu0 %1712 }
 0xd9d   :  { %4063 = vmatmul.mubr.msk.f32.vlgmr.msra.gmra.mrb[12].mxu1 %vm59_vm1, %v1713_v38 }
 0xd9e   :  { %4344 = vmatpush1.bf16.msra.mxu1 %v5209_v32  ;;  %1790 = vmatprep.mubr.f32.mxu1 %v5057_v7 }
 0xd9f   :  { %4346 = vmatprep.subr.bf16.mxu1 %v5213_v33 }
 0xda0   :  { %v1715_v57 = vpop.permute.xlu1 %1714 }
 0xda1   :  { %4064 = vmatmul.mubr.msk.f32.gmra.mrb[14].mxu1 %vm59_vm1, %v1715_v57 }
 0xda2   :  { %4348 = vmatpush1.bf16.msra.mxu1 %v5225_v36  ;;  %1867 = vmatprep.mubr.f32.mxu1 %v5057_v7 }
 0xda3   :  { %4374 = vmatprep.subr.bf16.mxu1 %v5117_v3 }
 0xda5   :  { %4065 = vmatmul.mubr.msk.f32.vlgmr.msra.gmra.mrb[12].mxu1 %vm140_vm0, %v4061_v58 }
 0xda6   :  { %1873 = vmatprep.mubr.f32.mxu1 %v5057_v7  ;;  %4376 = vmatpush1.bf16.msra.mxu1 %v5130_v8 }
 0xda7   :  { %4378 = vmatprep.subr.bf16.mxu1 %v5132_v9 }
 0xda9   :  { %4066 = vmatmul.mubr.msk.f32.gmra.mrb[14].mxu1 %vm140_vm0, %v4062_v59 }
 0xdaa   :  { %4380 = vmatpush1.bf16.msra.mxu1 %v5149_v14  ;;  %2254 = vmatprep.mubr.f32.mxu1 %v5057_v7 }
 0xdab   :  { %4382 = vmatprep.subr.bf16.mxu1 %v5153_v15 }
 0xdae   :  { %4384 = vmatpush1.bf16.msra.mxu1 %v5169_v20 }
 0xdaf   :  { %4386 = vmatprep.subr.bf16.mxu1 %v5173_v21 }
 0xdb2   :  { %4388 = vmatpush1.bf16.msra.mxu1 %v5189_v26 }
 0xdb3   :  { %4390 = vmatprep.subr.bf16.mxu1 %v5193_v27 }
 0xe78   :  { %v1869_v60 = vpop.f32.mrb[12].mxu1 }
 0xe79   :  { %v1880_v61 = vadd.f32 %v1869_v60, %v5258_v43  ;;  %v1871_v62 = vpop.f32.mrb[13].mxu1 }
 0xe7a   :  { %v1881_v11 = vadd.f32 %v1871_v62, %v5265_v53 }
 0xe7b   :  { %v4067_v63 = vmul.f32 -1.442695, %v1880_v61 }
 0xe7c   :  { %v1875_v0 = vpop.f32.mrb[14].mxu1  ;;  %v4068_v47 = vmul.f32 -1.442695, %v1881_v11 }
 0xe7d   :  { %4793 = vpow2.f32 %v4067_v63  ;;  %v1882_v1 = vadd.f32 %v1875_v0, %v5258_v43  ;;  %v1877_v2 = vpop.f32.mrb[15].mxu1 }
 0xe7e   :  { %v1883_v4 = vadd.f32 %v1877_v2, %v5265_v53 }
 0xe7f   :  { %v4069_v10 = vmul.f32 -1.442695, %v1882_v1 }
 0xe80   :  { %v4070_v48 = vmul.f32 -1.442695, %v1883_v4 }
 0xe81   :  { %4795 = vpow2.f32 %v4069_v10 }
 0xe82   :  { %4797 = vtanh.f32 %v1881_v11  ;;  %v4071_v11 = vld [vmem:[%s6232_s0 + $0x80] sm:$0xff] }
 0xe87   :  { %v4794_v6 = vpop.eup %4793 }
 0xe88   :  { %v1896_v23 = vadd.f32 1.0, %v4794_v6  ;;  %v4072_v6 = vld [vmem:[%s6232_s0 + $0x88] sm:$0xff] }
 0xe8a   :  { %4799 = vrcp.f32 %v1896_v23 }
 0xe8b   :  { %v4796_v12 = vpop.eup %4795  ;;  %4801 = vtanh.f32 %v1883_v4 }
 0xe8c   :  { %v1898_v5 = vadd.f32 1.0, %v4796_v12  ;;  %v4798_v35 = vpop.eup %4797 }
 0xe8e   :  { %4803 = vrcp.f32 %v1898_v5 }
 0xe8f   :  { %4805 = vpow2.f32 %v4068_v47 }
 0xe90   :  { %4807 = vpow2.f32 %v4070_v48 }
 0xe94   :  { %v4800_v18 = vpop.eup %4799 }
 0xe95   :  { %v1912_v39 = vmul.f32 %v4800_v18, %v4798_v35  ;;  %v4802_v42 = vpop.eup %4801  ;;  %v1910_v55 = vmul.f32 %v4800_v18, %v5558_v45 }
 0xe97   :  { %1916 = vrot.lane.b32.xlu0 %v1912_v39, %s5058_s5 }
 0xe98   :  { %v4804_v17 = vpop.eup %4803 }
 0xe99   :  { %v1913_v28 = vmul.f32 %v4804_v17, %v4802_v42  ;;  %v4806_v51 = vpop.eup %4805  ;;  %v1911_v59 = vmul.f32 %v4804_v17, %v5562_v50 }
 0xe9a   :  { %v1897_v52 = vadd.f32 1.0, %v4806_v51  ;;  %v4808_v31 = vpop.eup %4807 }
 0xe9b   :  { %1918 = vrot.lane.b32.xlu1 %v1913_v28, %s5058_s5  ;;  %v1899_v58 = vadd.f32 1.0, %v4808_v31 }
 0xe9c   :  { %4809 = vrcp.f32 %v1897_v52 }
 0xea6   :  { %v4810_v62 = vpop.eup %4809 }
 0xf09   :  { %v1917_v38 = vpop.permute.xlu0 %1916 }
 0xf0a   :  { %v5606_v57 = vadd.f32 %v1917_v38, %v1910_v55 }
 0xf0c   :  { %4811 = vtanh.f32 %v5606_v57 }
 0xf0d   :  { %v1919_v60 = vpop.permute.xlu1 %1918  ;;  %4813 = vrcp.f32 %v1899_v58 }
 0xf0e   :  { %v5610_v61 = vadd.f32 %v1919_v60, %v1911_v59 }
 0xf10   :  { %4815 = vtanh.f32 %v5610_v61 }
 0xf16   :  { %v4812_v63 = vpop.eup %4811 }
 0xf17   :  { %v5613_v0 = vmul.f32 %v4812_v63, %v4810_v62  ;;  %v4814_v45 = vpop.eup %4813 }
 0xf19   :  { %1947 = vrot.lane.b32.xlu0 %v5613_v0, %s5058_s5 }
 0xf1a   :  { %v4816_v1 = vpop.eup %4815 }
 0xf1b   :  { %v5617_v2 = vmul.f32 %v4816_v1, %v4814_v45 }
 0xf1d   :  { %1949 = vrot.lane.b32.xlu1 %v5617_v2, %s5058_s5 }
 0xf8b   :  { %v1948_v50 = vpop.permute.xlu0 %1947 }
 0xf8c   :  { %4073 = vmatmul.mubr.msk.f32.vlgmr.msra.gmra.mrb[16].mxu0 %vm59_vm1, %v1948_v50 }
 0xf8d   :  { %4368 = vmatpush1.bf16.msra.mxu0 %v5209_v32  ;;  %2025 = vmatprep.mubr.f32.mxu0 %v5057_v7 }
 0xf8e   :  { %4370 = vmatprep.subr.bf16.mxu0 %v5213_v33 }
 0xf8f   :  { %v1950_v10 = vpop.permute.xlu1 %1949 }
 0xf90   :  { %4074 = vmatmul.mubr.msk.f32.gmra.mrb[18].mxu0 %vm59_vm1, %v1950_v10 }
 0xf91   :  { %4372 = vmatpush1.bf16.msra.mxu0 %v5225_v36  ;;  %2102 = vmatprep.mubr.f32.mxu0 %v5057_v7 }
 0xf92   :  { %4398 = vmatprep.subr.bf16.mxu0 %v5117_v3 }
 0xf94   :  { %4075 = vmatmul.mubr.msk.f32.vlgmr.msra.gmra.mrb[16].mxu0 %vm140_vm0, %v4071_v11 }
 0xf95   :  { %2108 = vmatprep.mubr.f32.mxu0 %v5057_v7  ;;  %4400 = vmatpush1.bf16.msra.mxu0 %v5130_v8 }
 0xf96   :  { %4402 = vmatprep.subr.bf16.mxu0 %v5132_v9 }
 0xf98   :  { %4076 = vmatmul.mubr.msk.f32.gmra.mrb[18].mxu0 %vm140_vm0, %v4072_v6 }
 0xf99   :  { %4404 = vmatpush1.bf16.msra.mxu0 %v5149_v14  ;;  %2489 = vmatprep.mubr.f32.mxu0 %v5057_v7 }
 0xf9a   :  { %4406 = vmatprep.subr.bf16.mxu0 %v5153_v15 }
 0xf9d   :  { %4408 = vmatpush1.bf16.msra.mxu0 %v5169_v20 }
 0xf9e   :  { %4410 = vmatprep.subr.bf16.mxu0 %v5173_v21 }
 0xfa1   :  { %4412 = vmatpush1.bf16.msra.mxu0 %v5189_v26 }
 0xfa2   :  { %4414 = vmatprep.subr.bf16.mxu0 %v5193_v27 }
0x1067   :  { %v2104_v23 = vpop.f32.mrb[16].mxu0 }
0x1068   :  { %v2115_v4 = vadd.f32 %v2104_v23, %v5258_v43  ;;  %v2106_v12 = vpop.f32.mrb[17].mxu0 }
0x1069   :  { %v2116_v17 = vadd.f32 %v2106_v12, %v5265_v53 }
0x106a   :  { %v4077_v5 = vmul.f32 -1.442695, %v2115_v4 }
0x106b   :  { %v2110_v35 = vpop.f32.mrb[18].mxu0  ;;  %v4078_v62 = vmul.f32 -1.442695, %v2116_v17 }
0x106c   :  { %4817 = vpow2.f32 %v4077_v5  ;;  %v2117_v18 = vadd.f32 %v2110_v35, %v5258_v43  ;;  %v2112_v39 = vpop.f32.mrb[19].mxu0 }
0x106d   :  { %v2118_v48 = vadd.f32 %v2112_v39, %v5265_v53 }
0x106e   :  { %v4079_v42 = vmul.f32 -1.442695, %v2117_v18 }
0x106f   :  { %v4080_v63 = vmul.f32 -1.442695, %v2118_v48 }
0x1070   :  { %4819 = vpow2.f32 %v4079_v42 }
0x1071   :  { %4821 = vtanh.f32 %v2116_v17 }
0x1076   :  { %v4818_v28 = vpop.eup %4817 }
0x1077   :  { %v2131_v47 = vadd.f32 1.0, %v4818_v28 }
0x1079   :  { %4823 = vrcp.f32 %v2131_v47  ;;  %v4081_v47 = vld [vmem:[%s6232_s0 + $0x90] sm:$0xff] }
0x107a   :  { %v4820_v51 = vpop.eup %4819  ;;  %4825 = vtanh.f32 %v2118_v48  ;;  %v4082_v48 = vld [vmem:[%s6232_s0 + $0x98] sm:$0xff] }
0x107b   :  { %v2133_v52 = vadd.f32 1.0, %v4820_v51  ;;  %v4822_v31 = vpop.eup %4821 }
0x107d   :  { %4827 = vrcp.f32 %v2133_v52 }
0x107e   :  { %4829 = vpow2.f32 %v4078_v62 }
0x107f   :  { %4831 = vpow2.f32 %v4080_v63 }
0x1083   :  { %v4824_v55 = vpop.eup %4823 }
0x1084   :  { %v2147_v38 = vmul.f32 %v4824_v55, %v4822_v31  ;;  %v4826_v58 = vpop.eup %4825  ;;  %v2145_v10 = vmul.f32 %v4824_v55, %v5606_v57 }
0x1086   :  { %2151 = vrot.lane.b32.xlu0 %v2147_v38, %s5058_s5 }
0x1087   :  { %v4828_v59 = vpop.eup %4827 }
0x1088   :  { %v2148_v60 = vmul.f32 %v4828_v59, %v4826_v58  ;;  %v4830_v45 = vpop.eup %4829  ;;  %v2146_v4 = vmul.f32 %v4828_v59, %v5610_v61 }
0x1089   :  { %v2132_v1 = vadd.f32 1.0, %v4830_v45  ;;  %v4832_v50 = vpop.eup %4831 }
0x108a   :  { %2153 = vrot.lane.b32.xlu1 %v2148_v60, %s5058_s5  ;;  %v2134_v23 = vadd.f32 1.0, %v4832_v50 }
0x108b   :  { %4833 = vrcp.f32 %v2132_v1 }
0x1095   :  { %v4834_v35 = vpop.eup %4833 }
0x10f8   :  { %v2152_v11 = vpop.permute.xlu0 %2151 }
0x10f9   :  { %v5654_v6 = vadd.f32 %v2152_v11, %v2145_v10 }
0x10fb   :  { %4835 = vtanh.f32 %v5654_v6 }
0x10fc   :  { %v2154_v12 = vpop.permute.xlu1 %2153  ;;  %4837 = vrcp.f32 %v2134_v23 }
0x10fd   :  { %v5658_v5 = vadd.f32 %v2154_v12, %v2146_v4 }
0x10ff   :  { %4839 = vtanh.f32 %v5658_v5 }
0x1105   :  { %v4836_v18 = vpop.eup %4835 }
0x1106   :  { %v5661_v39 = vmul.f32 %v4836_v18, %v4834_v35  ;;  %v4838_v57 = vpop.eup %4837 }
0x1108   :  { %2182 = vrot.lane.b32.xlu0 %v5661_v39, %s5058_s5 }
0x1109   :  { %v4840_v42 = vpop.eup %4839 }
0x110a   :  { %v5665_v17 = vmul.f32 %v4840_v42, %v4838_v57 }
0x110c   :  { %2184 = vrot.lane.b32.xlu1 %v5665_v17, %s5058_s5 }
0x117a   :  { %v2183_v61 = vpop.permute.xlu0 %2182 }
0x117b   :  { %4083 = vmatmul.mubr.msk.f32.vlgmr.msra.gmra.mrb[16].mxu1 %vm59_vm1, %v2183_v61 }
0x117c   :  { %4392 = vmatpush1.bf16.msra.mxu1 %v5209_v32  ;;  %2260 = vmatprep.mubr.f32.mxu1 %v5057_v7 }
0x117d   :  { %4394 = vmatprep.subr.bf16.mxu1 %v5213_v33 }
0x117e   :  { %v2185_v28 = vpop.permute.xlu1 %2184 }
0x117f   :  { %4084 = vmatmul.mubr.msk.f32.gmra.mrb[18].mxu1 %vm59_vm1, %v2185_v28 }
0x1180   :  { %4396 = vmatpush1.bf16.msra.mxu1 %v5225_v36  ;;  %2337 = vmatprep.mubr.f32.mxu1 %v5057_v7 }
0x1181   :  { %4422 = vmatprep.subr.bf16.mxu1 %v5117_v3 }
0x1183   :  { %4085 = vmatmul.mubr.msk.f32.vlgmr.msra.gmra.mrb[16].mxu1 %vm140_vm0, %v4081_v47 }
0x1184   :  { %2343 = vmatprep.mubr.f32.mxu1 %v5057_v7  ;;  %4424 = vmatpush1.bf16.msra.mxu1 %v5130_v8 }
0x1185   :  { %4426 = vmatprep.subr.bf16.mxu1 %v5132_v9 }
0x1187   :  { %4086 = vmatmul.mubr.msk.f32.gmra.mrb[18].mxu1 %vm140_vm0, %v4082_v48 }
0x1188   :  { %4428 = vmatpush1.bf16.msra.mxu1 %v5149_v14  ;;  %2724 = vmatprep.mubr.f32.mxu1 %v5057_v7 }
0x1189   :  { %4430 = vmatprep.subr.bf16.mxu1 %v5153_v15 }
0x118c   :  { %4432 = vmatpush1.bf16.msra.mxu1 %v5169_v20 }
0x118d   :  { %4434 = vmatprep.subr.bf16.mxu1 %v5173_v21 }
0x1190   :  { %4436 = vmatpush1.bf16.msra.mxu1 %v5189_v26 }
0x1191   :  { %4438 = vmatprep.subr.bf16.mxu1 %v5193_v27 }
0x1256   :  { %v2339_v51 = vpop.f32.mrb[16].mxu1 }
0x1257   :  { %v2350_v52 = vadd.f32 %v2339_v51, %v5258_v43  ;;  %v2341_v31 = vpop.f32.mrb[17].mxu1 }
0x1258   :  { %v2351_v62 = vadd.f32 %v2341_v31, %v5265_v53 }
0x1259   :  { %v4087_v55 = vmul.f32 -1.442695, %v2350_v52 }
0x125a   :  { %v2345_v38 = vpop.f32.mrb[18].mxu1  ;;  %v4088_v57 = vmul.f32 -1.442695, %v2351_v62 }
0x125b   :  { %4841 = vpow2.f32 %v4087_v55  ;;  %v2352_v58 = vadd.f32 %v2345_v38, %v5258_v43  ;;  %v2347_v59 = vpop.f32.mrb[19].mxu1 }
0x125c   :  { %v2353_v1 = vadd.f32 %v2347_v59, %v5265_v53 }
0x125d   :  { %v4089_v60 = vmul.f32 -1.442695, %v2352_v58 }
0x125e   :  { %v4090_v42 = vmul.f32 -1.442695, %v2353_v1 }
0x125f   :  { %4843 = vpow2.f32 %v4089_v60 }
0x1260   :  { %4845 = vtanh.f32 %v2351_v62 }
0x1265   :  { %v4842_v63 = vpop.eup %4841 }
0x1266   :  { %v2366_v45 = vadd.f32 1.0, %v4842_v63 }
0x1268   :  { %4847 = vrcp.f32 %v2366_v45 }
0x1269   :  { %v4844_v50 = vpop.eup %4843  ;;  %4849 = vtanh.f32 %v2353_v1 }
0x126a   :  { %v2368_v10 = vadd.f32 1.0, %v4844_v50  ;;  %v4846_v11 = vpop.eup %4845  ;;  %v4091_v50 = vld [vmem:[%s6232_s0 + $0xa0] sm:$0xff] }
0x126c   :  { %4851 = vrcp.f32 %v2368_v10  ;;  %v4092_v10 = vld [vmem:[%s6232_s0 + $0xa8] sm:$0xff] }
0x126d   :  { %4853 = vpow2.f32 %v4088_v57 }
0x126e   :  { %4855 = vpow2.f32 %v4090_v42 }
0x1272   :  { %v4848_v23 = vpop.eup %4847 }
0x1273   :  { %v2382_v4 = vmul.f32 %v4848_v23, %v4846_v11  ;;  %v4850_v12 = vpop.eup %4849  ;;  %v2380_v48 = vmul.f32 %v4848_v23, %v5654_v6 }
0x1275   :  { %2386 = vrot.lane.b32.xlu0 %v2382_v4, %s5058_s5 }
0x1276   :  { %v4852_v35 = vpop.eup %4851 }
0x1277   :  { %v2383_v18 = vmul.f32 %v4852_v35, %v4850_v12  ;;  %v4854_v61 = vpop.eup %4853  ;;  %v2381_v55 = vmul.f32 %v4852_v35, %v5658_v5 }
0x1278   :  { %v2367_v28 = vadd.f32 1.0, %v4854_v61  ;;  %v4856_v47 = vpop.eup %4855 }
0x1279   :  { %2388 = vrot.lane.b32.xlu1 %v2383_v18, %s5058_s5  ;;  %v2369_v31 = vadd.f32 1.0, %v4856_v47 }
0x127a   :  { %4857 = vrcp.f32 %v2367_v28 }
0x1284   :  { %v4858_v59 = vpop.eup %4857 }
0x12e7   :  { %v2387_v51 = vpop.permute.xlu0 %2386 }
0x12e8   :  { %v5702_v52 = vadd.f32 %v2387_v51, %v2380_v48 }
0x12ea   :  { %4859 = vtanh.f32 %v5702_v52 }
0x12eb   :  { %v2389_v38 = vpop.permute.xlu1 %2388  ;;  %4861 = vrcp.f32 %v2369_v31 }
0x12ec   :  { %v5706_v58 = vadd.f32 %v2389_v38, %v2381_v55 }
0x12ee   :  { %4863 = vtanh.f32 %v5706_v58 }
0x12f4   :  { %v4860_v60 = vpop.eup %4859 }
0x12f5   :  { %v5709_v62 = vmul.f32 %v4860_v60, %v4858_v59  ;;  %v4862_v6 = vpop.eup %4861 }
0x12f7   :  { %2417 = vrot.lane.b32.xlu0 %v5709_v62, %s5058_s5 }
0x12f8   :  { %v4864_v63 = vpop.eup %4863 }
0x12f9   :  { %v5713_v45 = vmul.f32 %v4864_v63, %v4862_v6 }
0x12fb   :  { %2419 = vrot.lane.b32.xlu1 %v5713_v45, %s5058_s5 }
0x1369   :  { %v2418_v5 = vpop.permute.xlu0 %2417 }
0x136a   :  { %4093 = vmatmul.mubr.msk.f32.vlgmr.msra.gmra.mrb[20].mxu0 %vm59_vm1, %v2418_v5 }
0x136b   :  { %4416 = vmatpush1.bf16.msra.mxu0 %v5209_v32  ;;  %2495 = vmatprep.mubr.f32.mxu0 %v5057_v7 }
0x136c   :  { %4418 = vmatprep.subr.bf16.mxu0 %v5213_v33 }
0x136d   :  { %v2420_v1 = vpop.permute.xlu1 %2419 }
0x136e   :  { %4094 = vmatmul.mubr.msk.f32.gmra.mrb[22].mxu0 %vm59_vm1, %v2420_v1 }
0x136f   :  { %4420 = vmatpush1.bf16.msra.mxu0 %v5225_v36  ;;  %2572 = vmatprep.mubr.f32.mxu0 %v5057_v7 }
0x1370   :  { %4446 = vmatprep.subr.bf16.mxu0 %v5117_v3 }
0x1372   :  { %4095 = vmatmul.mubr.msk.f32.vlgmr.msra.gmra.mrb[20].mxu0 %vm140_vm0, %v4091_v50 }
0x1373   :  { %2578 = vmatprep.mubr.f32.mxu0 %v5057_v7  ;;  %4448 = vmatpush1.bf16.msra.mxu0 %v5130_v8 }
0x1374   :  { %4450 = vmatprep.subr.bf16.mxu0 %v5132_v9 }
0x1376   :  { %4096 = vmatmul.mubr.msk.f32.gmra.mrb[22].mxu0 %vm140_vm0, %v4092_v10 }
0x1377   :  { %4452 = vmatpush1.bf16.msra.mxu0 %v5149_v14  ;;  %2959 = vmatprep.mubr.f32.mxu0 %v5057_v7 }
0x1378   :  { %4454 = vmatprep.subr.bf16.mxu0 %v5153_v15 }
0x137b   :  { %4456 = vmatpush1.bf16.msra.mxu0 %v5169_v20 }
0x137c   :  { %4458 = vmatprep.subr.bf16.mxu0 %v5173_v21 }
0x137f   :  { %4460 = vmatpush1.bf16.msra.mxu0 %v5189_v26 }
0x1380   :  { %4462 = vmatprep.subr.bf16.mxu0 %v5193_v27 }
0x1445   :  { %v2574_v11 = vpop.f32.mrb[20].mxu0 }
0x1446   :  { %v2585_v23 = vadd.f32 %v2574_v11, %v5258_v43  ;;  %v2576_v4 = vpop.f32.mrb[21].mxu0 }
0x1447   :  { %v2586_v61 = vadd.f32 %v2576_v4, %v5265_v53 }
0x1448   :  { %v4097_v12 = vmul.f32 -1.442695, %v2585_v23 }
0x1449   :  { %v2580_v35 = vpop.f32.mrb[22].mxu0  ;;  %v4098_v5 = vmul.f32 -1.442695, %v2586_v61 }
0x144a   :  { %4865 = vpow2.f32 %v4097_v12  ;;  %v2587_v18 = vadd.f32 %v2580_v35, %v5258_v43  ;;  %v2582_v57 = vpop.f32.mrb[23].mxu0 }
0x144b   :  { %v2588_v48 = vadd.f32 %v2582_v57, %v5265_v53 }
0x144c   :  { %v4099_v42 = vmul.f32 -1.442695, %v2587_v18 }
0x144d   :  { %v4100_v1 = vmul.f32 -1.442695, %v2588_v48 }
0x144e   :  { %4867 = vpow2.f32 %v4099_v42 }
0x144f   :  { %4869 = vtanh.f32 %v2586_v61 }
0x1454   :  { %v4866_v28 = vpop.eup %4865 }
0x1455   :  { %v2601_v47 = vadd.f32 1.0, %v4866_v28 }
0x1457   :  { %4871 = vrcp.f32 %v2601_v47 }
0x1458   :  { %v4868_v51 = vpop.eup %4867  ;;  %4873 = vtanh.f32 %v2588_v48 }
0x1459   :  { %v2603_v31 = vadd.f32 1.0, %v4868_v51  ;;  %v4870_v55 = vpop.eup %4869 }
0x145b   :  { %4875 = vrcp.f32 %v2603_v31 }
0x145c   :  { %4877 = vpow2.f32 %v4098_v5 }
0x145d   :  { %4879 = vpow2.f32 %v4100_v1 }
0x1461   :  { %v4872_v38 = vpop.eup %4871 }
0x1462   :  { %v2617_v59 = vmul.f32 %v4872_v38, %v4870_v55  ;;  %v4874_v60 = vpop.eup %4873  ;;  %v2615_v23 = vmul.f32 %v4872_v38, %v5702_v52  ;;  %v4101_v55 = vld [vmem:[%s6232_s0 + $0xb0] sm:$0xff]  ;;  %v4102_v38 = vld [vmem:[%s6232_s0 + $0xb8] sm:$0xff] }
0x1464   :  { %2621 = vrot.lane.b32.xlu0 %v2617_v59, %s5058_s5 }
0x1465   :  { %v4876_v6 = vpop.eup %4875 }
0x1466   :  { %v2618_v63 = vmul.f32 %v4876_v6, %v4874_v60  ;;  %v4878_v50 = vpop.eup %4877  ;;  %v2616_v18 = vmul.f32 %v4876_v6, %v5706_v58 }
0x1467   :  { %v2602_v10 = vadd.f32 1.0, %v4878_v50  ;;  %v4880_v11 = vpop.eup %4879 }
0x1468   :  { %2623 = vrot.lane.b32.xlu1 %v2618_v63, %s5058_s5  ;;  %v2604_v35 = vadd.f32 1.0, %v4880_v11 }
0x1469   :  { %4881 = vrcp.f32 %v2602_v10 }
0x1473   :  { %v4882_v61 = vpop.eup %4881 }
0x14d6   :  { %v2622_v4 = vpop.permute.xlu0 %2621 }
0x14d7   :  { %v5750_v12 = vadd.f32 %v2622_v4, %v2615_v23 }
0x14d9   :  { %4883 = vtanh.f32 %v5750_v12 }
0x14da   :  { %v2624_v57 = vpop.permute.xlu1 %2623  ;;  %4885 = vrcp.f32 %v2604_v35 }
0x14db   :  { %v5754_v42 = vadd.f32 %v2624_v57, %v2616_v18 }
0x14dd   :  { %4887 = vtanh.f32 %v5754_v42 }
0x14e3   :  { %v4884_v28 = vpop.eup %4883 }
0x14e4   :  { %v5757_v47 = vmul.f32 %v4884_v28, %v4882_v61  ;;  %v4886_v52 = vpop.eup %4885 }
0x14e6   :  { %2652 = vrot.lane.b32.xlu0 %v5757_v47, %s5058_s5 }
0x14e7   :  { %v4888_v48 = vpop.eup %4887 }
0x14e8   :  { %v5761_v51 = vmul.f32 %v4888_v48, %v4886_v52 }
0x14ea   :  { %6250 = vst [vmem:[#allocation5_spill] sm:$0xff] %v5761_v51  ;;  %2654 = vrot.lane.b32.xlu1 %v5761_v51, %s5058_s5 }
0x1558   :  { %v2653_v58 = vpop.permute.xlu0 %2652 }
0x1559   :  { %4103 = vmatmul.mubr.msk.f32.vlgmr.msra.gmra.mrb[20].mxu1 %vm59_vm1, %v2653_v58 }
0x155a   :  { %4440 = vmatpush1.bf16.msra.mxu1 %v5209_v32  ;;  %2730 = vmatprep.mubr.f32.mxu1 %v5057_v7 }
0x155b   :  { %4442 = vmatprep.subr.bf16.mxu1 %v5213_v33 }
0x155c   :  { %v2655_v31 = vpop.permute.xlu1 %2654 }
0x155d   :  { %4104 = vmatmul.mubr.msk.f32.gmra.mrb[22].mxu1 %vm59_vm1, %v2655_v31 }
0x155e   :  { %4444 = vmatpush1.bf16.msra.mxu1 %v5225_v36  ;;  %2807 = vmatprep.mubr.f32.mxu1 %v5057_v7 }
0x155f   :  { %4470 = vmatprep.subr.bf16.mxu1 %v5117_v3 }
0x1561   :  { %4105 = vmatmul.mubr.msk.f32.vlgmr.msra.gmra.mrb[20].mxu1 %vm140_vm0, %v4101_v55 }
0x1562   :  { %2813 = vmatprep.mubr.f32.mxu1 %v5057_v7  ;;  %4472 = vmatpush1.bf16.msra.mxu1 %v5130_v8 }
0x1563   :  { %4474 = vmatprep.subr.bf16.mxu1 %v5132_v9 }
0x1565   :  { %4106 = vmatmul.mubr.msk.f32.gmra.mrb[22].mxu1 %vm140_vm0, %v4102_v38 }
0x1566   :  { %4476 = vmatpush1.bf16.msra.mxu1 %v5149_v14  ;;  %3194 = vmatprep.mubr.f32.mxu1 %v5057_v7 }
0x1567   :  { %4478 = vmatprep.subr.bf16.mxu1 %v5153_v15 }
0x156a   :  { %4480 = vmatpush1.bf16.msra.mxu1 %v5169_v20 }
0x156b   :  { %4482 = vmatprep.subr.bf16.mxu1 %v5173_v21 }
0x156e   :  { %4484 = vmatpush1.bf16.msra.mxu1 %v5189_v26 }
0x156f   :  { %4486 = vmatprep.subr.bf16.mxu1 %v5193_v27 }
0x1634   :  { %v2809_v59 = vpop.f32.mrb[20].mxu1 }
0x1635   :  { %v2820_v60 = vadd.f32 %v2809_v59, %v5258_v43  ;;  %v2811_v6 = vpop.f32.mrb[21].mxu1 }
0x1636   :  { %v2821_v11 = vadd.f32 %v2811_v6, %v5265_v53 }
0x1637   :  { %v4107_v63 = vmul.f32 -1.442695, %v2820_v60 }
0x1638   :  { %v2815_v5 = vpop.f32.mrb[22].mxu1  ;;  %v4108_v55 = vmul.f32 -1.442695, %v2821_v11 }
0x1639   :  { %4889 = vpow2.f32 %v4107_v63  ;;  %v2822_v1 = vadd.f32 %v2815_v5, %v5258_v43  ;;  %v2817_v50 = vpop.f32.mrb[23].mxu1 }
0x163a   :  { %v2823_v35 = vadd.f32 %v2817_v50, %v5265_v53 }
0x163b   :  { %v4109_v10 = vmul.f32 -1.442695, %v2822_v1 }
0x163c   :  { %v4110_v38 = vmul.f32 -1.442695, %v2823_v35 }
0x163d   :  { %4891 = vpow2.f32 %v4109_v10 }
0x163e   :  { %4893 = vtanh.f32 %v2821_v11 }
0x1643   :  { %v4890_v23 = vpop.eup %4889 }
0x1644   :  { %v2836_v4 = vadd.f32 1.0, %v4890_v23 }
0x1646   :  { %4895 = vrcp.f32 %v2836_v4 }
0x1647   :  { %v4892_v18 = vpop.eup %4891  ;;  %4897 = vtanh.f32 %v2823_v35 }
0x1648   :  { %v2838_v57 = vadd.f32 1.0, %v4892_v18  ;;  %v4894_v61 = vpop.eup %4893 }
0x164a   :  { %4899 = vrcp.f32 %v2838_v57 }
0x164b   :  { %4901 = vpow2.f32 %v4108_v55 }
0x164c   :  { %4903 = vpow2.f32 %v4110_v38 }
0x1650   :  { %v4896_v28 = vpop.eup %4895 }
0x1651   :  { %v2852_v52 = vmul.f32 %v4896_v28, %v4894_v61  ;;  %v4898_v48 = vpop.eup %4897  ;;  %v2850_v63 = vmul.f32 %v4896_v28, %v5750_v12 }
0x1653   :  { %2856 = vrot.lane.b32.xlu0 %v2852_v52, %s5058_s5  ;;  %v4111_v52 = vld [vmem:[%s6232_s0 + $0xc0] sm:$0xff] }
0x1654   :  { %v4900_v58 = vpop.eup %4899 }
0x1655   :  { %v2853_v31 = vmul.f32 %v4900_v58, %v4898_v48  ;;  %v4902_v59 = vpop.eup %4901  ;;  %v2851_v10 = vmul.f32 %v4900_v58, %v5754_v42  ;;  %v4112_v48 = vld [vmem:[%s6232_s0 + $0xc8] sm:$0xff] }
0x1656   :  { %v2837_v60 = vadd.f32 1.0, %v4902_v59  ;;  %v4904_v6 = vpop.eup %4903 }
0x1657   :  { %2858 = vrot.lane.b32.xlu1 %v2853_v31, %s5058_s5  ;;  %v2839_v50 = vadd.f32 1.0, %v4904_v6 }
0x1658   :  { %4905 = vrcp.f32 %v2837_v60 }
0x1662   :  { %v4906_v11 = vpop.eup %4905 }
0x16c5   :  { %v2857_v5 = vpop.permute.xlu0 %2856 }
0x16c6   :  { %v5798_v1 = vadd.f32 %v2857_v5, %v2850_v63 }
0x16c8   :  { %4907 = vtanh.f32 %v5798_v1 }
0x16c9   :  { %v2859_v23 = vpop.permute.xlu1 %2858  ;;  %4909 = vrcp.f32 %v2839_v50 }
0x16ca   :  { %v5802_v4 = vadd.f32 %v2859_v23, %v2851_v10 }
0x16cc   :  { %4911 = vtanh.f32 %v5802_v4 }
0x16d2   :  { %v4908_v35 = vpop.eup %4907 }
0x16d3   :  { %v5805_v18 = vmul.f32 %v4908_v35, %v4906_v11  ;;  %v4910_v12 = vpop.eup %4909 }
0x16d5   :  { %2887 = vrot.lane.b32.xlu0 %v5805_v18, %s5058_s5 }
0x16d6   :  { %v4912_v57 = vpop.eup %4911 }
0x16d7   :  { %v5809_v61 = vmul.f32 %v4912_v57, %v4910_v12 }
0x16d9   :  { %6251 = vst [vmem:[#allocation6_spill] sm:$0xff] %v5809_v61  ;;  %2889 = vrot.lane.b32.xlu1 %v5809_v61, %s5058_s5 }
0x1747   :  { %v2888_v42 = vpop.permute.xlu0 %2887 }
0x1748   :  { %4113 = vmatmul.mubr.msk.f32.vlgmr.msra.gmra.mrb[24].mxu0 %vm59_vm1, %v2888_v42 }
0x1749   :  { %4464 = vmatpush1.bf16.msra.mxu0 %v5209_v32  ;;  %2965 = vmatprep.mubr.f32.mxu0 %v5057_v7 }
0x174a   :  { %4466 = vmatprep.subr.bf16.mxu0 %v5213_v33 }
0x174b   :  { %v2890_v28 = vpop.permute.xlu1 %2889 }
0x174c   :  { %4114 = vmatmul.mubr.msk.f32.gmra.mrb[26].mxu0 %vm59_vm1, %v2890_v28 }
0x174d   :  { %4468 = vmatpush1.bf16.msra.mxu0 %v5225_v36  ;;  %3042 = vmatprep.mubr.f32.mxu0 %v5057_v7 }
0x174e   :  { %4494 = vmatprep.subr.bf16.mxu0 %v5117_v3 }
0x1750   :  { %4115 = vmatmul.mubr.msk.f32.vlgmr.msra.gmra.mrb[24].mxu0 %vm140_vm0, %v4111_v52 }
0x1751   :  { %3048 = vmatprep.mubr.f32.mxu0 %v5057_v7  ;;  %4496 = vmatpush1.bf16.msra.mxu0 %v5130_v8 }
0x1752   :  { %4498 = vmatprep.subr.bf16.mxu0 %v5132_v9 }
0x1754   :  { %4116 = vmatmul.mubr.msk.f32.gmra.mrb[26].mxu0 %vm140_vm0, %v4112_v48 }
0x1755   :  { %4500 = vmatpush1.bf16.msra.mxu0 %v5149_v14  ;;  %3429 = vmatprep.mubr.f32.mxu0 %v5057_v7 }
0x1756   :  { %4502 = vmatprep.subr.bf16.mxu0 %v5153_v15 }
0x1759   :  { %4504 = vmatpush1.bf16.msra.mxu0 %v5169_v20 }
0x175a   :  { %4506 = vmatprep.subr.bf16.mxu0 %v5173_v21 }
0x175d   :  { %4508 = vmatpush1.bf16.msra.mxu0 %v5189_v26 }
0x175e   :  { %4510 = vmatprep.subr.bf16.mxu0 %v5193_v27 }
0x1823   :  { %v3044_v58 = vpop.f32.mrb[24].mxu0 }
0x1824   :  { %v3055_v31 = vadd.f32 %v3044_v58, %v5258_v43  ;;  %v3046_v55 = vpop.f32.mrb[25].mxu0 }
0x1825   :  { %v3056_v5 = vadd.f32 %v3046_v55, %v5265_v53 }
0x1826   :  { %v4117_v38 = vmul.f32 -1.442695, %v3055_v31 }
0x1827   :  { %v3050_v59 = vpop.f32.mrb[26].mxu0  ;;  %v4118_v58 = vmul.f32 -1.442695, %v3056_v5 }
0x1828   :  { %4913 = vpow2.f32 %v4117_v38  ;;  %v3057_v60 = vadd.f32 %v3050_v59, %v5258_v43  ;;  %v3052_v6 = vpop.f32.mrb[27].mxu0 }
0x1829   :  { %v3058_v23 = vadd.f32 %v3052_v6, %v5265_v53 }
0x182a   :  { %v4119_v63 = vmul.f32 -1.442695, %v3057_v60 }
0x182b   :  { %v4120_v31 = vmul.f32 -1.442695, %v3058_v23 }
0x182c   :  { %4915 = vpow2.f32 %v4119_v63 }
0x182d   :  { %4917 = vtanh.f32 %v3056_v5 }
0x1832   :  { %v4914_v50 = vpop.eup %4913 }
0x1833   :  { %v3071_v10 = vadd.f32 1.0, %v4914_v50 }
0x1835   :  { %4919 = vrcp.f32 %v3071_v10 }
0x1836   :  { %v4916_v11 = vpop.eup %4915  ;;  %4921 = vtanh.f32 %v3058_v23 }
0x1837   :  { %v3073_v35 = vadd.f32 1.0, %v4916_v11  ;;  %v4918_v12 = vpop.eup %4917 }
0x1839   :  { %4923 = vrcp.f32 %v3073_v35 }
0x183a   :  { %4925 = vpow2.f32 %v4118_v58 }
0x183b   :  { %4927 = vpow2.f32 %v4120_v31 }
0x183f   :  { %v4920_v57 = vpop.eup %4919 }
0x1840   :  { %v3087_v42 = vmul.f32 %v4920_v57, %v4918_v12  ;;  %v4922_v28 = vpop.eup %4921  ;;  %v3085_v60 = vmul.f32 %v4920_v57, %v5798_v1 }
0x1842   :  { %3091 = vrot.lane.b32.xlu0 %v3087_v42, %s5058_s5 }
0x1843   :  { %v4924_v52 = vpop.eup %4923 }
0x1844   :  { %v3088_v48 = vmul.f32 %v4924_v52, %v4922_v28  ;;  %v4926_v55 = vpop.eup %4925  ;;  %v3086_v10 = vmul.f32 %v4924_v52, %v5802_v4  ;;  %v4121_v52 = vld [vmem:[%s6232_s0 + $0xd0] sm:$0xff] }
0x1845   :  { %v3072_v38 = vadd.f32 1.0, %v4926_v55  ;;  %v4928_v59 = vpop.eup %4927 }
0x1846   :  { %3093 = vrot.lane.b32.xlu1 %v3088_v48, %s5058_s5  ;;  %v3074_v50 = vadd.f32 1.0, %v4928_v59  ;;  %v4122_v48 = vld [vmem:[%s6232_s0 + $0xd8] sm:$0xff] }
0x1847   :  { %4929 = vrcp.f32 %v3072_v38 }
0x1851   :  { %v4930_v5 = vpop.eup %4929 }
0x18b4   :  { %v3092_v6 = vpop.permute.xlu0 %3091 }
0x18b5   :  { %v5846_v63 = vadd.f32 %v3092_v6, %v3085_v60 }
0x18b7   :  { %4931 = vtanh.f32 %v5846_v63 }
0x18b8   :  { %v3094_v11 = vpop.permute.xlu1 %3093  ;;  %4933 = vrcp.f32 %v3074_v50 }
0x18b9   :  { %v5850_v35 = vadd.f32 %v3094_v11, %v3086_v10 }
0x18bb   :  { %4935 = vtanh.f32 %v5850_v35 }
0x18c1   :  { %v4932_v23 = vpop.eup %4931 }
0x18c2   :  { %v5853_v12 = vmul.f32 %v4932_v23, %v4930_v5  ;;  %v4934_v1 = vpop.eup %4933 }
0x18c4   :  { %3122 = vrot.lane.b32.xlu0 %v5853_v12, %s5058_s5 }
0x18c5   :  { %v4936_v57 = vpop.eup %4935 }
0x18c6   :  { %v5857_v42 = vmul.f32 %v4936_v57, %v4934_v1 }
0x18c8   :  { %6252 = vst [vmem:[#allocation7_spill] sm:$0xff] %v5857_v42  ;;  %3124 = vrot.lane.b32.xlu1 %v5857_v42, %s5058_s5 }
0x1936   :  { %v3123_v4 = vpop.permute.xlu0 %3122 }
0x1937   :  { %4123 = vmatmul.mubr.msk.f32.vlgmr.msra.gmra.mrb[24].mxu1 %vm59_vm1, %v3123_v4 }
0x1938   :  { %4488 = vmatpush1.bf16.msra.mxu1 %v5209_v32  ;;  %3200 = vmatprep.mubr.f32.mxu1 %v5057_v7 }
0x1939   :  { %4490 = vmatprep.subr.bf16.mxu1 %v5213_v33 }
0x193a   :  { %v3125_v28 = vpop.permute.xlu1 %3124 }
0x193b   :  { %4124 = vmatmul.mubr.msk.f32.gmra.mrb[26].mxu1 %vm59_vm1, %v3125_v28 }
0x193c   :  { %4492 = vmatpush1.bf16.msra.mxu1 %v5225_v36  ;;  %3277 = vmatprep.mubr.f32.mxu1 %v5057_v7 }
0x193d   :  { %4518 = vmatprep.subr.bf16.mxu1 %v5117_v3 }
0x193f   :  { %4125 = vmatmul.mubr.msk.f32.vlgmr.msra.gmra.mrb[24].mxu1 %vm140_vm0, %v4121_v52 }
0x1940   :  { %3283 = vmatprep.mubr.f32.mxu1 %v5057_v7  ;;  %4520 = vmatpush1.bf16.msra.mxu1 %v5130_v8 }
0x1941   :  { %4522 = vmatprep.subr.bf16.mxu1 %v5132_v9 }
0x1943   :  { %4126 = vmatmul.mubr.msk.f32.gmra.mrb[26].mxu1 %vm140_vm0, %v4122_v48 }
0x1944   :  { %4524 = vmatpush1.bf16.msra.mxu1 %v5149_v14  ;;  %3664 = vmatprep.mubr.f32.mxu1 %v5057_v7 }
0x1945   :  { %4526 = vmatprep.subr.bf16.mxu1 %v5153_v15 }
0x1948   :  { %4528 = vmatpush1.bf16.msra.mxu1 %v5169_v20 }
0x1949   :  { %4530 = vmatprep.subr.bf16.mxu1 %v5173_v21 }
0x194c   :  { %4532 = vmatpush1.bf16.msra.mxu1 %v5189_v26 }
0x194d   :  { %4534 = vmatprep.subr.bf16.mxu1 %v5193_v27 }
0x1a12   :  { %v3279_v3 = vpop.f32.mrb[24].mxu1 }
0x1a13   :  { %v3290_v8 = vadd.f32 %v3279_v3, %v5258_v43  ;;  %v3281_v9 = vpop.f32.mrb[25].mxu1 }
0x1a14   :  { %v3291_v15 = vadd.f32 %v3281_v9, %v5265_v53 }
0x1a15   :  { %v4127_v58 = vmul.f32 -1.442695, %v3290_v8 }
0x1a16   :  { %v3285_v31 = vpop.f32.mrb[26].mxu1  ;;  %v4128_v23 = vmul.f32 -1.442695, %v3291_v15 }
0x1a17   :  { %4937 = vpow2.f32 %v4127_v58  ;;  %v3292_v14 = vadd.f32 %v3285_v31, %v5258_v43  ;;  %v3287_v55 = vpop.f32.mrb[27].mxu1 }
0x1a18   :  { %v3293_v26 = vadd.f32 %v3287_v55, %v5265_v53 }
0x1a19   :  { %v4129_v38 = vmul.f32 -1.442695, %v3292_v14 }
0x1a1a   :  { %v4130_v1 = vmul.f32 -1.442695, %v3293_v26 }
0x1a1b   :  { %4939 = vpow2.f32 %v4129_v38 }
0x1a1c   :  { %4941 = vtanh.f32 %v3291_v15 }
0x1a21   :  { %v4938_v20 = vpop.eup %4937 }
0x1a22   :  { %v3306_v21 = vadd.f32 1.0, %v4938_v20 }
0x1a24   :  { %4943 = vrcp.f32 %v3306_v21 }
0x1a25   :  { %v4940_v27 = vpop.eup %4939  ;;  %4945 = vtanh.f32 %v3293_v26  ;;  %v4131_v26 = vld [vmem:[%s6232_s0 + $0xe0] sm:$0xff] }
0x1a26   :  { %v3308_v59 = vadd.f32 1.0, %v4940_v27  ;;  %v4942_v60 = vpop.eup %4941  ;;  %v4132_v27 = vld [vmem:[%s6232_s0 + $0xe8] sm:$0xff] }
0x1a28   :  { %4947 = vrcp.f32 %v3308_v59 }
0x1a29   :  { %4949 = vpow2.f32 %v4128_v23 }
0x1a2a   :  { %4951 = vpow2.f32 %v4130_v1 }
0x1a2e   :  { %v4944_v6 = vpop.eup %4943 }
0x1a2f   :  { %v3322_v50 = vmul.f32 %v4944_v6, %v4942_v60  ;;  %v4946_v10 = vpop.eup %4945  ;;  %v3320_v52 = vmul.f32 %v4944_v6, %v5846_v63 }
0x1a31   :  { %3326 = vrot.lane.b32.xlu0 %v3322_v50, %s5058_s5 }
0x1a32   :  { %v4948_v11 = vpop.eup %4947 }
0x1a33   :  { %v3323_v5 = vmul.f32 %v4948_v11, %v4946_v10  ;;  %v4950_v57 = vpop.eup %4949  ;;  %v3321_v9 = vmul.f32 %v4948_v11, %v5850_v35 }
0x1a34   :  { %v3307_v4 = vadd.f32 1.0, %v4950_v57  ;;  %v4952_v28 = vpop.eup %4951 }
0x1a35   :  { %3328 = vrot.lane.b32.xlu1 %v3323_v5, %s5058_s5  ;;  %v3309_v8 = vadd.f32 1.0, %v4952_v28 }
0x1a36   :  { %4953 = vrcp.f32 %v3307_v4 }
0x1a40   :  { %v4954_v14 = vpop.eup %4953 }
0x1aa3   :  { %v3327_v48 = vpop.permute.xlu0 %3326 }
0x1aa4   :  { %v5894_v3 = vadd.f32 %v3327_v48, %v3320_v52 }
0x1aa6   :  { %4955 = vtanh.f32 %v5894_v3 }
0x1aa7   :  { %v3329_v58 = vpop.permute.xlu1 %3328  ;;  %4957 = vrcp.f32 %v3309_v8 }
0x1aa8   :  { %v5898_v31 = vadd.f32 %v3329_v58, %v3321_v9 }
0x1aaa   :  { %4959 = vtanh.f32 %v5898_v31 }
0x1ab0   :  { %v4956_v55 = vpop.eup %4955 }
0x1ab1   :  { %v5901_v38 = vmul.f32 %v4956_v55, %v4954_v14  ;;  %v4958_v63 = vpop.eup %4957 }
0x1ab3   :  { %6253 = vst [vmem:[#allocation8_spill] sm:$0xff] %v5901_v38  ;;  %3357 = vrot.lane.b32.xlu0 %v5901_v38, %s5058_s5 }
0x1ab4   :  { %v4960_v15 = vpop.eup %4959 }
0x1ab5   :  { %v5905_v20 = vmul.f32 %v4960_v15, %v4958_v63  ;;  %v5059_v15 = vmov 0  }
0x1ab6   :  { %4623 = vset.pattern.permute.xlu0 %v5059_v15  ;;  %4624 = vset.pattern.permute.xlu1 %v5059_v15 }
0x1ab7   :  { %6254 = vst [vmem:[#allocation9_spill] sm:$0xff] %v5905_v20  ;;  %3359 = vrot.lane.b32.xlu1 %v5905_v20, %s5058_s5 }
0x1b25   :  { %v3358_v35 = vpop.permute.xlu0 %3357 }
0x1b26   :  { %4133 = vmatmul.mubr.msk.f32.vlgmr.msra.gmra.mrb[28].mxu0 %vm59_vm1, %v3358_v35 }
0x1b27   :  { %4512 = vmatpush1.bf16.msra.mxu0 %v5209_v32  ;;  %3435 = vmatprep.mubr.f32.mxu0 %v5057_v7 }
0x1b28   :  { %4514 = vmatprep.subr.bf16.mxu0 %v5213_v33 }
0x1b29   :  { %v3360_v21 = vpop.permute.xlu1 %3359 }
0x1b2a   :  { %4134 = vmatmul.mubr.msk.f32.gmra.mrb[30].mxu0 %vm59_vm1, %v3360_v21 }
0x1b2b   :  { %4516 = vmatpush1.bf16.msra.mxu0 %v5225_v36  ;;  %3512 = vmatprep.mubr.f32.mxu0 %v5057_v7 }
0x1b2e   :  { %4135 = vmatmul.mubr.msk.f32.vlgmr.msra.gmra.mrb[28].mxu0 %vm140_vm0, %v4131_v26 }
0x1b2f   :  { %3518 = vmatprep.mubr.f32.mxu0 %v5057_v7 }
0x1b32   :  { %4136 = vmatmul.mubr.msk.f32.gmra.mrb[30].mxu0 %vm140_vm0, %v4132_v27 }
0x1b33   :  { %3914 = vmatprep.mubr.f32.mxu0 %v5057_v7 }
0x1c01   :  { %v3514_v59 = vpop.f32.mrb[28].mxu0 }
0x1c02   :  { %v3525_v60 = vadd.f32 %v3514_v59, %v5258_v43  ;;  %v3516_v6 = vpop.f32.mrb[29].mxu0 }
0x1c03   :  { %v3526_v1 = vadd.f32 %v3516_v6, %v5265_v53 }
0x1c04   :  { %v4137_v50 = vmul.f32 -1.442695, %v3525_v60 }
0x1c05   :  { %v3520_v10 = vpop.f32.mrb[30].mxu0  ;;  %v4138_v35 = vmul.f32 -1.442695, %v3526_v1 }
0x1c06   :  { %4961 = vpow2.f32 %v4137_v50  ;;  %v3527_v11 = vadd.f32 %v3520_v10, %v5258_v43  ;;  %v3522_v5 = vpop.f32.mrb[31].mxu0 }
0x1c07   :  { %v3528_v28 = vadd.f32 %v3522_v5, %v5265_v53 }
0x1c08   :  { %v4139_v23 = vmul.f32 -1.442695, %v3527_v11 }
0x1c09   :  { %v4140_v21 = vmul.f32 -1.442695, %v3528_v28 }
0x1c0a   :  { %4963 = vpow2.f32 %v4139_v23 }
0x1c0b   :  { %4965 = vtanh.f32 %v3526_v1  ;;  %v5945_v1 = vld [vmem:[%s6234_s2] sm:$0xff] }
0x1c0c   :  { %vm283_vm2 = vcmp.eq.s32.totalorder %v5945_v1, 1  ;;  %vm518_vm6 = vcmp.eq.s32.totalorder %v5945_v1, 2  ;;  %vm753_vm8 = vcmp.eq.s32.totalorder %v5945_v1, 3  ;;  %vm988_vm10 = vcmp.eq.s32.totalorder %v5945_v1, 4 }
0x1c0d   :  { %vm1223_vm12 = vcmp.eq.s32.totalorder %v5945_v1, 5  ;;  %vm1458_vm14 = vcmp.eq.s32.totalorder %v5945_v1, 6 }
0x1c10   :  { %v4962_v57 = vpop.eup %4961 }
0x1c11   :  { %v3541_v4 = vadd.f32 1.0, %v4962_v57 }
0x1c13   :  { %4967 = vrcp.f32 %v3541_v4 }
0x1c14   :  { %v4964_v52 = vpop.eup %4963  ;;  %4969 = vtanh.f32 %v3528_v28  ;;  %v3827_v28 = vld [vmem:[%s6238_s6 + $0x18] sm:$0xff] }
0x1c15   :  { %v3543_v48 = vadd.f32 1.0, %v4964_v52  ;;  %v4966_v8 = vpop.eup %4965  ;;  %v5959_v52 = vld [vmem:[%s6234_s2 + $0x8] sm:$0xff] }
0x1c16   :  { %vm519_vm3 = vcmp.eq.s32.totalorder %v5959_v52, 2  ;;  %vm284_vm4 = vcmp.eq.s32.totalorder %v5959_v52, 1  ;;  %vm754_vm5 = vcmp.eq.s32.totalorder %v5959_v52, 3  ;;  %vm989_vm7 = vcmp.eq.s32.totalorder %v5959_v52, 4 }
0x1c17   :  { %4971 = vrcp.f32 %v3543_v48  ;;  %vm1224_vm9 = vcmp.eq.s32.totalorder %v5959_v52, 5  ;;  %vm1459_vm11 = vcmp.eq.s32.totalorder %v5959_v52, 6  ;;  %vm1694_vm13 = vcmp.eq.s32.totalorder %v5959_v52, 7 }
0x1c18   :  { %4973 = vpow2.f32 %v4138_v35  ;;  %vm1929_vm15 = vcmp.eq.s32.totalorder %v5959_v52, 8 }
0x1c19   :  { %4975 = vpow2.f32 %v4140_v21  ;;  %v3829_v21 = vld [vmem:[%s6238_s6 + $0x28] sm:$0xff] }
0x1c1d   :  { %v4968_v9 = vpop.eup %4967 }
0x1c1e   :  { %v3557_v58 = vmul.f32 %v4968_v9, %v4966_v8  ;;  %v4970_v14 = vpop.eup %4969  ;;  %v3555_v60 = vmul.f32 %v4968_v9, %v5894_v3  ;;  %v3824_v8 = vld [vmem:[%s6238_s6] sm:$0xff]  ;;  %v3826_v9 = vld [vmem:[%s6238_s6 + $0x10] sm:$0xff] }
0x1c20   :  { %3561 = vrot.lane.b32.xlu0 %v3557_v58, %s5058_s5 }
0x1c21   :  { %v4972_v55 = vpop.eup %4971 }
0x1c22   :  { %v3558_v63 = vmul.f32 %v4972_v55, %v4970_v14  ;;  %v4974_v26 = vpop.eup %4973  ;;  %v3556_v11 = vmul.f32 %v4972_v55, %v5898_v31  ;;  %v3825_v31 = vld [vmem:[%s6238_s6 + $0x8] sm:$0xff]  ;;  %v5971_v14 = vpack.c.bf16 %v3826_v9, %v3824_v8  ;;  %v1226_v8 = vsel %vm1224_vm9, 1, %v5059_v15 }
0x1c23   :  { %v3542_v27 = vadd.f32 1.0, %v4974_v26  ;;  %v4976_v59 = vpop.eup %4975  ;;  %v5961_v48 = vpack.c.bf16 %v3827_v28, %v3825_v31  ;;  %v3831_v26 = vld [vmem:[%s6238_s6 + $0x38] sm:$0xff]  ;;  %v991_v31 = vsel %vm989_vm7, 1, %v5059_v15  ;;  %v755_v28 = vsel %vm753_vm8, 1, %v5059_v15 }
0x1c24   :  { %3563 = vrot.lane.b32.xlu1 %v3558_v63, %s5058_s5  ;;  %v3544_v10 = vadd.f32 1.0, %v4976_v59  ;;  %v285_v63 = vsel %vm283_vm2, 1, %v5059_v15  ;;  %v3828_v59 = vld [vmem:[%s6238_s6 + $0x20] sm:$0xff]  ;;  %v990_v9 = vsel %vm988_vm10, 1, %v5059_v15  ;;  %vm1693_vm2 = vcmp.eq.s32.totalorder %v5945_v1, 7 }
0x1c25   :  { %4977 = vrcp.f32 %v3542_v27  ;;  %4542 = vmatprep.subr.bf16.mxu0 %v5961_v48  ;;  %v5986_v27 = vpack.c.bf16 %v3831_v26, %v3829_v21  ;;  %v1460_v21 = vsel %vm1458_vm14, 1, %v5059_v15  ;;  %v1931_v26 = vsel %vm1929_vm15, 1, %v5059_v15 }
0x1c26   :  { %4544 = vmatpush1.bf16.msra.mxu0 %v5971_v14  ;;  %vm2634_vm7 = vcmp.eq.s32.totalorder %v5959_v52, 11  ;;  %vm2398_vm8 = vcmp.eq.s32.totalorder %v5945_v1, 10  ;;  %vm2869_vm9 = vcmp.eq.s32.totalorder %v5959_v52, 12  ;;  %vm2633_vm10 = vcmp.eq.s32.totalorder %v5945_v1, 11 }
0x1c27   :  { %4546 = vmatprep.subr.bf16.mxu0 %v5986_v27  ;;  %vm3103_vm14 = vcmp.eq.s32.totalorder %v5945_v1, 13  ;;  %vm3338_vm15 = vcmp.eq.s32.totalorder %v5945_v1, 14 }
0x1c2f   :  { %v4978_v3 = vpop.eup %4977 }
0x1c92   :  { %v3562_v6 = vpop.permute.xlu0 %3561 }
0x1c93   :  { %v5935_v50 = vadd.f32 %v3562_v6, %v3555_v60  ;;  %v3830_v60 = vld [vmem:[%s6238_s6 + $0x30] sm:$0xff] }
0x1c94   :  { %v5996_v6 = vpack.c.bf16 %v3830_v60, %v3828_v59  ;;  %v1695_v59 = vsel %vm1693_vm2, 1, %v5059_v15  ;;  %vm3808_vm2 = vcmp.eq.s32.totalorder %v5945_v1, 16 }
0x1c95   :  { %4979 = vtanh.f32 %v5935_v50 }
0x1c96   :  { %v3564_v5 = vpop.permute.xlu1 %3563  ;;  %4981 = vrcp.f32 %v3544_v10  ;;  %v521_v10 = vsel %vm519_vm3, 1, %v5059_v15  ;;  %4548 = vmatpush1.bf16.msra.mxu0 %v5996_v6  ;;  %vm2164_vm3 = vcmp.eq.s32.totalorder %v5959_v52, 9 }
0x1c97   :  { %v5939_v23 = vadd.f32 %v3564_v5, %v3556_v11  ;;  %v286_v11 = vsel %vm284_vm4, 1, %v5059_v15  ;;  %v3822_v5 = vld [vmem:[%s6233_s1] sm:$0xff]  ;;  %vm1928_vm4 = vcmp.eq.s32.totalorder %v5945_v1, 8  ;;  %v2166_v60 = vsel %vm2164_vm3, 1, %v5059_v15 }
0x1c98   :  { %vm3574_vm3 = vcmp.eq.s32.totalorder %v5959_v52, 15 }
0x1c99   :  { %4983 = vtanh.f32 %v5939_v23  ;;  %4151 = vmatmul.mubr.msk.f32.vlgmr.msra.gmra.mrb[32].mxu0 %vm140_vm0, %v3822_v5 }
0x1c9f   :  { %v4980_v57 = vpop.eup %4979 }
0x1ca0   :  { %v5947_v4 = vmul.f32 %v4980_v57, %v4978_v3  ;;  %v4982_v58 = vpop.eup %4981  ;;  %v756_v3 = vsel %vm754_vm5, 1, %v5059_v15  ;;  %v520_v57 = vsel %vm518_vm6, 1, %v5059_v15  ;;  %vm2399_vm5 = vcmp.eq.s32.totalorder %v5959_v52, 10 }
0x1ca1   :  { %vm2163_vm6 = vcmp.eq.s32.totalorder %v5945_v1, 9 }
0x1ca2   :  { %6255 = vst [vmem:[#allocation10_spill] sm:$0xff] %v5947_v4  ;;  %3592 = vrot.lane.b32.xlu0 %v5947_v4, %s5058_s5  ;;  %v2165_v5 = vsel %vm2163_vm6, 1, %v5059_v15 }
0x1ca3   :  { %v4984_v55 = vpop.eup %4983 }
0x1ca4   :  { %v5975_v35 = vmul.f32 %v4984_v55, %v4982_v58  ;;  %v1461_v58 = vsel %vm1459_vm11, 1, %v5059_v15  ;;  %v1225_v55 = vsel %vm1223_vm12, 1, %v5059_v15  ;;  %vm3104_vm11 = vcmp.eq.s32.totalorder %v5959_v52, 13 }
0x1ca5   :  { %vm2868_vm12 = vcmp.eq.s32.totalorder %v5945_v1, 12 }
0x1ca6   :  { %6256 = vst [vmem:[#allocation11_spill] sm:$0xff] %v5975_v35  ;;  %288 = vperm.xlu0 %4623, %v285_v63   ;;  %3594 = vrot.lane.b32.xlu1 %v5975_v35, %s5058_s5  ;;  %v1696_v63 = vsel %vm1694_vm13, 1, %v5059_v15  ;;  %vm3339_vm13 = vcmp.eq.s32.totalorder %v5959_v52, 14 }
0x1caa   :  { %526 = vperm.xlu0 %4623, %v521_v10   ;;  %291 = vperm.xlu1 %4624, %v286_v11   ;;  %v1930_v10 = vsel %vm1928_vm4, 1, %v5059_v15  ;;  %v2401_v11 = vsel %vm2399_vm5, 1, %v5059_v15  ;;  %vm3809_vm4 = vcmp.eq.s32.totalorder %v5959_v52, 16 }
0x1cae   :  { %761 = vperm.xlu0 %4623, %v756_v3   ;;  %523 = vperm.xlu1 %4624, %v520_v57   ;;  %v2636_v3 = vsel %vm2634_vm7, 1, %v5059_v15  ;;  %v2400_v57 = vsel %vm2398_vm8, 1, %v5059_v15 }
0x1cb2   :  { %996 = vperm.xlu0 %4623, %v991_v31   ;;  %758 = vperm.xlu1 %4624, %v755_v28   ;;  %v2871_v31 = vsel %vm2869_vm9, 1, %v5059_v15  ;;  %v2635_v28 = vsel %vm2633_vm10, 1, %v5059_v15 }
0x1cb6   :  { %1231 = vperm.xlu0 %4623, %v1226_v8   ;;  %993 = vperm.xlu1 %4624, %v990_v9   ;;  %v3106_v8 = vsel %vm3104_vm11, 1, %v5059_v15  ;;  %v2870_v9 = vsel %vm2868_vm12, 1, %v5059_v15 }
0x1cba   :  { %1466 = vperm.xlu0 %4623, %v1461_v58   ;;  %1228 = vperm.xlu1 %4624, %v1225_v55   ;;  %v3341_v58 = vsel %vm3339_vm13, 1, %v5059_v15  ;;  %v3105_v55 = vsel %vm3103_vm14, 1, %v5059_v15 }
0x1cbe   :  { %1701 = vperm.xlu0 %4623, %v1696_v63   ;;  %1463 = vperm.xlu1 %4624, %v1460_v21   ;;  %v3340_v63 = vsel %vm3338_vm15, 1, %v5059_v15 }
0x1cc2   :  { %1936 = vperm.xlu0 %4623, %v1931_v26   ;;  %1698 = vperm.xlu1 %4624, %v1695_v59   ;;  %v4141_v59 = vld [vmem:[%s6232_s0 + $0xf0] sm:$0xff] }
0x1cc6   :  { %2171 = vperm.xlu0 %4623, %v2166_v60   ;;  %1933 = vperm.xlu1 %4624, %v1930_v10  }
0x1cca   :  { %2406 = vperm.xlu0 %4623, %v2401_v11   ;;  %2168 = vperm.xlu1 %4624, %v2165_v5  }
0x1cce   :  { %2641 = vperm.xlu0 %4623, %v2636_v3   ;;  %2403 = vperm.xlu1 %4624, %v2400_v57  }
0x1cd2   :  { %2876 = vperm.xlu0 %4623, %v2871_v31   ;;  %2638 = vperm.xlu1 %4624, %v2635_v28  }
0x1cd6   :  { %3111 = vperm.xlu0 %4623, %v3106_v8   ;;  %2873 = vperm.xlu1 %4624, %v2870_v9  }
0x1cda   :  { %3346 = vperm.xlu0 %4623, %v3341_v58   ;;  %3108 = vperm.xlu1 %4624, %v3105_v55  }
0x1cde   :  { %3343 = vperm.xlu1 %4624, %v3340_v63  }
0x1d14   :  { %v3593_v21 = vpop.permute.xlu0 %3592 }
0x1d15   :  { %4143 = vmatmul.mubr.msk.f32.vlgmr.msra.gmra.mrb[28].mxu1 %vm59_vm1, %v3593_v21 }
0x1d16   :  { %4536 = vmatpush1.bf16.msra.mxu1 %v5209_v32  ;;  %3670 = vmatprep.mubr.f32.mxu1 %v5057_v7  ;;  %v4142_v32 = vld [vmem:[%s6232_s0 + $0xf8] sm:$0xff]  ;;  %s5060_s0 = smov [#allocation2]  }
0x1d17   :  { %4538 = vmatprep.subr.bf16.mxu1 %v5213_v33  ;;  %v3823_v33 = vld [vmem:[%s6233_s1 + $0x8] sm:$0xff]  ;;  %s3984_s1 = sshll.u32 %s5060_s0, 4  ;;  %s3985_s1 = int_to_ptr.vmem [resolvable:$true] %s3984_s1 }
0x1d18   :  { %v3595_v26 = vpop.permute.xlu1 %3594  ;;  %p5038_p1 = scmp.lt.s32.totalorder %s3985_s1, %s3985_s1 }
0x1d19   :  { %4144 = vmatmul.mubr.msk.f32.gmra.mrb[30].mxu1 %vm59_vm1, %v3595_v26 }
0x1d1a   :  { %4540 = vmatpush1.bf16.msra.mxu1 %v5225_v36  ;;  %3747 = vmatprep.mubr.f32.mxu1 %v5057_v7  ;;  %v3832_v36 = vld [vmem:[%s6239_s7] sm:$0x3]  ;;  %s5033_s7 = scalar_lea.vmem %s3985_s1, 256 }
0x1d1b   :  { %4549 = vmatprep.subr.bf16.mxu1 %v5961_v48  ;;  %v3837_v48 = vrot.slane %v3832_v36, %v227_v41  ;;  %p5034_p0 = scmp.ne.s32.totalorder %s3985_s1, %s5033_s7  ;;  %p5039_p2 = scmp.lt.s32.totalorder %s5033_s7, %s5033_s7 }
0x1d1d   :  { %4145 = vmatmul.mubr.msk.f32.vlgmr.msra.gmra.mrb[28].mxu1 %vm140_vm0, %v4141_v59  ;;  %p5040_p3 = por %p5039_p2, %p5038_p1 }
0x1d1e   :  { %3753 = vmatprep.mubr.f32.mxu1 %v5057_v7  ;;  %4551 = vmatpush1.bf16.msra.mxu1 %v5971_v14 }
0x1d1f   :  { %4550 = vmatprep.subr.bf16.mxu1 %v5986_v27  ;;  %p5041_p4 = pnand %p5040_p3, %p5034_p0 }
0x1d21   :  { %4146 = vmatmul.mubr.msk.f32.gmra.mrb[30].mxu1 %vm140_vm0, %v4142_v32 }
0x1d22   :  { %4552 = vmatpush1.bf16.msra.mxu1 %v5996_v6  ;;  %3920 = vmatprep.mubr.f32.mxu1 %v5057_v7  ;;  %v3841_v7 = vrot.slane %v3832_v36, %v231_v49 }
0x1d25   :  { %4152 = vmatmul.mubr.msk.f32.vlgmr.msra.gmra.mrb[32].mxu1 %vm140_vm0, %v3823_v33  ;;  %vm3573_vm0 = vcmp.eq.s32.totalorder %v5945_v1, 15  ;;  %v3811_v1 = vsel %vm3809_vm4, 1, %v5059_v15 }
0x1d6c   :  { %v3916_v14 = vpop.f32.mrb[32].mxu0 }
0x1d6d   :  { %v3917_v27 = vadd.f32 %v3916_v14, %v3837_v48  ;;  %v3918_v6 = vpop.f32.mrb[33].mxu0 }
0x1d6e   :  { %v6088_v10 = vadd.f32 %v3918_v6, %v3841_v7 }
0x1d6f   :  { %v4153_v60 = vmul.f32 -1.442695, %v3917_v27 }
0x1d70   :  { %6257 = vst [vmem:[#allocation12_spill] sm:$0xff] %v6088_v10 }
0x1d71   :  { %4985 = vpow2.f32 %v4153_v60 }
0x1d72   :  { %4987 = vtanh.f32 %v6088_v10 }
0x1d7b   :  { %v4986_v11 = vpop.eup %4985 }
0x1d7c   :  { %v3939_v5 = vadd.f32 1.0, %v4986_v11  ;;  %v4988_v3 = vpop.eup %4987 }
0x1d7e   :  { %4989 = vrcp.f32 %v3939_v5 }
0x1d88   :  { %v4990_v57 = vpop.eup %4989 }
0x1d89   :  { %v3953_v31 = vmul.f32 %v4990_v57, %v4988_v3 }
0x1df0   :  { %v3749_v28 = vpop.f32.mrb[28].mxu1 }
0x1df1   :  { %v3760_v41 = vadd.f32 %v3749_v28, %v5258_v43  ;;  %v3751_v8 = vpop.f32.mrb[29].mxu1 }
0x1df2   :  { %v6094_v32 = vadd.f32 %v3751_v8, %v5265_v53 }
0x1df3   :  { %v4147_v9 = vmul.f32 -1.442695, %v3760_v41 }
0x1df4   :  { %v3755_v58 = vpop.f32.mrb[30].mxu1 }
0x1df5   :  { %4991 = vpow2.f32 %v4147_v9  ;;  %v3762_v40 = vadd.f32 %v3755_v58, %v5258_v43  ;;  %v3757_v49 = vpop.f32.mrb[31].mxu1  ;;  %v3576_v9 = vsel %vm3574_vm3, 1, %v5059_v15 }
0x1df6   :  { %v6098_v14 = vadd.f32 %v3757_v49, %v5265_v53 }
0x1df7   :  { %v4149_v55 = vmul.f32 -1.442695, %v3762_v40 }
0x1df8   :  { %v3922_v63 = vpop.f32.mrb[32].mxu1 }
0x1df9   :  { %4993 = vpow2.f32 %v4149_v55  ;;  %v3923_v21 = vadd.f32 %v3922_v63, %v3837_v48  ;;  %v3924_v26 = vpop.f32.mrb[33].mxu1  ;;  %v292_v55 = vpop.permute.xlu1 %291 }
0x1dfa   :  { %v6100_v60 = vadd.f32 %v3924_v26, %v3841_v7  ;;  %v3575_v7 = vsel %vm3573_vm0, 1, %v5059_v15  ;;  %v289_v63 = vpop.permute.xlu0 %288  ;;  %vm294_vm6 = vcmp.eq.s32.totalorder %v292_v55, 1 }
0x1dfb   :  { %v4155_v59 = vmul.f32 -1.442695, %v3923_v21  ;;  %vm293_vm5 = vcmp.eq.s32.totalorder %v289_v63, 1 }
0x1dfc   :  { %6258 = vst [vmem:[#allocation13_spill] sm:$0xff] %v6100_v60 }
0x1dfd   :  { %4995 = vpow2.f32 %v4155_v59  ;;  %v524_v21 = vpop.permute.xlu1 %523 }
0x1dfe   :  { %4997 = vtanh.f32 %v6094_v32  ;;  %v527_v26 = vpop.permute.xlu0 %526  ;;  %vm528_vm7 = vcmp.eq.s32.totalorder %v524_v21, 1 }
0x1dff   :  { %v4992_v33 = vpop.eup %4991  ;;  %vm529_vm9 = vcmp.eq.s32.totalorder %v527_v26, 1 }
0x1e00   :  { %v3776_v36 = vadd.f32 1.0, %v4992_v33 }
0x1e01   :  { %v759_v59 = vpop.permute.xlu1 %758 }
0x1e02   :  { %4999 = vrcp.f32 %v3776_v36  ;;  %v762_v33 = vpop.permute.xlu0 %761  ;;  %vm763_vm8 = vcmp.eq.s32.totalorder %v759_v59, 1 }
0x1e03   :  { %v4994_v43 = vpop.eup %4993  ;;  %5001 = vtanh.f32 %v6098_v14  ;;  %vm764_vm11 = vcmp.eq.s32.totalorder %v762_v33, 1 }
0x1e04   :  { %v3778_v27 = vadd.f32 1.0, %v4994_v43 }
0x1e05   :  { %v994_v36 = vpop.permute.xlu1 %993 }
0x1e06   :  { %5003 = vrcp.f32 %v3778_v27  ;;  %v6119_v52 = vpop.permute.xlu0 %996  ;;  %vm998_vm10 = vcmp.eq.s32.totalorder %v994_v36, 1 }
0x1e07   :  { %v4996_v48 = vpop.eup %4995  ;;  %5005 = vtanh.f32 %v6100_v60  ;;  %vm999_vm13 = vcmp.eq.s32.totalorder %v6119_v52, 1 }
0x1e08   :  { %v3941_v6 = vadd.f32 1.0, %v4996_v48  ;;  %v4998_v11 = vpop.eup %4997 }
0x1e09   :  { %v1229_v43 = vpop.permute.xlu1 %1228 }
0x1e0a   :  { %5007 = vrcp.f32 %v3941_v6  ;;  %v6121_v27 = vpop.permute.xlu0 %1231  ;;  %vm1233_vm12 = vcmp.eq.s32.totalorder %v1229_v43, 1 }
0x1e0b   :  { %5009 = vtanh.f32 %v3953_v31  ;;  %v3810_v31 = vsel %vm3808_vm2, 1, %v5059_v15  ;;  %vm1234_vm0 = vcmp.eq.s32.totalorder %v6121_v27, 1 }
0x1e0c   :  { %v5000_v5 = vpop.eup %4999 }
0x1e0d   :  { %v3792_v3 = vmul.f32 %v5000_v5, %v4998_v11  ;;  %v5002_v53 = vpop.eup %5001  ;;  %v6123_v48 = vpop.permute.xlu1 %1463 }
0x1e0e   :  { %v6125_v15 = vpop.permute.xlu0 %1466  ;;  %vm1468_vm14 = vcmp.eq.s32.totalorder %v6123_v48, 1 }
0x1e0f   :  { %3796 = vrot.lane.b32.xlu1 %v3792_v3, %s5058_s5  ;;  %vm1469_vm3 = vcmp.eq.s32.totalorder %v6125_v15, 1 }
0x1e10   :  { %v6106_v57 = vpop.eup %5003 }
0x1e11   :  { %v3793_v28 = vmul.f32 %v6106_v57, %v5002_v53  ;;  %v5006_v41 = vpop.eup %5005  ;;  %v6127_v6 = vpop.permute.xlu1 %1698 }
0x1e12   :  { %v6129_v11 = vpop.permute.xlu0 %1701  ;;  %vm1703_vm15 = vcmp.eq.s32.totalorder %v6127_v6, 1  ;;  %v6267_v6 = vld [vmem:[#allocation11_spill] sm:$0xff] }
0x1e13   :  { %3578 = vperm.xlu1 %4624, %v3575_v7   ;;  %3798 = vrot.lane.b32.xlu0 %v3793_v28, %s5058_s5 }
0x1e14   :  { %v5008_v8 = vpop.eup %5007 }
0x1e15   :  { %v3954_v58 = vmul.f32 %v5008_v8, %v5006_v41  ;;  %v5010_v40 = vpop.eup %5009  ;;  %v6131_v3 = vpop.permute.xlu1 %1933 }
0x1e16   :  { %v6133_v53 = vpop.permute.xlu0 %1936  ;;  %vm1938_vm2 = vcmp.eq.s32.totalorder %v6131_v3, 1 }
0x1e17   :  { %5011 = vtanh.f32 %v3954_v58  ;;  %3813 = vperm.xlu1 %4624, %v3810_v31   ;;  %3581 = vperm.xlu0 %4623, %v3576_v9   ;;  %v4148_v9 = vmul.f32 -1.442695, %v6094_v32  ;;  %v3790_v32 = vmul.f32 %v5000_v5, %v5935_v50  ;;  %v295_v50 = vsel %vm293_vm5, %v5277_v24, 0.0 }
0x1e18   :  { %vm1704_vm5 = vcmp.eq.s32.totalorder %v6129_v11, 1 }
0x1e19   :  { %v6135_v7 = vpop.permute.xlu1 %2168  ;;  %5013 = vpow2.f32 %v4148_v9 }
0x1e1a   :  { %v6137_v28 = vpop.permute.xlu0 %2171  ;;  %vm2173_vm4 = vcmp.eq.s32.totalorder %v6135_v7, 1  ;;  %v6269_v7 = vld [vmem:[#allocation13_spill] sm:$0xff] }
0x1e1b   :  { %3816 = vperm.xlu0 %4623, %v3811_v1   ;;  %3959 = vrot.lane.b32.xlu1 %v5010_v40, %s5058_s5  ;;  %v4150_v1 = vmul.f32 -1.442695, %v6098_v14 }
0x1e1d   :  { %v6139_v41 = vpop.permute.xlu1 %2403  ;;  %5015 = vpow2.f32 %v4150_v1  ;;  %v3791_v1 = vmul.f32 %v6106_v57, %v5939_v23 }
0x1e1e   :  { %v6141_v8 = vpop.permute.xlu0 %2406 }
0x1e21   :  { %v5012_v49 = vpop.eup %5011  ;;  %v6143_v31 = vpop.permute.xlu1 %2638 }
0x1e22   :  { %3961 = vrot.lane.b32.xlu0 %v5012_v49, %s5058_s5  ;;  %v6146_v58 = vpop.permute.xlu0 %2641 }
0x1e23   :  { %v5014_v35 = vpop.eup %5013 }
0x1e24   :  { %v3777_v42 = vadd.f32 1.0, %v5014_v35  ;;  %v296_v35 = vsel %vm294_vm6, %v5281_v29, 0.0  ;;  %vm2408_vm6 = vcmp.eq.s32.totalorder %v6139_v41, 1 }
0x1e25   :  { %v6148_v40 = vpop.permute.xlu1 %2873 }
0x1e26   :  { %v6151_v49 = vpop.permute.xlu0 %2876  ;;  %5017 = vrcp.f32 %v3777_v42  ;;  %v531_v42 = vsel %vm529_vm9, %v5329_v25, %v296_v35  ;;  %vm2878_vm9 = vcmp.eq.s32.totalorder %v6148_v40, 1 }
0x1e27   :  { %v5016_v61 = vpop.eup %5015  ;;  %v766_v29 = vsel %vm764_vm11, %v5377_v19, %v531_v42 }
0x1e28   :  { %v3779_v14 = vadd.f32 1.0, %v5016_v61 }
0x1e29   :  { %v6153_v60 = vpop.permute.xlu1 %3108 }
0x1e2a   :  { %v6155_v10 = vpop.permute.xlu0 %3111  ;;  %vm3113_vm11 = vcmp.eq.s32.totalorder %v6153_v60, 1 }
0x1e2b   :  { %6259 = vst [vmem:[#allocation14_spill] sm:$0xff] %v6155_v10 }
0x1e2d   :  { %v6157_v20 = vpop.permute.xlu1 %3343 }
0x1e2e   :  { %v6160_v4 = vpop.permute.xlu0 %3346 }
0x1e30   :  { %v5018_v24 = vpop.eup %5017 }
0x1e32   :  { %v6260_v21 = vld [vmem:[#allocation14_spill] sm:$0xff] }
0x1e81   :  { %v3797_v51 = vpop.permute.xlu1 %3796 }
0x1e82   :  { %v3802_v9 = vadd.f32 %v3797_v51, %v3790_v32  ;;  %v530_v51 = vsel %vm528_vm7, %v5325_v22, %v295_v50  ;;  %vm2643_vm7 = vcmp.eq.s32.totalorder %v6143_v31, 1 }
0x1e83   :  { %v765_v61 = vsel %vm763_vm8, %v5373_v13, %v530_v51  ;;  %v1001_v13 = vsel %vm999_vm13, %v5425_v30, %v766_v29  ;;  %vm1939_vm8 = vcmp.eq.s32.totalorder %v6133_v53, 1  ;;  %vm3348_vm13 = vcmp.eq.s32.totalorder %v6157_v20, 1 }
0x1e84   :  { %5019 = vtanh.f32 %v3802_v9 }
0x1e85   :  { %v3799_v38 = vpop.permute.xlu0 %3798  ;;  %5021 = vrcp.f32 %v3779_v14 }
0x1e86   :  { %v3803_v10 = vadd.f32 %v3799_v38, %v3791_v1  ;;  %v1000_v38 = vsel %vm998_vm10, %v5421_v16, %v765_v61  ;;  %vm2174_vm10 = vcmp.eq.s32.totalorder %v6137_v28, 1  ;;  %v4156_v28 = vmul.f32 -1.442695, %v6269_v7 }
0x1e87   :  { %v1235_v22 = vsel %vm1233_vm12, %v5469_v34, %v1000_v38  ;;  %v1236_v34 = vsel %vm1234_vm0, %v5473_v37, %v1001_v13  ;;  %vm2409_vm12 = vcmp.eq.s32.totalorder %v6141_v8, 1  ;;  %vm2879_vm0 = vcmp.eq.s32.totalorder %v6151_v49, 1 }
0x1e88   :  { %5023 = vtanh.f32 %v3803_v10  ;;  %v1470_v25 = vsel %vm1468_vm14, %v5517_v44, %v1235_v22  ;;  %v1471_v5 = vsel %vm1469_vm3, %v5521_v46, %v1236_v34  ;;  %vm2644_vm14 = vcmp.eq.s32.totalorder %v6146_v58, 1 }
0x1e89   :  { %v1705_v16 = vsel %vm1703_vm15, %v5565_v54, %v1470_v25  ;;  %v1706_v54 = vsel %vm1704_vm5, %v5569_v56, %v1471_v5  ;;  %vm3349_vm3 = vcmp.eq.s32.totalorder %v6160_v4, 1  ;;  %v6268_v4 = vld [vmem:[#allocation12_spill] sm:$0xff] }
0x1e8a   :  { %v1940_v10 = vsel %vm1938_vm2, %v5613_v0, %v1705_v16  ;;  %vm3114_vm2 = vcmp.eq.s32.totalorder %v6260_v21, 1  ;;  %v4154_v53 = vmul.f32 -1.442695, %v6268_v4 }
0x1e8b   :  { %v2175_v44 = vsel %vm2173_vm4, %v5661_v39, %v1940_v10  ;;  %v1941_v39 = vsel %vm1939_vm8, %v5617_v2, %v1706_v54  ;;  %v6262_v2 = vld [vmem:[#allocation5_spill] sm:$0xff] }
0x1e8c   :  { %v2410_v37 = vsel %vm2408_vm6, %v5709_v62, %v2175_v44  ;;  %v2176_v63 = vsel %vm2174_vm10, %v5665_v17, %v1941_v39  ;;  %v6264_v17 = vld [vmem:[#allocation6_spill] sm:$0xff]  ;;  %5025 = vpow2.f32 %v4154_v53 }
0x1e8d   :  { %v2645_v46 = vsel %vm2643_vm7, %v5757_v47, %v2410_v37  ;;  %v2411_v60 = vsel %vm2409_vm12, %v5713_v45, %v2176_v63  ;;  %v6261_v47 = vld [vmem:[#allocation8_spill] sm:$0xff]  ;;  %v6266_v45 = vld [vmem:[#allocation9_spill] sm:$0xff]  ;;  %5027 = vpow2.f32 %v4156_v28 }
0x1e8e   :  { %v5020_v23 = vpop.eup %5019  ;;  %v2880_v56 = vsel %vm2878_vm9, %v5805_v18, %v2645_v46  ;;  %v2646_v33 = vsel %vm2644_vm14, %v6262_v2, %v2411_v60  ;;  %v6263_v18 = vld [vmem:[#allocation10_spill] sm:$0xff] }
0x1e8f   :  { %v3806_v19 = vmul.f32 %v5020_v23, %v5018_v24  ;;  %v5022_v30 = vpop.eup %5021  ;;  %v3115_v62 = vsel %vm3113_vm11, %v5853_v12, %v2880_v56  ;;  %v2881_v52 = vsel %vm2879_vm0, %v6264_v17, %v2646_v33  ;;  %v6265_v12 = vld [vmem:[#allocation7_spill] sm:$0xff] }
0x1e90   :  { %v3350_v20 = vsel %vm3348_vm13, %v6261_v47, %v3115_v62  ;;  %v3116_v27 = vsel %vm3114_vm2, %v6265_v12, %v2881_v52 }
0x1e91   :  { %v3351_v48 = vsel %vm3349_vm3, %v6266_v45, %v3116_v27 }
0x1e92   :  { %v5024_v57 = vpop.eup %5023  ;;  %v3579_v0 = vpop.permute.xlu1 %3578 }
0x1e93   :  { %v3807_v55 = vmul.f32 %v5024_v57, %v5022_v30  ;;  %vm3583_vm15 = vcmp.eq.s32.totalorder %v3579_v0, 1 }
0x1e94   :  { %v3585_v36 = vsel %vm3583_vm15, %v6263_v18, %v3350_v20 }
0x1e96   :  { %v3582_v26 = vpop.permute.xlu0 %3581  ;;  %v3814_v59 = vpop.permute.xlu1 %3813 }
0x1e97   :  { %vm3818_vm4 = vcmp.eq.s32.totalorder %v3814_v59, 1  ;;  %vm3584_vm5 = vcmp.eq.s32.totalorder %v3582_v26, 1  ;;  %v5026_v41 = vpop.eup %5025 }
0x1e98   :  { %v3820_v43 = vsel %vm3818_vm4, %v3806_v19, %v3585_v36  ;;  %v3586_v11 = vsel %vm3584_vm5, %v6267_v6, %v3351_v48  ;;  %v3940_v8 = vadd.f32 1.0, %v5026_v41  ;;  %v5028_v31 = vpop.eup %5027 }
0x1e99   :  { %3969 = vrot.lane.b32.xlu1 %v3820_v43, %s5058_s5  ;;  %v3942_v58 = vadd.f32 1.0, %v5028_v31 }
0x1e9a   :  { %v3817_v15 = vpop.permute.xlu0 %3816  ;;  %5029 = vrcp.f32 %v3940_v8  ;;  %v3960_v40 = vpop.permute.xlu1 %3959 }
0x1e9b   :  { %vm3819_vm6 = vcmp.eq.s32.totalorder %v3817_v15, 1  ;;  %5031 = vrcp.f32 %v3942_v58 }
0x1e9c   :  { %v3821_v3 = vsel %vm3819_vm6, %v3807_v55, %v3586_v11 }
0x1e9d   :  { %3971 = vrot.lane.b32.xlu0 %v3821_v3, %s5058_s5 }
0x1e9e   :  { %v3962_v9 = vpop.permute.xlu0 %3961 }
0x1ea4   :  { %v5030_v49 = vpop.eup %5029 }
0x1ea5   :  { %v3965_v32 = vmul.f32 %v5030_v49, %v3960_v40  ;;  %v5032_v50 = vpop.eup %5031 }
0x1ea6   :  { %v3966_v35 = vmul.f32 %v5032_v50, %v3962_v9 }
0x1f0b   :  { %v3970_v14 = vpop.permute.xlu1 %3969 }
0x1f0c   :  { %v3975_v1 = vsel %vm59_vm1, %v3970_v14, %v3965_v32 }
0x1f0d   :  { %3977 = vst [vmem:[#allocation2] sm:$0xff] %v3975_v1 }
0x1f0f   :  { %v3972_v51 = vpop.permute.xlu0 %3971 }
0x1f10   :  { %v3976_v61 = vsel %vm59_vm1, %v3972_v51, %v3966_v35 }
0x1f11   :  { %3978 = vst [vmem:[#allocation2 + $0x8] sm:$0xff] %v3976_v61 }
0x1f12   :  { %5044 = shalt.err (!%p5041_p4)
}
0x1f13   :  { %s5045_s25 = scalar_lea.hbm %s6240_s8, 256 }
0x1f14   :  { %p5046_p5 = scmp.ne.s32.totalorder %s6240_s8, %s5045_s25  ;;  %p5049_p6 = scmp.lt.u32.totalorder %s5045_s25, %s6240_s8 }
0x1f16   :  { %p5051_p7 = pnand %p5049_p6, %p5046_p5 }
0x1f18   :  { %5054 = shalt.err (!%p5051_p7)
}
0x1f19   :  { %s5061_s30 = smov 128   ;;  %s5062_s3 = smov 8  }
0x1f1a   :  { %3990 = dma.vmem_to_hbm [thread:$0]  %s3985_s1, 256, %s6240_s8, [#allocation3], %s5061_s30, %s5061_s30, %s5062_s3  }
0x1f1b   :  { %5055 = dma.done.wait [#allocation3], 256  }
0x1f1c   :  { %5056 = vsyncadd [#allocation3], 4294967040 }
0x1f1d   :  { %3994 = vsyncpa [#allocation3], 1 }

</bundles_post_ra>
